<compile_context>
chip_gen: v7x
topology: tpu7x:2x2x1
jax: 0.10.0
libtpu: 0.0.40
codegen_flags: <defaults>
</compile_context>

<pallas_src>
import functools

import jax
import jax.numpy as jnp
from jax.experimental import pallas as pl
from jax.experimental.pallas import tpu as pltpu

LANE = 128    # pad feature/hidden dims to the lane width -> lane-dense compute & stores
SUB = 8       # pad graph count to the sublane width
NEG = -1e30   # "minus infinity" sentinel baked into ealpha / assign bias


# ----------------------------------------------------------------------------
# Fused kernel: GATConv stack (heads=1, edge-attr attention) + GlobalAttention
#               pooling + final Linear.  Everything stays resident in VMEM.
# ----------------------------------------------------------------------------
def _mygat_fused_kernel(x_ref, ealpha_ref, w_ref, b_ref, assign_ref, wg_ref,
                        bg_ref, w1_ref, b1_ref, o_ref, *, num_layers, hidden):
    tiny = jnp.float32(1e-30)
    h = x_ref[...]                                            # [N, P] f32

    # ---------------- GATConv stack (h stays in VMEM across layers) ----------------
    for l in range(num_layers):
        # bf16 operands -> native MXU path; f32 accumulation.
        xw = jnp.dot(h.astype(jnp.bfloat16), w_ref[l],
                     preferred_element_type=jnp.float32)      # [N, P]
        # att_src / att_dst were pre-folded into columns hidden / hidden+1 of w_ref[l],
        # so the per-node attention scalars come out of the matmul for free.
        a_src = xw[:, hidden:hidden + 1]                      # [N, 1]
        a_dst = xw[:, hidden + 1:hidden + 2]                  # [N, 1]
        a_src_row = a_src.reshape(1, -1)                      # [1, N] (single-vreg relayout)

        # e[i, j] over edge j -> i; non-edges already carry -1e30 inside ealpha.
        logits = a_dst + a_src_row + ealpha_ref[l]            # [N, N]
        e = jnp.where(logits >= 0.0, logits, 0.2 * logits)    # leaky_relu(0.2)
        m = jnp.max(e, axis=-1, keepdims=True)                # self loop => real row max
        p = jnp.exp(e - m)                                    # non-edges underflow to 0
        denom = jnp.maximum(jnp.sum(p, axis=-1, keepdims=True), tiny)
        alpha = p * pl.reciprocal(denom, approx=True)         # EUP; err << bf16 matmul err

        h_new = jnp.dot(alpha.astype(jnp.bfloat16), xw.astype(jnp.bfloat16),
                        preferred_element_type=jnp.float32) + b_ref[l]
        # BasicGNN(jk=None): ReLU after every layer except the last.
        h = jnp.maximum(h_new, 0.0) if l < num_layers - 1 else h_new

    # ---------------- GlobalAttention pooling + final Linear ----------------
    gate = jnp.sum(h * wg_ref[...], axis=-1, keepdims=True) + bg_ref[...]   # [N, 1] (VPU)
    gm = gate.reshape(1, -1) + assign_ref[...]                # [Gp, N]; non-members -1e30
    m = jnp.max(gm, axis=-1, keepdims=True)                   # [Gp, 1]
    e = jnp.exp(gm - m)                                       # non-members underflow to 0
    denom = jnp.maximum(jnp.sum(e, axis=-1, keepdims=True), tiny)   # padded-graph-row guard
    alpha = e * pl.reciprocal(denom, approx=True)             # EUP slot

    pooled = jnp.dot(alpha.astype(jnp.bfloat16), h.astype(jnp.bfloat16),
                     preferred_element_type=jnp.float32)      # [Gp, P]
    out = jnp.dot(pooled.astype(jnp.bfloat16), w1_ref[...],
                  preferred_element_type=jnp.float32) + b1_ref[...]
    o_ref[...] = out                                          # lane-dense store


# ----------------------------------------------------------------------------
# Wrapper: JAX glue (dense graph structure + padding) + single pallas_call.
# ----------------------------------------------------------------------------
def _pad2(a, rows, cols):
    return jnp.zeros((rows, cols), jnp.float32).at[: a.shape[0], : a.shape[1]].set(a)


def mygat_forward(params, x, edge_index, edge_attr, batch, *, num_graphs):
    n, _ = x.shape
    hidden = params["lin1_w"].shape[0]
    layers = params["layers"]
    num_layers = len(layers)
    assert hidden + 2 <= LANE, "need two free padded lanes to pack att_src / att_dst"
    gp = ((num_graphs + SUB - 1) // SUB) * SUB

    src, dst = edge_index[0], edge_index[1]
    diag = jnp.arange(n)

    # Per-layer dense edge-attention planes built with ONE fused projection + ONE scatter:
    #   ealpha[l, i, j] = att_edge_l . lin_edge_l(e_{j->i})  for edges j -> i,
    #   mean edge feature on the self-loop diagonal (PyG fill_value='mean'),
    #   and -1e30 for non-edges (edge mask folded in -> no adjacency input, no selects).
    v_all = jnp.stack([lp["w_e"] @ lp["att_edge"] for lp in layers], axis=1)  # [edge_dim, L]
    per_edge = edge_attr @ v_all                                              # [E, L]
    loop_val = jnp.mean(edge_attr, axis=0) @ v_all                            # [L]
    ealpha = jnp.full((n, n, num_layers), NEG, jnp.float32)
    ealpha = ealpha.at[dst, src].set(per_edge)
    ealpha = ealpha.at[diag, diag].set(loop_val)
    ealpha = jnp.transpose(ealpha, (2, 0, 1))                                 # [L, N, N]

    # Zero-pad every feature dimension to the 128-lane width; pack (W @ att_src) and
    # (W @ att_dst) into the otherwise-zero columns `hidden` / `hidden+1` so the attention
    # projections ride the existing MXU matmul for free.  Weights ship as bf16.
    x_p = _pad2(x, n, LANE)
    w_stack = []
    for lp in layers:
        w = _pad2(lp["w"], LANE, LANE)
        w = w.at[: lp["w"].shape[0], hidden].set(lp["w"] @ lp["att_src"])
        w = w.at[: lp["w"].shape[0], hidden + 1].set(lp["w"] @ lp["att_dst"])
        w_stack.append(w)
    w_p = jnp.stack(w_stack).astype(jnp.bfloat16)                             # [L, P, P]
    b_p = jnp.stack([_pad2(lp["b"][None, :], 1, LANE) for lp in layers])      # [L, 1, P]

    # Pooling membership as an additive bias (0 for member, -1e30 otherwise).
    member = batch[None, :] == jnp.arange(gp, dtype=batch.dtype)[:, None]
    assign = jnp.where(member, 0.0, NEG).astype(jnp.float32)                  # [Gp, N]
    wg_p = _pad2(params["gate_w"].reshape(1, -1), 1, LANE)
    bg_p = params["gate_b"].reshape(1, 1)
    w1_p = _pad2(params["lin1_w"], LANE, LANE).astype(jnp.bfloat16)
    b1_p = _pad2(params["lin1_b"][None, :], 1, LANE)

    vmem = pl.BlockSpec(memory_space=pltpu.MemorySpace.VMEM)
    out_p = pl.pallas_call(
        functools.partial(_mygat_fused_kernel, num_layers=num_layers, hidden=hidden),
        out_shape=jax.ShapeDtypeStruct((gp, LANE), jnp.float32),
        in_specs=[vmem] * 9,
        out_specs=vmem,
        compiler_params=pltpu.CompilerParams(vmem_limit_bytes=32 * 1024 * 1024),
    )(x_p, ealpha, w_p, b_p, assign, wg_p, bg_p, w1_p, b1_p)

    return out_p[:num_graphs, :hidden]


# ----------------------------------------------------------------------------
# Deterministic parameter init (shapes follow GATConv heads=1 / GlobalAttention / Linear).
# ----------------------------------------------------------------------------
def init_params(key, num_features, num_layers, hidden, edge_dim):
    def uniform(k, shape, fan_in):
        bound = 1.0 / jnp.sqrt(jnp.float32(fan_in))
        return jax.random.uniform(k, shape, jnp.float32, -bound, bound)

    keys = jax.random.split(key, num_layers + 2)
    layers = []
    in_dim = num_features
    for i in range(num_layers):
        ks = jax.random.split(keys[i], 6)
        layers.append({
            "w": uniform(ks[0], (in_dim, hidden), in_dim),          # lin (no bias)
            "att_src": uniform(ks[1], (hidden,), hidden),
            "att_dst": uniform(ks[2], (hidden,), hidden),
            "w_e": uniform(ks[3], (edge_dim, hidden), edge_dim),    # lin_edge (no bias)
            "att_edge": uniform(ks[4], (hidden,), hidden),
            "b": uniform(ks[5], (hidden,), hidden),                 # GATConv bias
        })
        in_dim = hidden
    kgw, kgb = jax.random.split(keys[num_layers])
    klw, klb = jax.random.split(keys[num_layers + 1])
    return {
        "layers": layers,
        "gate_w": uniform(kgw, (hidden, 1), hidden),   # att.gate_nn = Linear(hidden, 1)
        "gate_b": uniform(kgb, (1,), hidden),
        "lin1_w": uniform(klw, (hidden, hidden), hidden),
        "lin1_b": uniform(klb, (hidden,), hidden),
    }


# ----------------------------------------------------------------------------
# Pure-JAX edge-wise reference (same math, PyG-style segment ops) for a check.
# ----------------------------------------------------------------------------
def reference_forward(params, x, edge_index, edge_attr, batch, num_graphs):
    n = x.shape[0]
    src, dst = edge_index[0], edge_index[1]
    diag = jnp.arange(n)
    src2 = jnp.concatenate([src, diag])
    dst2 = jnp.concatenate([dst, diag])
    eattr2 = jnp.concatenate(
        [edge_attr, jnp.tile(jnp.mean(edge_attr, axis=0)[None, :], (n, 1))], axis=0)

    layers = params["layers"]
    h = x
    for li, lp in enumerate(layers):
        xw = h @ lp["w"]
        a_src = xw @ lp["att_src"]
        a_dst = xw @ lp["att_dst"]
        a_edge = (eattr2 @ lp["w_e"]) @ lp["att_edge"]
        logits = a_src[src2] + a_dst[dst2] + a_edge
        logits = jnp.where(logits >= 0, logits, 0.2 * logits)
        m = jax.ops.segment_max(logits, dst2, num_segments=n)
        e = jnp.exp(logits - m[dst2])
        den = jax.ops.segment_sum(e, dst2, num_segments=n)
        alpha = e / den[dst2]
        h = jax.ops.segment_sum(alpha[:, None] * xw[src2], dst2, num_segments=n) + lp["b"]
        if li < len(layers) - 1:
            h = jnp.maximum(h, 0.0)

    gate = h @ params["gate_w"][:, 0] + params["gate_b"][0]
    m = jax.ops.segment_max(gate, batch, num_segments=num_graphs)
    e = jnp.exp(gate - m[batch])
    den = jax.ops.segment_sum(e, batch, num_segments=num_graphs)
    alpha = e / den[batch]
    pooled = jax.ops.segment_sum(alpha[:, None] * h, batch, num_segments=num_graphs)
    return pooled @ params["lin1_w"] + params["lin1_b"]


if __name__ == "__main__":
    num_nodes = 64
    num_features = 16
    hidden = 32
    num_layers = 3
    edge_dim = 8
    num_graphs = 4
    nodes_per_graph = num_nodes // num_graphs
    deg = 4

    key = jax.random.PRNGKey(0)
    k_x, k_e, k_p = jax.random.split(key, 3)

    x = jax.random.normal(k_x, (num_nodes, num_features), jnp.float32)
    # Deterministic unique edges, no self loops, within each graph: node -> next `deg` nodes.
    src = jnp.repeat(jnp.arange(num_nodes, dtype=jnp.int32), deg)
    off = jnp.tile(jnp.arange(1, deg + 1, dtype=jnp.int32), num_nodes)
    dst = (src // nodes_per_graph) * nodes_per_graph + (src % nodes_per_graph + off) % nodes_per_graph
    edge_index = jnp.stack([src, dst])
    edge_attr = jax.random.normal(k_e, (src.shape[0], edge_dim), jnp.float32)
    batch = jnp.repeat(jnp.arange(num_graphs, dtype=jnp.int32), nodes_per_graph)

    params = init_params(k_p, num_features, num_layers, hidden, edge_dim)

    fwd = jax.jit(functools.partial(mygat_forward, num_graphs=num_graphs))
    out = jax.block_until_ready(fwd(params, x, edge_index, edge_attr, batch))

    ref = reference_forward(params, x, edge_index, edge_attr, batch, num_graphs)
    assert out.shape == (num_graphs, hidden)
    # Tolerance loosened relative to the pure-f32 version because all MXU operands are bf16.
    assert jnp.allclose(out, ref, atol=5e-2, rtol=5e-2), (
        "mismatch vs reference, max abs diff = "
        f"{float(jnp.max(jnp.abs(out - ref)))}")
    print("KERNEL_OK")
</pallas_src>

<mosaic_0001>
module attributes {stable_mosaic.version = 11 : i64} {
  func.func @_mygat_fused_kernel(%arg0: memref<64x128xf32, #tpu.memory_space<vmem>>, %arg1: memref<3x64x64xf32, #tpu.memory_space<vmem>>, %arg2: memref<3x128x128xbf16, #tpu.memory_space<vmem>>, %arg3: memref<3x1x128xf32, #tpu.memory_space<vmem>>, %arg4: memref<8x64xf32, #tpu.memory_space<vmem>>, %arg5: memref<1x128xf32, #tpu.memory_space<vmem>>, %arg6: memref<1x1xf32, #tpu.memory_space<vmem>>, %arg7: memref<128x128xbf16, #tpu.memory_space<vmem>>, %arg8: memref<1x128xf32, #tpu.memory_space<vmem>>, %arg9: memref<8x128xf32, #tpu.memory_space<vmem>>) attributes {dimension_semantics = [], scalar_prefetch = 0 : i64, scratch_operands = 0 : i64, tpu.core_type = #tpu.core_type<tc>} {
    %c0 = arith.constant 0 : index
    %c0_0 = arith.constant 0 : index
    %0 = vector.load %arg0[%c0, %c0_0] : memref<64x128xf32, #tpu.memory_space<vmem>>, vector<64x128xf32>
    %1 = arith.truncf %0 : vector<64x128xf32> to vector<64x128xbf16>
    %c0_1 = arith.constant 0 : index
    %c0_2 = arith.constant 0 : index
    %c0_3 = arith.constant 0 : index
    %2 = vector.load %arg2[%c0_1, %c0_2, %c0_3] : memref<3x128x128xbf16, #tpu.memory_space<vmem>>, vector<1x128x128xbf16>
    %3 = vector.shape_cast %2 : vector<1x128x128xbf16> to vector<128x128xbf16>
    %cst = arith.constant dense<0.000000e+00> : vector<64x128xf32>
    %4 = tpu.matmul %1, %3, %cst {dimension_numbers = #tpu.dot_dimension_numbers<[1], [0], [0], [1], [0, 0, 1, 1], [], []>} : vector<64x128xbf16>, vector<128x128xbf16>, vector<64x128xf32> -> vector<64x128xf32>
    %5 = vector.extract_strided_slice %4 {offsets = [0, 32], sizes = [64, 1], strides = [1, 1]} : vector<64x128xf32> to vector<64x1xf32>
    %6 = vector.extract_strided_slice %4 {offsets = [0, 33], sizes = [64, 1], strides = [1, 1]} : vector<64x128xf32> to vector<64x1xf32>
    %7 = vector.shape_cast %5 : vector<64x1xf32> to vector<1x64xf32>
    %8 = vector.broadcast %6 : vector<64x1xf32> to vector<64x64xf32>
    %9 = vector.broadcast %7 : vector<1x64xf32> to vector<64x64xf32>
    %10 = arith.addf %8, %9 : vector<64x64xf32>
    %c0_4 = arith.constant 0 : index
    %c0_5 = arith.constant 0 : index
    %c0_6 = arith.constant 0 : index
    %11 = vector.load %arg1[%c0_4, %c0_5, %c0_6] : memref<3x64x64xf32, #tpu.memory_space<vmem>>, vector<1x64x64xf32>
    %12 = vector.shape_cast %11 : vector<1x64x64xf32> to vector<64x64xf32>
    %13 = arith.addf %10, %12 : vector<64x64xf32>
    %cst_7 = arith.constant 0.000000e+00 : f32
    %14 = vector.broadcast %cst_7 : f32 to vector<64x64xf32>
    %15 = arith.cmpf oge, %13, %14 : vector<64x64xf32>
    %cst_8 = arith.constant 2.000000e-01 : f32
    %16 = vector.broadcast %cst_8 : f32 to vector<64x64xf32>
    %17 = arith.mulf %16, %13 : vector<64x64xf32>
    %18 = arith.select %15, %13, %17 : vector<64x64xi1>, vector<64x64xf32>
    %cst_9 = arith.constant dense<0xFF800000> : vector<64xf32>
    %19 = vector.multi_reduction <maximumf>, %18, %cst_9 [1] : vector<64x64xf32> to vector<64xf32>
    %20 = vector.shape_cast %19 : vector<64xf32> to vector<64x1xf32>
    %21 = vector.broadcast %20 : vector<64x1xf32> to vector<64x64xf32>
    %22 = arith.subf %18, %21 : vector<64x64xf32>
    %23 = math.exp %22 : vector<64x64xf32>
    %cst_10 = arith.constant dense<0.000000e+00> : vector<64xf32>
    %24 = vector.multi_reduction <add>, %23, %cst_10 [1] : vector<64x64xf32> to vector<64xf32>
    %25 = vector.shape_cast %24 : vector<64xf32> to vector<64x1xf32>
    %cst_11 = arith.constant 1.000000e-30 : f32
    %26 = vector.broadcast %cst_11 : f32 to vector<64x1xf32>
    %27 = arith.maximumf %25, %26 : vector<64x1xf32>
    %28 = tpu.reciprocal %27 {approx = true} : vector<64x1xf32> -> vector<64x1xf32>
    %29 = vector.broadcast %28 : vector<64x1xf32> to vector<64x64xf32>
    %30 = arith.mulf %23, %29 : vector<64x64xf32>
    %31 = arith.truncf %30 : vector<64x64xf32> to vector<64x64xbf16>
    %32 = arith.truncf %4 : vector<64x128xf32> to vector<64x128xbf16>
    %cst_12 = arith.constant dense<0.000000e+00> : vector<64x128xf32>
    %33 = tpu.matmul %31, %32, %cst_12 {dimension_numbers = #tpu.dot_dimension_numbers<[1], [0], [0], [1], [0, 0, 1, 1], [], []>} : vector<64x64xbf16>, vector<64x128xbf16>, vector<64x128xf32> -> vector<64x128xf32>
    %c0_13 = arith.constant 0 : index
    %c0_14 = arith.constant 0 : index
    %c0_15 = arith.constant 0 : index
    %34 = vector.load %arg3[%c0_13, %c0_14, %c0_15] : memref<3x1x128xf32, #tpu.memory_space<vmem>>, vector<1x1x128xf32>
    %35 = vector.shape_cast %34 : vector<1x1x128xf32> to vector<1x128xf32>
    %36 = vector.broadcast %35 : vector<1x128xf32> to vector<64x128xf32>
    %37 = arith.addf %33, %36 : vector<64x128xf32>
    %cst_16 = arith.constant 0.000000e+00 : f32
    %38 = vector.broadcast %cst_16 : f32 to vector<64x128xf32>
    %39 = arith.maximumf %37, %38 : vector<64x128xf32>
    %40 = arith.truncf %39 : vector<64x128xf32> to vector<64x128xbf16>
    %c1 = arith.constant 1 : index
    %c0_17 = arith.constant 0 : index
    %c0_18 = arith.constant 0 : index
    %41 = vector.load %arg2[%c1, %c0_17, %c0_18] : memref<3x128x128xbf16, #tpu.memory_space<vmem>>, vector<1x128x128xbf16>
    %42 = vector.shape_cast %41 : vector<1x128x128xbf16> to vector<128x128xbf16>
    %cst_19 = arith.constant dense<0.000000e+00> : vector<64x128xf32>
    %43 = tpu.matmul %40, %42, %cst_19 {dimension_numbers = #tpu.dot_dimension_numbers<[1], [0], [0], [1], [0, 0, 1, 1], [], []>} : vector<64x128xbf16>, vector<128x128xbf16>, vector<64x128xf32> -> vector<64x128xf32>
    %44 = vector.extract_strided_slice %43 {offsets = [0, 32], sizes = [64, 1], strides = [1, 1]} : vector<64x128xf32> to vector<64x1xf32>
    %45 = vector.extract_strided_slice %43 {offsets = [0, 33], sizes = [64, 1], strides = [1, 1]} : vector<64x128xf32> to vector<64x1xf32>
    %46 = vector.shape_cast %44 : vector<64x1xf32> to vector<1x64xf32>
    %47 = vector.broadcast %45 : vector<64x1xf32> to vector<64x64xf32>
    %48 = vector.broadcast %46 : vector<1x64xf32> to vector<64x64xf32>
    %49 = arith.addf %47, %48 : vector<64x64xf32>
    %c1_20 = arith.constant 1 : index
    %c0_21 = arith.constant 0 : index
    %c0_22 = arith.constant 0 : index
    %50 = vector.load %arg1[%c1_20, %c0_21, %c0_22] : memref<3x64x64xf32, #tpu.memory_space<vmem>>, vector<1x64x64xf32>
    %51 = vector.shape_cast %50 : vector<1x64x64xf32> to vector<64x64xf32>
    %52 = arith.addf %49, %51 : vector<64x64xf32>
    %cst_23 = arith.constant 0.000000e+00 : f32
    %53 = vector.broadcast %cst_23 : f32 to vector<64x64xf32>
    %54 = arith.cmpf oge, %52, %53 : vector<64x64xf32>
    %cst_24 = arith.constant 2.000000e-01 : f32
    %55 = vector.broadcast %cst_24 : f32 to vector<64x64xf32>
    %56 = arith.mulf %55, %52 : vector<64x64xf32>
    %57 = arith.select %54, %52, %56 : vector<64x64xi1>, vector<64x64xf32>
    %cst_25 = arith.constant dense<0xFF800000> : vector<64xf32>
    %58 = vector.multi_reduction <maximumf>, %57, %cst_25 [1] : vector<64x64xf32> to vector<64xf32>
    %59 = vector.shape_cast %58 : vector<64xf32> to vector<64x1xf32>
    %60 = vector.broadcast %59 : vector<64x1xf32> to vector<64x64xf32>
    %61 = arith.subf %57, %60 : vector<64x64xf32>
    %62 = math.exp %61 : vector<64x64xf32>
    %cst_26 = arith.constant dense<0.000000e+00> : vector<64xf32>
    %63 = vector.multi_reduction <add>, %62, %cst_26 [1] : vector<64x64xf32> to vector<64xf32>
    %64 = vector.shape_cast %63 : vector<64xf32> to vector<64x1xf32>
    %cst_27 = arith.constant 1.000000e-30 : f32
    %65 = vector.broadcast %cst_27 : f32 to vector<64x1xf32>
    %66 = arith.maximumf %64, %65 : vector<64x1xf32>
    %67 = tpu.reciprocal %66 {approx = true} : vector<64x1xf32> -> vector<64x1xf32>
    %68 = vector.broadcast %67 : vector<64x1xf32> to vector<64x64xf32>
    %69 = arith.mulf %62, %68 : vector<64x64xf32>
    %70 = arith.truncf %69 : vector<64x64xf32> to vector<64x64xbf16>
    %71 = arith.truncf %43 : vector<64x128xf32> to vector<64x128xbf16>
    %cst_28 = arith.constant dense<0.000000e+00> : vector<64x128xf32>
    %72 = tpu.matmul %70, %71, %cst_28 {dimension_numbers = #tpu.dot_dimension_numbers<[1], [0], [0], [1], [0, 0, 1, 1], [], []>} : vector<64x64xbf16>, vector<64x128xbf16>, vector<64x128xf32> -> vector<64x128xf32>
    %c1_29 = arith.constant 1 : index
    %c0_30 = arith.constant 0 : index
    %c0_31 = arith.constant 0 : index
    %73 = vector.load %arg3[%c1_29, %c0_30, %c0_31] : memref<3x1x128xf32, #tpu.memory_space<vmem>>, vector<1x1x128xf32>
    %74 = vector.shape_cast %73 : vector<1x1x128xf32> to vector<1x128xf32>
    %75 = vector.broadcast %74 : vector<1x128xf32> to vector<64x128xf32>
    %76 = arith.addf %72, %75 : vector<64x128xf32>
    %cst_32 = arith.constant 0.000000e+00 : f32
    %77 = vector.broadcast %cst_32 : f32 to vector<64x128xf32>
    %78 = arith.maximumf %76, %77 : vector<64x128xf32>
    %79 = arith.truncf %78 : vector<64x128xf32> to vector<64x128xbf16>
    %c2 = arith.constant 2 : index
    %c0_33 = arith.constant 0 : index
    %c0_34 = arith.constant 0 : index
    %80 = vector.load %arg2[%c2, %c0_33, %c0_34] : memref<3x128x128xbf16, #tpu.memory_space<vmem>>, vector<1x128x128xbf16>
    %81 = vector.shape_cast %80 : vector<1x128x128xbf16> to vector<128x128xbf16>
    %cst_35 = arith.constant dense<0.000000e+00> : vector<64x128xf32>
    %82 = tpu.matmul %79, %81, %cst_35 {dimension_numbers = #tpu.dot_dimension_numbers<[1], [0], [0], [1], [0, 0, 1, 1], [], []>} : vector<64x128xbf16>, vector<128x128xbf16>, vector<64x128xf32> -> vector<64x128xf32>
    %83 = vector.extract_strided_slice %82 {offsets = [0, 32], sizes = [64, 1], strides = [1, 1]} : vector<64x128xf32> to vector<64x1xf32>
    %84 = vector.extract_strided_slice %82 {offsets = [0, 33], sizes = [64, 1], strides = [1, 1]} : vector<64x128xf32> to vector<64x1xf32>
    %85 = vector.shape_cast %83 : vector<64x1xf32> to vector<1x64xf32>
    %86 = vector.broadcast %84 : vector<64x1xf32> to vector<64x64xf32>
    %87 = vector.broadcast %85 : vector<1x64xf32> to vector<64x64xf32>
    %88 = arith.addf %86, %87 : vector<64x64xf32>
    %c2_36 = arith.constant 2 : index
    %c0_37 = arith.constant 0 : index
    %c0_38 = arith.constant 0 : index
    %89 = vector.load %arg1[%c2_36, %c0_37, %c0_38] : memref<3x64x64xf32, #tpu.memory_space<vmem>>, vector<1x64x64xf32>
    %90 = vector.shape_cast %89 : vector<1x64x64xf32> to vector<64x64xf32>
    %91 = arith.addf %88, %90 : vector<64x64xf32>
    %cst_39 = arith.constant 0.000000e+00 : f32
    %92 = vector.broadcast %cst_39 : f32 to vector<64x64xf32>
    %93 = arith.cmpf oge, %91, %92 : vector<64x64xf32>
    %cst_40 = arith.constant 2.000000e-01 : f32
    %94 = vector.broadcast %cst_40 : f32 to vector<64x64xf32>
    %95 = arith.mulf %94, %91 : vector<64x64xf32>
    %96 = arith.select %93, %91, %95 : vector<64x64xi1>, vector<64x64xf32>
    %cst_41 = arith.constant dense<0xFF800000> : vector<64xf32>
    %97 = vector.multi_reduction <maximumf>, %96, %cst_41 [1] : vector<64x64xf32> to vector<64xf32>
    %98 = vector.shape_cast %97 : vector<64xf32> to vector<64x1xf32>
    %99 = vector.broadcast %98 : vector<64x1xf32> to vector<64x64xf32>
    %100 = arith.subf %96, %99 : vector<64x64xf32>
    %101 = math.exp %100 : vector<64x64xf32>
    %cst_42 = arith.constant dense<0.000000e+00> : vector<64xf32>
    %102 = vector.multi_reduction <add>, %101, %cst_42 [1] : vector<64x64xf32> to vector<64xf32>
    %103 = vector.shape_cast %102 : vector<64xf32> to vector<64x1xf32>
    %cst_43 = arith.constant 1.000000e-30 : f32
    %104 = vector.broadcast %cst_43 : f32 to vector<64x1xf32>
    %105 = arith.maximumf %103, %104 : vector<64x1xf32>
    %106 = tpu.reciprocal %105 {approx = true} : vector<64x1xf32> -> vector<64x1xf32>
    %107 = vector.broadcast %106 : vector<64x1xf32> to vector<64x64xf32>
    %108 = arith.mulf %101, %107 : vector<64x64xf32>
    %109 = arith.truncf %108 : vector<64x64xf32> to vector<64x64xbf16>
    %110 = arith.truncf %82 : vector<64x128xf32> to vector<64x128xbf16>
    %cst_44 = arith.constant dense<0.000000e+00> : vector<64x128xf32>
    %111 = tpu.matmul %109, %110, %cst_44 {dimension_numbers = #tpu.dot_dimension_numbers<[1], [0], [0], [1], [0, 0, 1, 1], [], []>} : vector<64x64xbf16>, vector<64x128xbf16>, vector<64x128xf32> -> vector<64x128xf32>
    %c2_45 = arith.constant 2 : index
    %c0_46 = arith.constant 0 : index
    %c0_47 = arith.constant 0 : index
    %112 = vector.load %arg3[%c2_45, %c0_46, %c0_47] : memref<3x1x128xf32, #tpu.memory_space<vmem>>, vector<1x1x128xf32>
    %113 = vector.shape_cast %112 : vector<1x1x128xf32> to vector<1x128xf32>
    %114 = vector.broadcast %113 : vector<1x128xf32> to vector<64x128xf32>
    %115 = arith.addf %111, %114 : vector<64x128xf32>
    %c0_48 = arith.constant 0 : index
    %c0_49 = arith.constant 0 : index
    %116 = vector.load %arg5[%c0_48, %c0_49] : memref<1x128xf32, #tpu.memory_space<vmem>>, vector<1x128xf32>
    %117 = vector.broadcast %116 : vector<1x128xf32> to vector<64x128xf32>
    %118 = arith.mulf %115, %117 : vector<64x128xf32>
    %cst_50 = arith.constant dense<0.000000e+00> : vector<64xf32>
    %119 = vector.multi_reduction <add>, %118, %cst_50 [1] : vector<64x128xf32> to vector<64xf32>
    %120 = vector.shape_cast %119 : vector<64xf32> to vector<64x1xf32>
    %c0_51 = arith.constant 0 : index
    %c0_52 = arith.constant 0 : index
    %121 = vector.load %arg6[%c0_51, %c0_52] : memref<1x1xf32, #tpu.memory_space<vmem>>, vector<1x1xf32>
    %122 = vector.broadcast %121 : vector<1x1xf32> to vector<64x1xf32>
    %123 = arith.addf %120, %122 : vector<64x1xf32>
    %124 = vector.shape_cast %123 : vector<64x1xf32> to vector<1x64xf32>
    %c0_53 = arith.constant 0 : index
    %c0_54 = arith.constant 0 : index
    %125 = vector.load %arg4[%c0_53, %c0_54] : memref<8x64xf32, #tpu.memory_space<vmem>>, vector<8x64xf32>
    %126 = vector.broadcast %124 : vector<1x64xf32> to vector<8x64xf32>
    %127 = arith.addf %126, %125 : vector<8x64xf32>
    %cst_55 = arith.constant dense<0xFF800000> : vector<8xf32>
    %128 = vector.multi_reduction <maximumf>, %127, %cst_55 [1] : vector<8x64xf32> to vector<8xf32>
    %129 = vector.shape_cast %128 : vector<8xf32> to vector<8x1xf32>
    %130 = vector.broadcast %129 : vector<8x1xf32> to vector<8x64xf32>
    %131 = arith.subf %127, %130 : vector<8x64xf32>
    %132 = math.exp %131 : vector<8x64xf32>
    %cst_56 = arith.constant dense<0.000000e+00> : vector<8xf32>
    %133 = vector.multi_reduction <add>, %132, %cst_56 [1] : vector<8x64xf32> to vector<8xf32>
    %134 = vector.shape_cast %133 : vector<8xf32> to vector<8x1xf32>
    %cst_57 = arith.constant 1.000000e-30 : f32
    %135 = vector.broadcast %cst_57 : f32 to vector<8x1xf32>
    %136 = arith.maximumf %134, %135 : vector<8x1xf32>
    %137 = tpu.reciprocal %136 {approx = true} : vector<8x1xf32> -> vector<8x1xf32>
    %138 = vector.broadcast %137 : vector<8x1xf32> to vector<8x64xf32>
    %139 = arith.mulf %132, %138 : vector<8x64xf32>
    %140 = arith.truncf %139 : vector<8x64xf32> to vector<8x64xbf16>
    %141 = arith.truncf %115 : vector<64x128xf32> to vector<64x128xbf16>
    %cst_58 = arith.constant dense<0.000000e+00> : vector<8x128xf32>
    %142 = tpu.matmul %140, %141, %cst_58 {dimension_numbers = #tpu.dot_dimension_numbers<[1], [0], [0], [1], [0, 0, 1, 1], [], []>} : vector<8x64xbf16>, vector<64x128xbf16>, vector<8x128xf32> -> vector<8x128xf32>
    %143 = arith.truncf %142 : vector<8x128xf32> to vector<8x128xbf16>
    %c0_59 = arith.constant 0 : index
    %c0_60 = arith.constant 0 : index
    %144 = vector.load %arg7[%c0_59, %c0_60] : memref<128x128xbf16, #tpu.memory_space<vmem>>, vector<128x128xbf16>
    %cst_61 = arith.constant dense<0.000000e+00> : vector<8x128xf32>
    %145 = tpu.matmul %143, %144, %cst_61 {dimension_numbers = #tpu.dot_dimension_numbers<[1], [0], [0], [1], [0, 0, 1, 1], [], []>} : vector<8x128xbf16>, vector<128x128xbf16>, vector<8x128xf32> -> vector<8x128xf32>
    %c0_62 = arith.constant 0 : index
    %c0_63 = arith.constant 0 : index
    %146 = vector.load %arg8[%c0_62, %c0_63] : memref<1x128xf32, #tpu.memory_space<vmem>>, vector<1x128xf32>
    %147 = vector.broadcast %146 : vector<1x128xf32> to vector<8x128xf32>
    %148 = arith.addf %145, %147 : vector<8x128xf32>
    %c0_64 = arith.constant 0 : index
    %c0_65 = arith.constant 0 : index
    %149 = vector.load %arg9[%c0_64, %c0_65] : memref<8x128xf32, #tpu.memory_space<vmem>>, vector<8x128xf32>
    tpu.vector_store %arg9[%c0_64, %c0_65], %148 {strides = array<i32>} : memref<8x128xf32, #tpu.memory_space<vmem>>, vector<8x128xf32>,
    return
  }
}

</mosaic_0001>

<bundles_post_ra>
// kernel: mygat_forward.1
= control target key start
LH: loop header
LB: loop body
LE: loop exit
PB: predicated region body
PF: predicated region fallthrough
CT: control target
= control target key end

     0   :  { %v4894_v1 = vmov 32   ;;  %v4895_v27 = vmov 33   ;;  %v240_v34 = vlaneseq  ;;  %vm251_vm0 = vcmask 130112   ;;  %s7061_s2 = inlined_call_operand.vmem [shape: bf16[3,128,128], index: 2, kind: input, shape index: {}]   ;;  %s7062_s0 = inlined_call_operand.vmem [shape: f32[64,128], index: 0, kind: input, shape index: {}]   ;;  %s7063_s1 = inlined_call_operand.vmem [shape: f32[3,64,64], index: 1, kind: input, shape index: {}]   ;;  %s7064_s3 = inlined_call_operand.vmem [shape: f32[3,1,128], index: 3, kind: input, shape index: {}]   ;;  %s7065_s4 = inlined_call_operand.vmem [shape: f32[8,64], index: 4, kind: input, shape index: {}]   ;;  %s7066_s6 = inlined_call_operand.<no memory space> [shape: f32[1,1], index: 6, kind: input, shape index: {}]   ;;  %s7067_s5 = inlined_call_operand.vmem [shape: f32[1,128], index: 5, kind: input, shape index: {}]   ;;  %s7068_s7 = inlined_call_operand.vmem [shape: bf16[128,128], index: 7, kind: input, shape index: {}]   ;;  %s7069_s8 = inlined_call_operand.vmem [shape: f32[1,128], index: 8, kind: input, shape index: {}]   ;;  %s7070_s9 = inlined_call_operand.vmem [shape: f32[8,128], index: 9, kind: output, shape index: {}]  }
   0x1   :  { %v4636_v0 = vld [vmem:[%s7061_s2] sm:$0xff]   ;;  %4616 = vset.pattern.permute.xlu1 %v4894_v1  ;;  %4617 = vset.pattern.permute.xlu0 %v4894_v1  ;;  %v4637_v2 = vld [vmem:[%s7061_s2 + $0x8] sm:$0xff]   ;;  %v4638_v3 = vld [vmem:[%s7061_s2 + $0x10] sm:$0xff]   ;;  %vm258_vm1 = vcmask 195712   ;;  %vm265_vm2 = vcmask 261312   ;;  %vm272_vm3 = vcmask 326912  }
   0x2   :  { %4459 = vmatprep.subr.bf16.mxu0 %v4636_v0  ;;  %v4639_v4 = vld [vmem:[%s7061_s2 + $0x18] sm:$0xff]   ;;  %v35_v5 = vld [vmem:[%s7062_s0] sm:$0xff]  ;;  %v36_v6 = vld [vmem:[%s7062_s0 + $0x8] sm:$0xff]  ;;  %v241_v37 = vand.u32 127, %v240_v34  ;;  %v5005_v39 = vshrl.u32 %v240_v34, 7  ;;  %vm279_vm4 = vcmask 392512  }
   0x3   :  { %4460 = vmatpush3.bf16.msra.mxu0 %v4636_v0  ;;  %v43_v7 = vpack.c.bf16 %v36_v6, %v35_v5  ;;  %v4640_v8 = vld [vmem:[%s7061_s2 + $0x20] sm:$0xff]   ;;  %v4641_v9 = vld [vmem:[%s7061_s2 + $0x28] sm:$0xff]   ;;  %v4642_v10 = vld [vmem:[%s7061_s2 + $0x30] sm:$0xff]   ;;  %vm286_vm5 = vcmask 458112   ;;  %vm293_vm6 = vcmask 523712   ;;  %vm357_vm7 = vcmask 523264  }
   0x4   :  { %4461 = vmatprep.subr.bf16.mxu0 %v4637_v2  ;;  %v4643_v11 = vld [vmem:[%s7061_s2 + $0x38] sm:$0xff]   ;;  %v37_v12 = vld [vmem:[%s7062_s0 + $0x10] sm:$0xff]  ;;  %v39_v14 = vld [vmem:[%s7062_s0 + $0x20] sm:$0xff]  ;;  %v246_v38 = vadd.s32 4294967288, %v241_v37  ;;  %v253_v42 = vadd.s32 4294967280, %v241_v37  ;;  %v5011_v44 = vsub.s32 %v241_v37, %v5005_v39  ;;  %v260_v45 = vadd.s32 4294967272, %v241_v37 }
   0x5   :  { %4475 = vmatprep.mubr.bf16.mxu0 %v43_v7  ;;  %v38_v13 = vld [vmem:[%s7062_s0 + $0x18] sm:$0xff]  ;;  %v40_v15 = vld [vmem:[%s7062_s0 + $0x28] sm:$0xff]  ;;  %v41_v18 = vld [vmem:[%s7062_s0 + $0x30] sm:$0xff]  ;;  %v267_v50 = vadd.s32 4294967264, %v241_v37  ;;  %v274_v52 = vadd.s32 4294967256, %v241_v37  ;;  %v281_v53 = vadd.s32 4294967248, %v241_v37 }
   0x6   :  { %v44_v16 = vpack.c.bf16 %v38_v13, %v37_v12  ;;  %v45_v17 = vpack.c.bf16 %v40_v15, %v39_v14  ;;  %v42_v19 = vld [vmem:[%s7062_s0 + $0x38] sm:$0xff]  ;;  %v5008_v43 = vsub.s32 %v246_v38, %v5005_v39  ;;  %7227 = vst [vmem:[#allocation4_spill] sm:$0xff] %v5011_v44  ;;  %v5014_v48 = vsub.s32 %v253_v42, %v5005_v39  ;;  %v318_v13 = vld [vmem:[%s7063_s1 + $0x8] sm:$0xff] }
   0x7   :  { %4462 = vmatpush3.bf16.msra.mxu0 %v4637_v2  ;;  %v46_v20 = vpack.c.bf16 %v42_v19, %v41_v18  ;;  %v5019_v54 = vsub.s32 %v260_v45, %v5005_v39  ;;  %v288_v55 = vadd.s32 4294967240, %v241_v37  ;;  %v5024_v60 = vsub.s32 %v267_v50, %v5005_v39  ;;  %v320_v18 = vld [vmem:[%s7063_s1 + $0x18] sm:$0xff]  ;;  %v317_v19 = vld [vmem:[%s7063_s1] sm:$0xff] }
   0x8   :  { %4463 = vmatprep.subr.bf16.mxu0 %v4638_v3  ;;  %7226 = vst [vmem:[#allocation3_spill] sm:$0xff] %v5008_v43  ;;  %7228 = vst [vmem:[#allocation5_spill] sm:$0xff] %v5014_v48  ;;  %v5027_v61 = vsub.s32 %v274_v52, %v5005_v39  ;;  %v5031_v63 = vsub.s32 %v281_v53, %v5005_v39  ;;  %v324_v45 = vld [vmem:[%s7063_s1 + $0x38] sm:$0xff] }
   0x9   :  { %7229 = vst [vmem:[#allocation6_spill] sm:$0xff] %v5019_v54  ;;  %7230 = vst [vmem:[#allocation7_spill] sm:$0xff] %v5024_v60  ;;  %v5035_v2 = vsub.s32 %v288_v55, %v5005_v39 }
   0xa   :  { %7231 = vst [vmem:[#allocation8_spill] sm:$0xff] %v5027_v61  ;;  %7232 = vst [vmem:[#allocation9_spill] sm:$0xff] %v5031_v63 }
   0xb   :  { %4464 = vmatpush3.bf16.msra.mxu0 %v4638_v3  ;;  %7233 = vst [vmem:[#allocation10_spill] sm:$0xff] %v5035_v2 }
   0xc   :  { %4465 = vmatprep.subr.bf16.mxu0 %v4639_v4 }
   0xf   :  { %4466 = vmatpush3.bf16.msra.mxu0 %v4639_v4 }
  0x10   :  { %4467 = vmatprep.subr.bf16.mxu0 %v4640_v8 }
  0x13   :  { %4468 = vmatpush3.bf16.msra.mxu0 %v4640_v8 }
  0x14   :  { %4469 = vmatprep.subr.bf16.mxu0 %v4641_v9 }
  0x17   :  { %4470 = vmatpush3.bf16.msra.mxu0 %v4641_v9 }
  0x18   :  { %4471 = vmatprep.subr.bf16.mxu0 %v4642_v10 }
  0x1b   :  { %4472 = vmatpush3.bf16.msra.mxu0 %v4642_v10 }
  0x1c   :  { %4473 = vmatprep.subr.bf16.mxu0 %v4643_v11 }
  0x1f   :  { %4474 = vmatpush3.bf16.msra.mxu0 %v4643_v11 }
  0x22   :  { %4476 = vmatmul.mubr.bf16.vlgmr.msra.gmra.mrb[0].mxu0 %v44_v16 }
  0x23   :  { %4479 = vmatprep.mubr.bf16.mxu0 %v45_v17  ;;  %v319_v17 = vld [vmem:[%s7063_s1 + $0x10] sm:$0xff] }
  0x2a   :  { %4480 = vmatmul.mubr.bf16.gmra.mrb[4].mxu0 %v46_v20 }
  0xf5   :  { %v4477_v21 = vpop.f32.mrb[0].mxu0 }
  0xf6   :  { %223 = vperm.xlu1 %4616, %v4477_v21   ;;  %v145_v22 = vpop.f32.mrb[1].mxu0 }
  0xf7   :  { %217 = vperm.xlu0 %4617, %v145_v22   ;;  %v4478_v23 = vpop.f32.mrb[2].mxu0 }
  0xf8   :  { %v459_v24 = vpack.c.bf16 %v4478_v23, %v4477_v21  ;;  %v148_v25 = vpop.f32.mrb[3].mxu0 }
  0xf9   :  { %v458_v26 = vpack.c.bf16 %v148_v25, %v145_v22 }
  0xfa   :  { %226 = vperm.xlu1 %4616, %v4478_v23  }
  0xfb   :  { %4618 = vset.pattern.permute.xlu0 %v4895_v27  ;;  %4483 = vmatprep.subr.bf16.mxu1 %v458_v26 }
  0xfc   :  { %178 = vperm.xlu0 %4618, %v145_v22   ;;  %4484 = vmatpush3.bf16.msra.mxu1 %v458_v26 }
  0xfd   :  { %v4481_v28 = vpop.f32.mrb[4].mxu0  ;;  %4485 = vmatprep.subr.bf16.mxu1 %v459_v24 }
  0xfe   :  { %v161_v29 = vpop.f32.mrb[5].mxu0 }
  0xff   :  { %v4482_v30 = vpop.f32.mrb[6].mxu0 }
 0x100   :  { %v461_v31 = vpack.c.bf16 %v4482_v30, %v4481_v28  ;;  %4619 = vset.pattern.permute.xlu0 %v4894_v1  ;;  %4486 = vmatpush3.bf16.msra.mxu1 %v459_v24  ;;  %v164_v32 = vpop.f32.mrb[7].mxu0 }
 0x101   :  { %238 = vperm.xlu1 %4616, %v4482_v30   ;;  %v460_v33 = vpack.c.bf16 %v164_v32, %v161_v29  ;;  %220 = vperm.xlu0 %4619, %v148_v25  }
 0x103   :  { %4487 = vmatprep.subr.bf16.mxu1 %v460_v33 }
 0x104   :  { %4488 = vmatpush3.bf16.msra.mxu1 %v460_v33 }
 0x105   :  { %232 = vperm.xlu1 %4616, %v164_v32   ;;  %235 = vperm.xlu0 %4619, %v4481_v28  }
 0x106   :  { %4489 = vmatprep.subr.bf16.mxu1 %v461_v31 }
 0x108   :  { %4490 = vmatpush3.bf16.msra.mxu1 %v461_v31 }
 0x109   :  { %4620 = vset.pattern.permute.xlu1 %v4895_v27  ;;  %229 = vperm.xlu0 %4619, %v161_v29  }
 0x10a   :  { %183 = vperm.xlu1 %4620, %v148_v25  }
 0x10d   :  { %4621 = vset.pattern.permute.xlu0 %v4895_v27 }
 0x10e   :  { %188 = vperm.xlu1 %4620, %v4477_v21   ;;  %193 = vperm.xlu0 %4621, %v4478_v23  }
 0x112   :  { %198 = vperm.xlu1 %4620, %v161_v29   ;;  %203 = vperm.xlu0 %4621, %v164_v32  }
 0x116   :  { %208 = vperm.xlu1 %4620, %v4481_v28   ;;  %213 = vperm.xlu0 %4621, %v4482_v30   ;;  %v321_v28 = vld [vmem:[%s7063_s1 + $0x20] sm:$0xff]  ;;  %v322_v30 = vld [vmem:[%s7063_s1 + $0x28] sm:$0xff] }
 0x11a   :  { %4623 = vset.pattern.permute.xlu1 %v4894_v1  ;;  %4622 = vset.pattern.permute.xlu0 %v4894_v1 }
 0x175   :  { %v224_v35 = vpop.permute.xlu1 %223 }
 0x176   :  { %v218_v36 = vpop.permute.xlu0 %217  ;;  %v257_v59 = vrot.slane %v224_v35, %v5014_v48 }
 0x177   :  { %v245_v51 = vrot.slane %v218_v36, %v5011_v44 }
 0x179   :  { %v227_v41 = vpop.permute.xlu1 %226 }
 0x17a   :  { %v264_v0 = vrot.slane %v227_v41, %v5019_v54  ;;  %v323_v41 = vld [vmem:[%s7063_s1 + $0x30] sm:$0xff] }
 0x17b   :  { %v179_v40 = vpop.permute.xlu0 %178 }
 0x180   :  { %v239_v46 = vpop.permute.xlu1 %238  ;;  %v221_v47 = vpop.permute.xlu0 %220 }
 0x181   :  { %v250_v49 = vrot.slane %v221_v47, %v5008_v43  ;;  %v292_v10 = vrot.slane %v239_v46, %v5035_v2 }
 0x183   :  { %v252_v56 = vsel %vm251_vm0, %v250_v49, %v245_v51 }
 0x184   :  { %v233_v57 = vpop.permute.xlu1 %232  ;;  %v236_v58 = vpop.permute.xlu0 %235  ;;  %v259_v62 = vsel %vm258_vm1, %v257_v59, %v252_v56 }
 0x185   :  { %v278_v6 = vrot.slane %v233_v57, %v5027_v61  ;;  %v266_v7 = vsel %vm265_vm2, %v264_v0, %v259_v62  ;;  %v285_v8 = vrot.slane %v236_v58, %v5031_v63 }
 0x188   :  { %v230_v3 = vpop.permute.xlu0 %229 }
 0x189   :  { %v271_v4 = vrot.slane %v230_v3, %v5024_v60  ;;  %v184_v5 = vpop.permute.xlu1 %183 }
 0x18b   :  { %v273_v9 = vsel %vm272_vm3, %v271_v4, %v266_v7 }
 0x18c   :  { %v280_v11 = vsel %vm279_vm4, %v278_v6, %v273_v9 }
 0x18d   :  { %v287_v12 = vsel %vm286_vm5, %v285_v8, %v280_v11  ;;  %v189_v14 = vpop.permute.xlu1 %188  ;;  %v194_v15 = vpop.permute.xlu0 %193 }
 0x18e   :  { %v294_v16 = vsel %vm293_vm6, %v292_v10, %v287_v12 }
 0x18f   :  { %v310_v20 = vadd.f32 %v294_v16, %v184_v5  ;;  %v311_v21 = vadd.f32 %v294_v16, %v189_v14  ;;  %v312_v22 = vadd.f32 %v294_v16, %v194_v15  ;;  %v309_v23 = vadd.f32 %v294_v16, %v179_v40 }
 0x191   :  { %v326_v24 = vadd.f32 %v318_v13, %v310_v20  ;;  %v327_v25 = vadd.f32 %v319_v17, %v311_v21  ;;  %v328_v26 = vadd.f32 %v320_v18, %v312_v22  ;;  %v199_v29 = vpop.permute.xlu1 %198  ;;  %v204_v31 = vpop.permute.xlu0 %203  ;;  %v325_v32 = vadd.f32 %v317_v19, %v309_v23 }
 0x192   :  { %v313_v33 = vadd.f32 %v294_v16, %v199_v29  ;;  %v314_v34 = vadd.f32 %v294_v16, %v204_v31 }
 0x193   :  { %vm333_vm8 = vcmp.ge.f32.partialorder %v325_v32, 0.0  ;;  %v341_v35 = vmul.f32 0.2, %v325_v32  ;;  %vm334_vm9 = vcmp.ge.f32.partialorder %v326_v24, 0.0  ;;  %v342_v36 = vmul.f32 0.2, %v326_v24 }
 0x194   :  { %v329_v37 = vadd.f32 %v321_v28, %v313_v33  ;;  %v330_v38 = vadd.f32 %v322_v30, %v314_v34  ;;  %vm336_vm10 = vcmp.ge.f32.partialorder %v328_v26, 0.0  ;;  %v344_v40 = vmul.f32 0.2, %v328_v26 }
 0x195   :  { %v209_v42 = vpop.permute.xlu1 %208  ;;  %v214_v46 = vpop.permute.xlu0 %213  ;;  %v349_v47 = vsel %vm333_vm8, %v325_v32, %v341_v35  ;;  %v350_v49 = vsel %vm334_vm9, %v326_v24, %v342_v36  ;;  %vm335_vm11 = vcmp.ge.f32.partialorder %v327_v25, 0.0  ;;  %v343_v50 = vmul.f32 0.2, %v327_v25 }
 0x196   :  { %v315_v51 = vadd.f32 %v294_v16, %v209_v42  ;;  %v316_v52 = vadd.f32 %v294_v16, %v214_v46  ;;  %v358_v53 = vsel %vm357_vm7, %v349_v47, -inf  ;;  %v361_v55 = vsel %vm357_vm7, %v350_v49, -inf }
 0x197   :  { %359 = vmax.xlane.f32.xlu1 %v358_v53  ;;  %362 = vmax.xlane.f32.xlu0 %v361_v55  ;;  %v352_v56 = vsel %vm336_vm10, %v328_v26, %v344_v40  ;;  %v351_v57 = vsel %vm335_vm11, %v327_v25, %v343_v50  ;;  %v346_v58 = vmul.f32 0.2, %v330_v38  ;;  %vm338_vm12 = vcmp.ge.f32.partialorder %v330_v38, 0.0 }
 0x198   :  { %v331_v59 = vadd.f32 %v323_v41, %v315_v51  ;;  %v332_v62 = vadd.f32 %v324_v45, %v316_v52  ;;  %vm337_vm13 = vcmp.ge.f32.partialorder %v329_v37, 0.0  ;;  %v345_v0 = vmul.f32 0.2, %v329_v37 }
 0x199   :  { %v367_v3 = vsel %vm357_vm7, %v352_v56, -inf  ;;  %v364_v4 = vsel %vm357_vm7, %v351_v57, -inf  ;;  %v354_v5 = vsel %vm338_vm12, %v330_v38, %v346_v58 }
 0x19a   :  { %v353_v6 = vsel %vm337_vm13, %v329_v37, %v345_v0  ;;  %v348_v7 = vmul.f32 0.2, %v332_v62  ;;  %v347_v8 = vmul.f32 0.2, %v331_v59  ;;  %vm340_vm14 = vcmp.ge.f32.partialorder %v332_v62, 0.0  ;;  %v4644_v0 = vld [vmem:[%s7061_s2 + $0x40] sm:$0xff]  }
 0x19b   :  { %368 = vmax.xlane.f32.xlu1 %v367_v3  ;;  %365 = vmax.xlane.f32.xlu0 %v364_v4  ;;  %vm339_vm15 = vcmp.ge.f32.partialorder %v331_v59, 0.0  ;;  %v373_v9 = vsel %vm357_vm7, %v354_v5, -inf  ;;  %v370_v10 = vsel %vm357_vm7, %v353_v6, -inf }
 0x19c   :  { %v356_v11 = vsel %vm340_vm14, %v332_v62, %v348_v7  ;;  %v355_v12 = vsel %vm339_vm15, %v331_v59, %v347_v8  ;;  %4499 = vmatprep.subr.bf16.mxu1 %v4644_v0 }
 0x19d   :  { %v379_v13 = vsel %vm357_vm7, %v356_v11, -inf  ;;  %v376_v14 = vsel %vm357_vm7, %v355_v12, -inf }
 0x19f   :  { %374 = vmax.xlane.f32.xlu1 %v373_v9  ;;  %371 = vmax.xlane.f32.xlu0 %v370_v10 }
 0x1a3   :  { %380 = vmax.xlane.f32.xlu1 %v379_v13  ;;  %377 = vmax.xlane.f32.xlu0 %v376_v14 }
 0x224   :  { %v363_v15 = vpop.xlane.xlu0 %362  ;;  %v360_v16 = vpop.xlane.xlu1 %359 }
 0x225   :  { %v383_v17 = vsub.f32 %v350_v49, %v363_v15  ;;  %v382_v18 = vsub.f32 %v349_v47, %v360_v16 }
 0x227   :  { %v392_v19 = vmul.f32 1.442695, %v383_v17  ;;  %v390_v20 = vmul.f32 1.442695, %v382_v18 }
 0x228   :  { %v366_v21 = vpop.xlane.xlu0 %365  ;;  %v369_v22 = vpop.xlane.xlu1 %368 }
 0x229   :  { %4668 = vpow2.f32 %v392_v19  ;;  %v384_v23 = vsub.f32 %v351_v57, %v366_v21  ;;  %v385_v24 = vsub.f32 %v352_v56, %v369_v22 }
 0x22a   :  { %4670 = vpow2.f32 %v390_v20 }
 0x22b   :  { %v394_v25 = vmul.f32 1.442695, %v384_v23  ;;  %v396_v26 = vmul.f32 1.442695, %v385_v24 }
 0x22c   :  { %v372_v28 = vpop.xlane.xlu0 %371  ;;  %v375_v29 = vpop.xlane.xlu1 %374 }
 0x22d   :  { %4672 = vpow2.f32 %v394_v25  ;;  %v386_v30 = vsub.f32 %v353_v6, %v372_v28  ;;  %v387_v31 = vsub.f32 %v354_v5, %v375_v29 }
 0x22e   :  { %4674 = vpow2.f32 %v396_v26 }
 0x22f   :  { %v398_v32 = vmul.f32 1.442695, %v386_v30  ;;  %v400_v33 = vmul.f32 1.442695, %v387_v31  ;;  %v4645_v31 = vld [vmem:[%s7061_s2 + $0x48] sm:$0xff]  }
 0x230   :  { %v378_v34 = vpop.xlane.xlu0 %377  ;;  %v381_v35 = vpop.xlane.xlu1 %380 }
 0x231   :  { %4676 = vpow2.f32 %v398_v32  ;;  %v388_v36 = vsub.f32 %v355_v12, %v378_v34  ;;  %v389_v37 = vsub.f32 %v356_v11, %v381_v35 }
 0x232   :  { %4678 = vpow2.f32 %v400_v33 }
 0x233   :  { %v4669_v38 = vpop.eup %4668  ;;  %v402_v40 = vmul.f32 1.442695, %v388_v36  ;;  %v404_v41 = vmul.f32 1.442695, %v389_v37  ;;  %v4646_v37 = vld [vmem:[%s7061_s2 + $0x50] sm:$0xff]  }
 0x234   :  { %v4671_v42 = vpop.eup %4670  ;;  %v409_v45 = vsel %vm357_vm7, %v4669_v38, 0.0 }
 0x235   :  { %4680 = vpow2.f32 %v402_v40  ;;  %410 = vadd.xlane.f32.xlu1 %v409_v45  ;;  %v406_v46 = vsel %vm357_vm7, %v4671_v42, 0.0  ;;  %v4647_v45 = vld [vmem:[%s7061_s2 + $0x58] sm:$0xff]  }
 0x236   :  { %4682 = vpow2.f32 %v404_v41  ;;  %407 = vadd.xlane.f32.xlu0 %v406_v46  ;;  %v4648_v46 = vld [vmem:[%s7061_s2 + $0x60] sm:$0xff]  }
 0x237   :  { %v4673_v47 = vpop.eup %4672 }
 0x238   :  { %v4675_v49 = vpop.eup %4674  ;;  %v412_v50 = vsel %vm357_vm7, %v4673_v47, 0.0 }
 0x239   :  { %v415_v51 = vsel %vm357_vm7, %v4675_v49, 0.0 }
 0x23a   :  { %413 = vadd.xlane.f32.xlu0 %v412_v50  ;;  %416 = vadd.xlane.f32.xlu1 %v415_v51  ;;  %v4651_v50 = vld [vmem:[%s7061_s2 + $0x78] sm:$0xff]   ;;  %v4292_v51 = vld [vmem:[%s7064_s3] ss:$0 sm:$0xff] }
 0x23b   :  { %v4677_v52 = vpop.eup %4676 }
 0x23c   :  { %v4679_v53 = vpop.eup %4678  ;;  %v418_v55 = vsel %vm357_vm7, %v4677_v52, 0.0 }
 0x23d   :  { %v421_v56 = vsel %vm357_vm7, %v4679_v53, 0.0 }
 0x23e   :  { %419 = vadd.xlane.f32.xlu0 %v418_v55  ;;  %422 = vadd.xlane.f32.xlu1 %v421_v56 }
 0x23f   :  { %v4681_v57 = vpop.eup %4680 }
 0x240   :  { %v4683_v58 = vpop.eup %4682  ;;  %v424_v59 = vsel %vm357_vm7, %v4681_v57, 0.0 }
 0x241   :  { %v427_v62 = vsel %vm357_vm7, %v4683_v58, 0.0 }
 0x242   :  { %425 = vadd.xlane.f32.xlu0 %v424_v59  ;;  %428 = vadd.xlane.f32.xlu1 %v427_v62 }
 0x2c2   :  { %v411_v3 = vpop.xlane.xlu1 %410 }
 0x2c3   :  { %v408_v4 = vpop.xlane.xlu0 %407  ;;  %v431_v5 = vmax.f32 %v411_v3, 1e-30 }
 0x2c4   :  { %v430_v6 = vmax.f32 %v408_v4, 1e-30 }
 0x2c5   :  { %4684 = vrcp.f32 %v431_v5 }
 0x2c6   :  { %4686 = vrcp.f32 %v430_v6 }
 0x2c7   :  { %v414_v7 = vpop.xlane.xlu0 %413  ;;  %v417_v8 = vpop.xlane.xlu1 %416 }
 0x2c8   :  { %v432_v9 = vmax.f32 %v414_v7, 1e-30  ;;  %v433_v10 = vmax.f32 %v417_v8, 1e-30 }
 0x2ca   :  { %4688 = vrcp.f32 %v432_v9 }
 0x2cb   :  { %4690 = vrcp.f32 %v433_v10  ;;  %v420_v11 = vpop.xlane.xlu0 %419  ;;  %v423_v12 = vpop.xlane.xlu1 %422 }
 0x2cc   :  { %v434_v13 = vmax.f32 %v420_v11, 1e-30  ;;  %v435_v14 = vmax.f32 %v423_v12, 1e-30 }
 0x2ce   :  { %4692 = vrcp.f32 %v434_v13 }
 0x2cf   :  { %v4685_v15 = vpop.eup %4684  ;;  %4694 = vrcp.f32 %v435_v14  ;;  %v426_v16 = vpop.xlane.xlu0 %425 }
 0x2d0   :  { %v429_v17 = vpop.xlane.xlu1 %428  ;;  %v4687_v18 = vpop.eup %4686  ;;  %v436_v19 = vmax.f32 %v426_v16, 1e-30  ;;  %v447_v21 = vmul.f32 %v4685_v15, %v4669_v38 }
 0x2d1   :  { %v437_v20 = vmax.f32 %v429_v17, 1e-30  ;;  %v446_v22 = vmul.f32 %v4687_v18, %v4671_v42 }
 0x2d2   :  { %4696 = vrcp.f32 %v436_v19 }
 0x2d3   :  { %4698 = vrcp.f32 %v437_v20  ;;  %v454_v23 = vpack.c.bf16 %v447_v21, %v446_v22 }
 0x2d4   :  { %v4689_v24 = vpop.eup %4688 }
 0x2d5   :  { %v4691_v25 = vpop.eup %4690  ;;  %4491 = vmatprep.mubr.msk.bf16.mxu1 %vm357_vm7, %v454_v23  ;;  %v448_v26 = vmul.f32 %v4689_v24, %v4673_v47  ;;  %v4649_v47 = vld [vmem:[%s7061_s2 + $0x68] sm:$0xff]  }
 0x2d6   :  { %v449_v28 = vmul.f32 %v4691_v25, %v4675_v49  ;;  %v4650_v49 = vld [vmem:[%s7061_s2 + $0x70] sm:$0xff]  }
 0x2d8   :  { %v4693_v29 = vpop.eup %4692  ;;  %v455_v30 = vpack.c.bf16 %v449_v28, %v448_v26 }
 0x2d9   :  { %v4695_v32 = vpop.eup %4694  ;;  %v450_v33 = vmul.f32 %v4693_v29, %v4677_v52 }
 0x2da   :  { %4492 = vmatmul.mubr.msk.bf16.vlgmr.msra.gmra.mrb[0].mxu1 %vm357_vm7, %v455_v30  ;;  %v451_v34 = vmul.f32 %v4695_v32, %v4679_v53 }
 0x2db   :  { %4500 = vmatpush3.bf16.msra.mxu1 %v4644_v0 }
 0x2dc   :  { %v4697_v35 = vpop.eup %4696  ;;  %v456_v36 = vpack.c.bf16 %v451_v34, %v450_v33  ;;  %4501 = vmatprep.subr.bf16.mxu1 %v4645_v31 }
 0x2dd   :  { %v4699_v38 = vpop.eup %4698  ;;  %v452_v40 = vmul.f32 %v4697_v35, %v4681_v57 }
 0x2de   :  { %4495 = vmatprep.mubr.msk.bf16.mxu1 %vm357_vm7, %v456_v36  ;;  %v453_v41 = vmul.f32 %v4699_v38, %v4683_v58 }
 0x2df   :  { %4502 = vmatpush3.bf16.msra.mxu1 %v4645_v31 }
 0x2e0   :  { %v457_v42 = vpack.c.bf16 %v453_v41, %v452_v40  ;;  %4503 = vmatprep.subr.bf16.mxu1 %v4646_v37 }
 0x2e2   :  { %4496 = vmatmul.mubr.msk.bf16.gmra.mrb[4].mxu1 %vm357_vm7, %v457_v42 }
 0x2e3   :  { %4504 = vmatpush3.bf16.msra.mxu1 %v4646_v37 }
 0x2e4   :  { %4505 = vmatprep.subr.bf16.mxu1 %v4647_v45 }
 0x2e7   :  { %4506 = vmatpush3.bf16.msra.mxu1 %v4647_v45 }
 0x2e8   :  { %4507 = vmatprep.subr.bf16.mxu1 %v4648_v46 }
 0x2eb   :  { %4508 = vmatpush3.bf16.msra.mxu1 %v4648_v46 }
 0x2ec   :  { %4509 = vmatprep.subr.bf16.mxu1 %v4649_v47 }
 0x2ef   :  { %4510 = vmatpush3.bf16.msra.mxu1 %v4649_v47 }
 0x2f0   :  { %4511 = vmatprep.subr.bf16.mxu1 %v4650_v49 }
 0x2f3   :  { %4512 = vmatpush3.bf16.msra.mxu1 %v4650_v49 }
 0x2f4   :  { %4513 = vmatprep.subr.bf16.mxu1 %v4651_v50 }
 0x2f7   :  { %4514 = vmatpush3.bf16.msra.mxu1 %v4651_v50 }
 0x3ad   :  { %v4493_v52 = vpop.f32.mrb[0].mxu1 }
 0x3ae   :  { %v524_v53 = vadd.f32 %v4493_v52, %v4292_v51  ;;  %v515_v55 = vpop.f32.mrb[1].mxu1 }
 0x3af   :  { %v516_v56 = vadd.f32 %v4292_v51, %v515_v55  ;;  %v4494_v57 = vpop.f32.mrb[2].mxu1 }
 0x3b0   :  { %v527_v58 = vadd.f32 %v4494_v57, %v4292_v51  ;;  %v518_v59 = vpop.f32.mrb[3].mxu1  ;;  %v548_v0 = vmax.f32 %v524_v53, 0.0 }
 0x3b1   :  { %v519_v62 = vadd.f32 %v4292_v51, %v518_v59  ;;  %v546_v4 = vmax.f32 %v516_v56, 0.0 }
 0x3b2   :  { %v549_v3 = vmax.f32 %v527_v58, 0.0 }
 0x3b3   :  { %v547_v5 = vmax.f32 %v519_v62, 0.0 }
 0x3b4   :  { %v555_v6 = vpack.c.bf16 %v549_v3, %v548_v0 }
 0x3b5   :  { %v554_v7 = vpack.c.bf16 %v547_v5, %v546_v4  ;;  %v4497_v8 = vpop.f32.mrb[4].mxu1 }
 0x3b6   :  { %v540_v9 = vadd.f32 %v4497_v8, %v4292_v51  ;;  %v531_v10 = vpop.f32.mrb[5].mxu1 }
 0x3b7   :  { %v532_v11 = vadd.f32 %v4292_v51, %v531_v10  ;;  %v4498_v12 = vpop.f32.mrb[6].mxu1  ;;  %4515 = vmatprep.mubr.bf16.mxu1 %v554_v7  ;;  %v4321_v10 = vld [vmem:[%s7063_s1 + $0x40] sm:$0xff] }
 0x3b8   :  { %v543_v13 = vadd.f32 %v4498_v12, %v4292_v51  ;;  %v534_v14 = vpop.f32.mrb[7].mxu1  ;;  %4516 = vmatmul.mubr.bf16.vlgmr.msra.gmra.mrb[8].mxu1 %v555_v6  ;;  %v552_v16 = vmax.f32 %v540_v9, 0.0  ;;  %v4323_v6 = vld [vmem:[%s7063_s1 + $0x50] sm:$0xff]  ;;  %v4322_v9 = vld [vmem:[%s7063_s1 + $0x48] sm:$0xff] }
 0x3b9   :  { %v535_v15 = vadd.f32 %v4292_v51, %v534_v14  ;;  %v550_v18 = vmax.f32 %v532_v11, 0.0  ;;  %v4325_v11 = vld [vmem:[%s7063_s1 + $0x60] sm:$0xff] }
 0x3ba   :  { %v553_v17 = vmax.f32 %v543_v13, 0.0 }
 0x3bb   :  { %v551_v19 = vmax.f32 %v535_v15, 0.0 }
 0x3bc   :  { %v557_v20 = vpack.c.bf16 %v553_v17, %v552_v16  ;;  %v4327_v17 = vld [vmem:[%s7063_s1 + $0x70] sm:$0xff] }
 0x3bd   :  { %v556_v21 = vpack.c.bf16 %v551_v19, %v550_v18 }
 0x3bf   :  { %4519 = vmatprep.mubr.bf16.mxu1 %v556_v21 }
 0x3c0   :  { %4520 = vmatmul.mubr.bf16.gmra.mrb[12].mxu1 %v557_v20 }
 0x48b   :  { %v4517_v22 = vpop.f32.mrb[8].mxu1 }
 0x48c   :  { %735 = vperm.xlu1 %4623, %v4517_v22   ;;  %v657_v23 = vpop.f32.mrb[9].mxu1 }
 0x48d   :  { %729 = vperm.xlu0 %4622, %v657_v23   ;;  %v4518_v24 = vpop.f32.mrb[10].mxu1 }
 0x48e   :  { %v948_v25 = vpack.c.bf16 %v4518_v24, %v4517_v22  ;;  %v660_v26 = vpop.f32.mrb[11].mxu1 }
 0x48f   :  { %v947_v28 = vpack.c.bf16 %v660_v26, %v657_v23 }
 0x490   :  { %4624 = vset.pattern.permute.xlu1 %v4895_v27 }
 0x491   :  { %690 = vperm.xlu1 %4624, %v657_v23   ;;  %4626 = vset.pattern.permute.xlu0 %v4895_v27  ;;  %v4324_v23 = vld [vmem:[%s7063_s1 + $0x58] sm:$0xff] }
 0x492   :  { %4523 = vmatprep.subr.bf16.mxu1 %v947_v28  ;;  %695 = vperm.xlu0 %4626, %v660_v26  }
 0x493   :  { %4524 = vmatpush3.bf16.msra.mxu1 %v947_v28  ;;  %v4521_v29 = vpop.f32.mrb[12].mxu1 }
 0x494   :  { %4525 = vmatprep.subr.bf16.mxu1 %v948_v25  ;;  %v673_v30 = vpop.f32.mrb[13].mxu1 }
 0x495   :  { %4625 = vset.pattern.permute.xlu1 %v4894_v1  ;;  %v4522_v31 = vpop.f32.mrb[14].mxu1 }
 0x496   :  { %v950_v32 = vpack.c.bf16 %v4522_v31, %v4521_v29  ;;  %738 = vperm.xlu1 %4625, %v4518_v24   ;;  %710 = vperm.xlu0 %4626, %v673_v30   ;;  %v676_v33 = vpop.f32.mrb[15].mxu1 }
 0x497   :  { %4526 = vmatpush3.bf16.msra.mxu1 %v948_v25  ;;  %v949_v34 = vpack.c.bf16 %v676_v33, %v673_v30 }
 0x499   :  { %4527 = vmatprep.subr.bf16.mxu1 %v949_v34 }
 0x49a   :  { %732 = vperm.xlu1 %4625, %v660_v26   ;;  %720 = vperm.xlu0 %4626, %v4521_v29  }
 0x49b   :  { %4528 = vmatpush3.bf16.msra.mxu1 %v949_v34  ;;  %v4326_v34 = vld [vmem:[%s7063_s1 + $0x68] sm:$0xff] }
 0x49c   :  { %4529 = vmatprep.subr.bf16.mxu1 %v950_v32 }
 0x49e   :  { %747 = vperm.xlu1 %4625, %v4521_v29   ;;  %4629 = vset.pattern.permute.xlu0 %v4894_v1 }
 0x49f   :  { %4530 = vmatpush3.bf16.msra.mxu1 %v950_v32 }
 0x4a2   :  { %741 = vperm.xlu1 %4625, %v673_v30  }
 0x4a6   :  { %750 = vperm.xlu1 %4625, %v4522_v31  }
 0x4aa   :  { %744 = vperm.xlu1 %4625, %v676_v33  }
 0x4ae   :  { %4627 = vset.pattern.permute.xlu1 %v4895_v27 }
 0x4af   :  { %700 = vperm.xlu1 %4627, %v4517_v22  }
 0x4b3   :  { %705 = vperm.xlu1 %4627, %v4518_v24  }
 0x4b7   :  { %715 = vperm.xlu1 %4627, %v676_v33  }
 0x4bb   :  { %725 = vperm.xlu1 %4627, %v4522_v31  }
 0x4bf   :  { %4628 = vset.pattern.permute.xlu1 %v4894_v1 }
 0x50b   :  { %v736_v35 = vpop.permute.xlu1 %735 }
 0x50c   :  { %v730_v40 = vpop.permute.xlu0 %729  ;;  %v764_v50 = vrot.slane %v736_v35, %v5014_v48 }
 0x50d   :  { %v755_v46 = vrot.slane %v730_v40, %v5011_v44 }
 0x510   :  { %v691_v36 = vpop.permute.xlu1 %690 }
 0x511   :  { %v696_v47 = vpop.permute.xlu0 %695 }
 0x515   :  { %v739_v37 = vpop.permute.xlu1 %738  ;;  %v711_v56 = vpop.permute.xlu0 %710 }
 0x516   :  { %v769_v55 = vrot.slane %v739_v37, %v5019_v54 }
 0x519   :  { %v733_v38 = vpop.permute.xlu1 %732  ;;  %v721_v12 = vpop.permute.xlu0 %720 }
 0x51a   :  { %v759_v42 = vrot.slane %v733_v38, %v5008_v43 }
 0x51c   :  { %v760_v49 = vsel %vm251_vm0, %v759_v42, %v755_v46 }
 0x51d   :  { %v748_v41 = vpop.permute.xlu1 %747  ;;  %v765_v52 = vsel %vm258_vm1, %v764_v50, %v760_v49  ;;  %v4328_v49 = vld [vmem:[%s7063_s1 + $0x78] sm:$0xff] }
 0x51e   :  { %v770_v58 = vsel %vm265_vm2, %v769_v55, %v765_v52  ;;  %v784_v62 = vrot.slane %v748_v41, %v5031_v63 }
 0x521   :  { %v742_v45 = vpop.permute.xlu1 %741 }
 0x522   :  { %v774_v53 = vrot.slane %v742_v45, %v5024_v60 }
 0x524   :  { %v775_v0 = vsel %vm272_vm3, %v774_v53, %v770_v58 }
 0x525   :  { %v751_v51 = vpop.permute.xlu1 %750 }
 0x526   :  { %v789_v3 = vrot.slane %v751_v51, %v5035_v2 }
 0x529   :  { %v745_v57 = vpop.permute.xlu1 %744 }
 0x52a   :  { %v779_v59 = vrot.slane %v745_v57, %v5027_v61 }
 0x52c   :  { %v780_v4 = vsel %vm279_vm4, %v779_v59, %v775_v0 }
 0x52d   :  { %v785_v5 = vsel %vm286_vm5, %v784_v62, %v780_v4 }
 0x52e   :  { %v790_v7 = vsel %vm293_vm6, %v789_v3, %v785_v5  ;;  %v701_v8 = vpop.permute.xlu1 %700 }
 0x52f   :  { %v800_v13 = vadd.f32 %v790_v7, %v701_v8  ;;  %v799_v14 = vadd.f32 %v790_v7, %v696_v47  ;;  %v798_v15 = vadd.f32 %v790_v7, %v691_v36  ;;  %v802_v16 = vadd.f32 %v790_v7, %v711_v56 }
 0x530   :  { %v804_v18 = vadd.f32 %v790_v7, %v721_v12 }
 0x531   :  { %v817_v19 = vadd.f32 %v4323_v6, %v800_v13  ;;  %v816_v20 = vadd.f32 %v4322_v9, %v799_v14  ;;  %v815_v21 = vadd.f32 %v4321_v10, %v798_v15  ;;  %v819_v22 = vadd.f32 %v4325_v11, %v802_v16 }
 0x532   :  { %v706_v24 = vpop.permute.xlu1 %705  ;;  %v821_v25 = vadd.f32 %v4327_v17, %v804_v18 }
 0x533   :  { %v801_v26 = vadd.f32 %v790_v7, %v706_v24  ;;  %vm824_vm8 = vcmp.ge.f32.partialorder %v816_v20, 0.0  ;;  %v832_v28 = vmul.f32 0.2, %v816_v20  ;;  %vm823_vm9 = vcmp.ge.f32.partialorder %v815_v21, 0.0 }
 0x534   :  { %v831_v29 = vmul.f32 0.2, %v815_v21  ;;  %vm827_vm10 = vcmp.ge.f32.partialorder %v819_v22, 0.0  ;;  %v835_v30 = vmul.f32 0.2, %v819_v22  ;;  %vm825_vm11 = vcmp.ge.f32.partialorder %v817_v19, 0.0 }
 0x535   :  { %v818_v31 = vadd.f32 %v4324_v23, %v801_v26  ;;  %v840_v32 = vsel %vm824_vm8, %v816_v20, %v832_v28  ;;  %v833_v33 = vmul.f32 0.2, %v817_v19  ;;  %v837_v42 = vmul.f32 0.2, %v821_v25 }
 0x536   :  { %v716_v35 = vpop.permute.xlu1 %715  ;;  %v850_v36 = vsel %vm357_vm7, %v840_v32, -inf  ;;  %v839_v37 = vsel %vm823_vm9, %v815_v21, %v831_v29  ;;  %v843_v41 = vsel %vm827_vm10, %v819_v22, %v835_v30  ;;  %vm829_vm12 = vcmp.ge.f32.partialorder %v821_v25, 0.0 }
 0x537   :  { %v803_v38 = vadd.f32 %v790_v7, %v716_v35  ;;  %851 = vmax.xlane.f32.xlu1 %v850_v36  ;;  %v847_v40 = vsel %vm357_vm7, %v839_v37, -inf  ;;  %v841_v45 = vsel %vm825_vm11, %v817_v19, %v833_v33  ;;  %v834_v46 = vmul.f32 0.2, %v818_v31 }
 0x538   :  { %848 = vmax.xlane.f32.xlu0 %v847_v40  ;;  %vm826_vm13 = vcmp.ge.f32.partialorder %v818_v31, 0.0  ;;  %v859_v51 = vsel %vm357_vm7, %v843_v41, -inf  ;;  %v853_v53 = vsel %vm357_vm7, %v841_v45, -inf  ;;  %v845_v55 = vsel %vm829_vm12, %v821_v25, %v837_v42 }
 0x539   :  { %v820_v47 = vadd.f32 %v4326_v34, %v803_v38  ;;  %v842_v56 = vsel %vm826_vm13, %v818_v31, %v834_v46  ;;  %v865_v59 = vsel %vm357_vm7, %v845_v55, -inf }
 0x53a   :  { %v726_v50 = vpop.permute.xlu1 %725  ;;  %v856_v62 = vsel %vm357_vm7, %v842_v56, -inf }
 0x53b   :  { %v805_v52 = vadd.f32 %v790_v7, %v726_v50  ;;  %860 = vmax.xlane.f32.xlu1 %v859_v51  ;;  %v836_v57 = vmul.f32 0.2, %v820_v47  ;;  %vm828_vm14 = vcmp.ge.f32.partialorder %v820_v47, 0.0 }
 0x53c   :  { %854 = vmax.xlane.f32.xlu0 %v853_v53  ;;  %v4653_v53 = vld [vmem:[%s7061_s2 + $0x88] sm:$0xff]  }
 0x53d   :  { %v822_v58 = vadd.f32 %v4328_v49, %v805_v52  ;;  %v844_v0 = vsel %vm828_vm14, %v820_v47, %v836_v57  ;;  %v4652_v52 = vld [vmem:[%s7061_s2 + $0x80] sm:$0xff]  }
 0x53e   :  { %v862_v4 = vsel %vm357_vm7, %v844_v0, -inf  ;;  %4539 = vmatprep.subr.bf16.mxu0 %v4652_v52  ;;  %v4656_v57 = vld [vmem:[%s7061_s2 + $0xa0] sm:$0xff]  }
 0x53f   :  { %866 = vmax.xlane.f32.xlu1 %v865_v59  ;;  %v838_v3 = vmul.f32 0.2, %v822_v58  ;;  %vm830_vm15 = vcmp.ge.f32.partialorder %v822_v58, 0.0  ;;  %4540 = vmatpush3.bf16.msra.mxu0 %v4652_v52 }
 0x540   :  { %857 = vmax.xlane.f32.xlu0 %v856_v62  ;;  %4541 = vmatprep.subr.bf16.mxu0 %v4653_v53 }
 0x541   :  { %v846_v5 = vsel %vm830_vm15, %v822_v58, %v838_v3  ;;  %v4657_v58 = vld [vmem:[%s7061_s2 + $0xa8] sm:$0xff]  }
 0x542   :  { %v868_v6 = vsel %vm357_vm7, %v846_v5, -inf }
 0x543   :  { %4542 = vmatpush3.bf16.msra.mxu0 %v4653_v53 }
 0x544   :  { %863 = vmax.xlane.f32.xlu0 %v862_v4 }
 0x548   :  { %869 = vmax.xlane.f32.xlu0 %v868_v6 }
 0x5c4   :  { %v852_v7 = vpop.xlane.xlu1 %851 }
 0x5c5   :  { %v849_v8 = vpop.xlane.xlu0 %848  ;;  %v872_v9 = vsub.f32 %v840_v32, %v852_v7 }
 0x5c6   :  { %v871_v10 = vsub.f32 %v839_v37, %v849_v8 }
 0x5c7   :  { %v881_v11 = vmul.f32 1.442695, %v872_v9 }
 0x5c8   :  { %v879_v12 = vmul.f32 1.442695, %v871_v10  ;;  %v861_v13 = vpop.xlane.xlu1 %860 }
 0x5c9   :  { %4700 = vpow2.f32 %v881_v11  ;;  %v855_v14 = vpop.xlane.xlu0 %854  ;;  %v875_v15 = vsub.f32 %v843_v41, %v861_v13 }
 0x5ca   :  { %4702 = vpow2.f32 %v879_v12  ;;  %v873_v16 = vsub.f32 %v841_v45, %v855_v14 }
 0x5cb   :  { %v887_v18 = vmul.f32 1.442695, %v875_v15 }
 0x5cc   :  { %v883_v17 = vmul.f32 1.442695, %v873_v16  ;;  %v867_v19 = vpop.xlane.xlu1 %866 }
 0x5cd   :  { %v858_v20 = vpop.xlane.xlu0 %857  ;;  %v877_v21 = vsub.f32 %v845_v55, %v867_v19  ;;  %v4654_v55 = vld [vmem:[%s7061_s2 + $0x90] sm:$0xff]  }
 0x5ce   :  { %4704 = vpow2.f32 %v883_v17  ;;  %v874_v22 = vsub.f32 %v842_v56, %v858_v20  ;;  %4543 = vmatprep.subr.bf16.mxu0 %v4654_v55  ;;  %v4655_v56 = vld [vmem:[%s7061_s2 + $0x98] sm:$0xff]  }
 0x5cf   :  { %4706 = vpow2.f32 %v887_v18  ;;  %v891_v24 = vmul.f32 1.442695, %v877_v21  ;;  %4544 = vmatpush3.bf16.msra.mxu0 %v4654_v55 }
 0x5d0   :  { %v885_v23 = vmul.f32 1.442695, %v874_v22  ;;  %4545 = vmatprep.subr.bf16.mxu0 %v4655_v56 }
 0x5d1   :  { %v864_v25 = vpop.xlane.xlu0 %863 }
 0x5d2   :  { %4708 = vpow2.f32 %v885_v23  ;;  %v876_v26 = vsub.f32 %v844_v0, %v864_v25 }
 0x5d3   :  { %v5171_v28 = vpop.eup %4700  ;;  %4710 = vpow2.f32 %v891_v24  ;;  %4546 = vmatpush3.bf16.msra.mxu0 %v4655_v56 }
 0x5d4   :  { %v5173_v29 = vpop.eup %4702  ;;  %v889_v30 = vmul.f32 1.442695, %v876_v26  ;;  %v898_v31 = vsel %vm357_vm7, %v5171_v28, 0.0  ;;  %4547 = vmatprep.subr.bf16.mxu0 %v4656_v57 }
 0x5d5   :  { %v870_v32 = vpop.xlane.xlu0 %869  ;;  %v895_v33 = vsel %vm357_vm7, %v5173_v29, 0.0  ;;  %899 = vadd.xlane.f32.xlu0 %v898_v31 }
 0x5d6   :  { %4712 = vpow2.f32 %v889_v30  ;;  %v878_v34 = vsub.f32 %v846_v5, %v870_v32  ;;  %896 = vadd.xlane.f32.xlu1 %v895_v33 }
 0x5d7   :  { %4548 = vmatpush3.bf16.msra.mxu0 %v4656_v57 }
 0x5d8   :  { %v5179_v35 = vpop.eup %4704  ;;  %v893_v36 = vmul.f32 1.442695, %v878_v34  ;;  %4549 = vmatprep.subr.bf16.mxu0 %v4657_v58 }
 0x5d9   :  { %v901_v37 = vsel %vm357_vm7, %v5179_v35, 0.0  ;;  %v5183_v38 = vpop.eup %4706 }
 0x5da   :  { %4714 = vpow2.f32 %v893_v36  ;;  %902 = vadd.xlane.f32.xlu1 %v901_v37  ;;  %v907_v42 = vsel %vm357_vm7, %v5183_v38, 0.0  ;;  %v4658_v37 = vld [vmem:[%s7061_s2 + $0xb0] sm:$0xff]  }
 0x5db   :  { %4550 = vmatpush3.bf16.msra.mxu0 %v4657_v58 }
 0x5dc   :  { %v5185_v40 = vpop.eup %4708  ;;  %4551 = vmatprep.subr.bf16.mxu0 %v4658_v37 }
 0x5dd   :  { %v904_v41 = vsel %vm357_vm7, %v5185_v40, 0.0  ;;  %v5191_v45 = vpop.eup %4710 }
 0x5de   :  { %905 = vadd.xlane.f32.xlu0 %v904_v41  ;;  %908 = vadd.xlane.f32.xlu1 %v907_v42  ;;  %v913_v49 = vsel %vm357_vm7, %v5191_v45, 0.0 }
 0x5df   :  { %4552 = vmatpush3.bf16.msra.mxu0 %v4658_v37 }
 0x5e0   :  { %v5193_v46 = vpop.eup %4712 }
 0x5e1   :  { %v910_v47 = vsel %vm357_vm7, %v5193_v46, 0.0 }
 0x5e2   :  { %911 = vadd.xlane.f32.xlu0 %v910_v47  ;;  %914 = vadd.xlane.f32.xlu1 %v913_v49 }
 0x5e4   :  { %v5199_v50 = vpop.eup %4714 }
 0x5e5   :  { %v916_v51 = vsel %vm357_vm7, %v5199_v50, 0.0 }
 0x5e6   :  { %917 = vadd.xlane.f32.xlu0 %v916_v51 }
 0x662   :  { %v900_v59 = vpop.xlane.xlu0 %899 }
 0x663   :  { %v920_v62 = vmax.f32 %v900_v59, 1e-30  ;;  %v897_v0 = vpop.xlane.xlu1 %896 }
 0x664   :  { %v919_v3 = vmax.f32 %v897_v0, 1e-30 }
 0x665   :  { %4716 = vrcp.f32 %v920_v62 }
 0x666   :  { %4718 = vrcp.f32 %v919_v3 }
 0x667   :  { %v903_v4 = vpop.xlane.xlu1 %902 }
 0x668   :  { %v921_v5 = vmax.f32 %v903_v4, 1e-30 }
 0x66a   :  { %4720 = vrcp.f32 %v921_v5 }
 0x66b   :  { %v906_v6 = vpop.xlane.xlu0 %905  ;;  %v909_v7 = vpop.xlane.xlu1 %908 }
 0x66c   :  { %v922_v8 = vmax.f32 %v906_v6, 1e-30  ;;  %v923_v9 = vmax.f32 %v909_v7, 1e-30 }
 0x66e   :  { %4722 = vrcp.f32 %v922_v8 }
 0x66f   :  { %v4717_v10 = vpop.eup %4716  ;;  %v912_v11 = vpop.xlane.xlu0 %911  ;;  %4724 = vrcp.f32 %v923_v9 }
 0x670   :  { %v915_v12 = vpop.xlane.xlu1 %914  ;;  %v4719_v13 = vpop.eup %4718  ;;  %v924_v14 = vmax.f32 %v912_v11, 1e-30  ;;  %v936_v16 = vmul.f32 %v4717_v10, %v5171_v28 }
 0x671   :  { %v925_v15 = vmax.f32 %v915_v12, 1e-30  ;;  %v935_v17 = vmul.f32 %v4719_v13, %v5173_v29 }
 0x672   :  { %4726 = vrcp.f32 %v924_v14 }
 0x673   :  { %v918_v18 = vpop.xlane.xlu0 %917  ;;  %v943_v19 = vpack.c.bf16 %v936_v16, %v935_v17  ;;  %4728 = vrcp.f32 %v925_v15 }
 0x674   :  { %v926_v20 = vmax.f32 %v918_v18, 1e-30  ;;  %v4721_v21 = vpop.eup %4720 }
 0x675   :  { %4531 = vmatprep.mubr.msk.bf16.mxu1 %vm357_vm7, %v943_v19  ;;  %v937_v23 = vmul.f32 %v4721_v21, %v5179_v35 }
 0x676   :  { %4730 = vrcp.f32 %v926_v20 }
 0x678   :  { %v4723_v22 = vpop.eup %4722 }
 0x679   :  { %v938_v24 = vmul.f32 %v4723_v22, %v5185_v40  ;;  %v4725_v25 = vpop.eup %4724  ;;  %v4330_v40 = vld [vmem:[%s7064_s3 + $0x1] ss:$0 sm:$0xff] }
 0x67a   :  { %v939_v28 = vmul.f32 %v4725_v25, %v5183_v38  ;;  %v4659_v38 = vld [vmem:[%s7061_s2 + $0xb8] sm:$0xff]  }
 0x67b   :  { %v944_v26 = vpack.c.bf16 %v938_v24, %v937_v23  ;;  %4553 = vmatprep.subr.bf16.mxu0 %v4659_v38 }
 0x67c   :  { %v4727_v30 = vpop.eup %4726  ;;  %4554 = vmatpush3.bf16.msra.mxu0 %v4659_v38 }
 0x67d   :  { %4532 = vmatmul.mubr.msk.bf16.vlgmr.msra.gmra.mrb[16].mxu1 %vm357_vm7, %v944_v26  ;;  %v940_v29 = vmul.f32 %v4727_v30, %v5193_v46  ;;  %v4729_v31 = vpop.eup %4728 }
 0x67e   :  { %v941_v34 = vmul.f32 %v4729_v31, %v5191_v45 }
 0x67f   :  { %v945_v32 = vpack.c.bf16 %v940_v29, %v939_v28 }
 0x680   :  { %v4731_v33 = vpop.eup %4730 }
 0x681   :  { %4535 = vmatprep.mubr.msk.bf16.mxu1 %vm357_vm7, %v945_v32  ;;  %v942_v35 = vmul.f32 %v4731_v33, %v5199_v50 }
 0x683   :  { %v946_v36 = vpack.c.bf16 %v942_v35, %v941_v34 }
 0x685   :  { %4536 = vmatmul.mubr.msk.bf16.gmra.mrb[20].mxu1 %vm357_vm7, %v946_v36 }
 0x750   :  { %v4533_v41 = vpop.f32.mrb[16].mxu1 }
 0x751   :  { %v1014_v42 = vadd.f32 %v4533_v41, %v4330_v40  ;;  %v1005_v45 = vpop.f32.mrb[17].mxu1 }
 0x752   :  { %v1006_v46 = vadd.f32 %v4330_v40, %v1005_v45  ;;  %v4534_v47 = vpop.f32.mrb[18].mxu1 }
 0x753   :  { %v1017_v49 = vadd.f32 %v4534_v47, %v4330_v40  ;;  %v1008_v50 = vpop.f32.mrb[19].mxu1  ;;  %v1038_v52 = vmax.f32 %v1014_v42, 0.0 }
 0x754   :  { %v1009_v51 = vadd.f32 %v4330_v40, %v1008_v50  ;;  %v1036_v55 = vmax.f32 %v1006_v46, 0.0 }
 0x755   :  { %v1039_v53 = vmax.f32 %v1017_v49, 0.0 }
 0x756   :  { %v1037_v56 = vmax.f32 %v1009_v51, 0.0 }
 0x757   :  { %v1045_v57 = vpack.c.bf16 %v1039_v53, %v1038_v52 }
 0x758   :  { %v1044_v58 = vpack.c.bf16 %v1037_v56, %v1036_v55  ;;  %v4537_v59 = vpop.f32.mrb[20].mxu1  ;;  %v4361_v55 = vld [vmem:[%s7063_s1 + $0x90] sm:$0xff] }
 0x759   :  { %v1030_v62 = vadd.f32 %v4537_v59, %v4330_v40  ;;  %v1021_v0 = vpop.f32.mrb[21].mxu1  ;;  %v4359_v59 = vld [vmem:[%s7063_s1 + $0x80] sm:$0xff] }
 0x75a   :  { %v1022_v3 = vadd.f32 %v4330_v40, %v1021_v0  ;;  %v4538_v4 = vpop.f32.mrb[22].mxu1  ;;  %4555 = vmatprep.mubr.bf16.mxu0 %v1044_v58  ;;  %v4360_v58 = vld [vmem:[%s7063_s1 + $0x88] sm:$0xff] }
 0x75b   :  { %v1033_v5 = vadd.f32 %v4538_v4, %v4330_v40  ;;  %v1024_v6 = vpop.f32.mrb[23].mxu1  ;;  %4556 = vmatmul.mubr.bf16.vlgmr.msra.gmra.mrb[8].mxu0 %v1045_v57  ;;  %v1042_v8 = vmax.f32 %v1030_v62, 0.0  ;;  %v4363_v62 = vld [vmem:[%s7063_s1 + $0xa0] sm:$0xff] }
 0x75c   :  { %v1025_v7 = vadd.f32 %v4330_v40, %v1024_v6  ;;  %v1040_v10 = vmax.f32 %v1022_v3, 0.0 }
 0x75d   :  { %v1043_v9 = vmax.f32 %v1033_v5, 0.0 }
 0x75e   :  { %v1041_v11 = vmax.f32 %v1025_v7, 0.0  ;;  %v4365_v7 = vld [vmem:[%s7063_s1 + $0xb0] sm:$0xff] }
 0x75f   :  { %v1047_v12 = vpack.c.bf16 %v1043_v9, %v1042_v8 }
 0x760   :  { %v1046_v13 = vpack.c.bf16 %v1041_v11, %v1040_v10 }
 0x762   :  { %4559 = vmatprep.mubr.bf16.mxu0 %v1046_v13  ;;  %v4362_v13 = vld [vmem:[%s7063_s1 + $0x98] sm:$0xff] }
 0x763   :  { %4560 = vmatmul.mubr.bf16.gmra.mrb[12].mxu0 %v1047_v12 }
 0x82e   :  { %v4557_v14 = vpop.f32.mrb[8].mxu0 }
 0x82f   :  { %v1147_v15 = vpop.f32.mrb[9].mxu0 }
 0x830   :  { %1219 = vperm.xlu1 %4628, %v1147_v15   ;;  %v4558_v16 = vpop.f32.mrb[10].mxu0 }
 0x831   :  { %v1438_v17 = vpack.c.bf16 %v4558_v16, %v4557_v14  ;;  %v1150_v18 = vpop.f32.mrb[11].mxu0 }
 0x832   :  { %v1437_v19 = vpack.c.bf16 %v1150_v18, %v1147_v15  ;;  %1222 = vperm.xlu0 %4629, %v1150_v18  }
 0x834   :  { %1225 = vperm.xlu1 %4628, %v4557_v14   ;;  %4563 = vmatprep.subr.bf16.mxu1 %v1437_v19 }
 0x835   :  { %4564 = vmatpush3.bf16.msra.mxu1 %v1437_v19 }
 0x836   :  { %4631 = vset.pattern.permute.xlu0 %v4895_v27  ;;  %v4561_v20 = vpop.f32.mrb[12].mxu0  ;;  %4565 = vmatprep.subr.bf16.mxu1 %v1438_v17 }
 0x837   :  { %1185 = vperm.xlu0 %4631, %v1150_v18   ;;  %v1163_v21 = vpop.f32.mrb[13].mxu0 }
 0x838   :  { %1228 = vperm.xlu1 %4628, %v4558_v16   ;;  %v4562_v22 = vpop.f32.mrb[14].mxu0 }
 0x839   :  { %v1440_v23 = vpack.c.bf16 %v4562_v22, %v4561_v20  ;;  %v1166_v24 = vpop.f32.mrb[15].mxu0  ;;  %4566 = vmatpush3.bf16.msra.mxu1 %v1438_v17 }
 0x83a   :  { %v1439_v25 = vpack.c.bf16 %v1166_v24, %v1163_v21 }
 0x83b   :  { %1200 = vperm.xlu0 %4631, %v1163_v21  }
 0x83c   :  { %4630 = vset.pattern.permute.xlu1 %v4895_v27  ;;  %4567 = vmatprep.subr.bf16.mxu1 %v1439_v25 }
 0x83d   :  { %1180 = vperm.xlu1 %4630, %v1147_v15   ;;  %4568 = vmatpush3.bf16.msra.mxu1 %v1439_v25 }
 0x83e   :  { %4569 = vmatprep.subr.bf16.mxu1 %v1440_v23 }
 0x83f   :  { %1210 = vperm.xlu0 %4631, %v4561_v20  }
 0x841   :  { %4632 = vset.pattern.permute.xlu1 %v4894_v1  ;;  %4570 = vmatpush3.bf16.msra.mxu1 %v1440_v23  ;;  %v4364_v23 = vld [vmem:[%s7063_s1 + $0xa8] sm:$0xff] }
 0x842   :  { %1237 = vperm.xlu1 %4632, %v4561_v20  }
 0x846   :  { %1231 = vperm.xlu1 %4632, %v1163_v21  }
 0x84a   :  { %1240 = vperm.xlu1 %4632, %v4562_v22  }
 0x84e   :  { %1234 = vperm.xlu1 %4632, %v1166_v24  }
 0x852   :  { %4633 = vset.pattern.permute.xlu1 %v4895_v27 }
 0x853   :  { %1190 = vperm.xlu1 %4633, %v4557_v14  }
 0x857   :  { %1195 = vperm.xlu1 %4633, %v4558_v16  }
 0x85b   :  { %1205 = vperm.xlu1 %4633, %v1166_v24  }
 0x85f   :  { %1215 = vperm.xlu1 %4633, %v4562_v22  }
 0x8af   :  { %v1220_v26 = vpop.permute.xlu1 %1219 }
 0x8b0   :  { %v1245_v35 = vrot.slane %v1220_v26, %v5011_v44 }
 0x8b1   :  { %v1223_v31 = vpop.permute.xlu0 %1222 }
 0x8b2   :  { %v1249_v1 = vrot.slane %v1223_v31, %v5008_v43 }
 0x8b3   :  { %v1226_v30 = vpop.permute.xlu1 %1225 }
 0x8b4   :  { %v1254_v36 = vrot.slane %v1226_v30, %v5014_v48  ;;  %v1250_v27 = vsel %vm251_vm0, %v1249_v1, %v1245_v35 }
 0x8b6   :  { %v1186_v34 = vpop.permute.xlu0 %1185  ;;  %v1255_v41 = vsel %vm258_vm1, %v1254_v36, %v1250_v27 }
 0x8b7   :  { %v1229_v28 = vpop.permute.xlu1 %1228 }
 0x8b8   :  { %v1259_v38 = vrot.slane %v1229_v28, %v5019_v54 }
 0x8ba   :  { %v1201_v42 = vpop.permute.xlu0 %1200  ;;  %v1260_v46 = vsel %vm265_vm2, %v1259_v38, %v1255_v41 }
 0x8bc   :  { %v1181_v29 = vpop.permute.xlu1 %1180 }
 0x8be   :  { %v1211_v0 = vpop.permute.xlu0 %1210 }
 0x8c1   :  { %v1238_v32 = vpop.permute.xlu1 %1237 }
 0x8c2   :  { %v1274_v49 = vrot.slane %v1238_v32, %v5031_v63 }
 0x8c5   :  { %v1232_v33 = vpop.permute.xlu1 %1231 }
 0x8c6   :  { %v1264_v40 = vrot.slane %v1232_v33, %v5024_v60 }
 0x8c8   :  { %v1265_v50 = vsel %vm272_vm3, %v1264_v40, %v1260_v46 }
 0x8c9   :  { %v1241_v37 = vpop.permute.xlu1 %1240 }
 0x8ca   :  { %v1279_v51 = vrot.slane %v1241_v37, %v5035_v2 }
 0x8cd   :  { %v1235_v45 = vpop.permute.xlu1 %1234 }
 0x8ce   :  { %v1269_v47 = vrot.slane %v1235_v45, %v5027_v61 }
 0x8d0   :  { %v1270_v52 = vsel %vm279_vm4, %v1269_v47, %v1265_v50 }
 0x8d1   :  { %v1275_v53 = vsel %vm286_vm5, %v1274_v49, %v1270_v52 }
 0x8d2   :  { %v1280_v56 = vsel %vm293_vm6, %v1279_v51, %v1275_v53  ;;  %v1191_v57 = vpop.permute.xlu1 %1190 }
 0x8d3   :  { %v1290_v3 = vadd.f32 %v1280_v56, %v1191_v57  ;;  %v1289_v4 = vadd.f32 %v1280_v56, %v1186_v34  ;;  %v1288_v5 = vadd.f32 %v1280_v56, %v1181_v29  ;;  %v1292_v6 = vadd.f32 %v1280_v56, %v1201_v42  ;;  %v4366_v34 = vld [vmem:[%s7063_s1 + $0xb8] sm:$0xff] }
 0x8d4   :  { %v1294_v8 = vadd.f32 %v1280_v56, %v1211_v0 }
 0x8d5   :  { %v1307_v9 = vadd.f32 %v4361_v55, %v1290_v3  ;;  %v1306_v10 = vadd.f32 %v4360_v58, %v1289_v4  ;;  %v1305_v11 = vadd.f32 %v4359_v59, %v1288_v5  ;;  %v1309_v12 = vadd.f32 %v4363_v62, %v1292_v6 }
 0x8d6   :  { %v1196_v14 = vpop.permute.xlu1 %1195  ;;  %v1311_v15 = vadd.f32 %v4365_v7, %v1294_v8 }
 0x8d7   :  { %v1291_v16 = vadd.f32 %v1280_v56, %v1196_v14  ;;  %vm1314_vm8 = vcmp.ge.f32.partialorder %v1306_v10, 0.0  ;;  %v1322_v17 = vmul.f32 0.2, %v1306_v10  ;;  %vm1313_vm9 = vcmp.ge.f32.partialorder %v1305_v11, 0.0 }
 0x8d8   :  { %v1321_v18 = vmul.f32 0.2, %v1305_v11  ;;  %vm1317_vm10 = vcmp.ge.f32.partialorder %v1309_v12, 0.0  ;;  %v1325_v19 = vmul.f32 0.2, %v1309_v12  ;;  %vm1315_vm11 = vcmp.ge.f32.partialorder %v1307_v9, 0.0 }
 0x8d9   :  { %v1308_v20 = vadd.f32 %v4362_v13, %v1291_v16  ;;  %v1330_v21 = vsel %vm1314_vm8, %v1306_v10, %v1322_v17  ;;  %v1323_v22 = vmul.f32 0.2, %v1307_v9  ;;  %v1327_v31 = vmul.f32 0.2, %v1311_v15 }
 0x8da   :  { %v1206_v24 = vpop.permute.xlu1 %1205  ;;  %v1340_v25 = vsel %vm357_vm7, %v1330_v21, -inf  ;;  %v1329_v26 = vsel %vm1313_vm9, %v1305_v11, %v1321_v18  ;;  %v1333_v29 = vsel %vm1317_vm10, %v1309_v12, %v1325_v19  ;;  %vm1319_vm12 = vcmp.ge.f32.partialorder %v1311_v15, 0.0 }
 0x8db   :  { %v1293_v30 = vadd.f32 %v1280_v56, %v1206_v24  ;;  %1341 = vmax.xlane.f32.xlu1 %v1340_v25  ;;  %v1337_v28 = vsel %vm357_vm7, %v1329_v26, -inf  ;;  %v1331_v32 = vsel %vm1315_vm11, %v1307_v9, %v1323_v22  ;;  %v1324_v33 = vmul.f32 0.2, %v1308_v20 }
 0x8dc   :  { %1338 = vmax.xlane.f32.xlu0 %v1337_v28  ;;  %vm1316_vm13 = vcmp.ge.f32.partialorder %v1308_v20, 0.0  ;;  %v1349_v36 = vsel %vm357_vm7, %v1333_v29, -inf  ;;  %v1343_v27 = vsel %vm357_vm7, %v1331_v32, -inf  ;;  %v1335_v38 = vsel %vm1319_vm12, %v1311_v15, %v1327_v31 }
 0x8dd   :  { %v1310_v1 = vadd.f32 %v4364_v23, %v1293_v30  ;;  %v1332_v40 = vsel %vm1316_vm13, %v1308_v20, %v1324_v33  ;;  %v1355_v45 = vsel %vm357_vm7, %v1335_v38, -inf  ;;  %vm295_vm8 = vcmask 1041409  }
 0x8de   :  { %v1216_v35 = vpop.permute.xlu1 %1215  ;;  %v1346_v46 = vsel %vm357_vm7, %v1332_v40, -inf  ;;  %vm296_vm9 = vcmask 1042434   ;;  %vm298_vm10 = vcmask 1043459   ;;  %vm300_vm11 = vcmask 1044484  }
 0x8df   :  { %v1295_v37 = vadd.f32 %v1280_v56, %v1216_v35  ;;  %1350 = vmax.xlane.f32.xlu1 %v1349_v36  ;;  %v1326_v41 = vmul.f32 0.2, %v1310_v1  ;;  %vm1318_vm14 = vcmp.ge.f32.partialorder %v1310_v1, 0.0  ;;  %v5326_v35 = vsub.s32 0, %v5005_v39  ;;  %v1572_v36 = vld [vmem:[%s7065_s4] sm:$0xff] }
 0x8e0   :  { %1344 = vmax.xlane.f32.xlu0 %v1343_v27  ;;  %v5333_v27 = vsub.s32 1, %v5005_v39  ;;  %vm302_vm12 = vcmask 1045509   ;;  %vm304_vm13 = vcmask 1046534  }
 0x8e1   :  { %v1312_v42 = vadd.f32 %v4366_v34, %v1295_v37  ;;  %v1334_v47 = vsel %vm1318_vm14, %v1310_v1, %v1326_v41  ;;  %7234 = vst [vmem:[#allocation11_spill] sm:$0xff] %v5326_v35  ;;  %v1577_v37 = vrot.slane %v1572_v36, %v5326_v35  ;;  %vm306_vm14 = vcmask 1047559  }
 0x8e2   :  { %v1352_v50 = vsel %vm357_vm7, %v1334_v47, -inf  ;;  %7235 = vst [vmem:[#allocation12_spill] sm:$0xff] %v5333_v27 }
 0x8e3   :  { %1356 = vmax.xlane.f32.xlu1 %v1355_v45  ;;  %v1328_v49 = vmul.f32 0.2, %v1312_v42  ;;  %vm1320_vm15 = vcmp.ge.f32.partialorder %v1312_v42, 0.0 }
 0x8e4   :  { %1347 = vmax.xlane.f32.xlu0 %v1346_v46  ;;  %v5345_v46 = vsub.s32 4, %v5005_v39 }
 0x8e5   :  { %v1336_v51 = vsel %vm1320_vm15, %v1312_v42, %v1328_v49  ;;  %v5341_v42 = vsub.s32 3, %v5005_v39  ;;  %v5349_v49 = vsub.s32 5, %v5005_v39  ;;  %vm4898_vm15 = vmmov 0  }
 0x8e6   :  { %v1358_v52 = vsel %vm357_vm7, %v1336_v51, -inf  ;;  %7238 = vst [vmem:[#allocation15_spill] sm:$0xff] %v5345_v46 }
 0x8e7   :  { %7237 = vst [vmem:[#allocation14_spill] sm:$0xff] %v5341_v42  ;;  %v1682_v45 = vrot.slane %v1572_v36, %v5341_v42  ;;  %7239 = vst [vmem:[#allocation16_spill] sm:$0xff] %v5349_v49 }
 0x8e8   :  { %1353 = vmax.xlane.f32.xlu0 %v1352_v50  ;;  %v5352_v50 = vrot.slane %v1572_v36, %v5349_v49 }
 0x8ec   :  { %1359 = vmax.xlane.f32.xlu0 %v1358_v52 }
 0x968   :  { %v1342_v53 = vpop.xlane.xlu1 %1341 }
 0x969   :  { %v1339_v55 = vpop.xlane.xlu0 %1338  ;;  %v1362_v56 = vsub.f32 %v1330_v21, %v1342_v53  ;;  %v5365_v53 = vsub.s32 7, %v5005_v39 }
 0x96a   :  { %v1361_v57 = vsub.f32 %v1329_v26, %v1339_v55 }
 0x96b   :  { %v1371_v58 = vmul.f32 1.442695, %v1362_v56  ;;  %7241 = vst [vmem:[#allocation18_spill] sm:$0xff] %v5365_v53  ;;  %v5370_v55 = vrot.slane %v1572_v36, %v5365_v53 }
 0x96c   :  { %v1369_v59 = vmul.f32 1.442695, %v1361_v57  ;;  %v1351_v62 = vpop.xlane.xlu1 %1350 }
 0x96d   :  { %4732 = vpow2.f32 %v1371_v58  ;;  %v1345_v0 = vpop.xlane.xlu0 %1344  ;;  %v1365_v3 = vsub.f32 %v1333_v29, %v1351_v62 }
 0x96e   :  { %4734 = vpow2.f32 %v1369_v59  ;;  %v1363_v4 = vsub.f32 %v1331_v32, %v1345_v0 }
 0x96f   :  { %v1377_v6 = vmul.f32 1.442695, %v1365_v3 }
 0x970   :  { %v1373_v5 = vmul.f32 1.442695, %v1363_v4  ;;  %v1357_v7 = vpop.xlane.xlu1 %1356 }
 0x971   :  { %v1348_v8 = vpop.xlane.xlu0 %1347  ;;  %v1367_v9 = vsub.f32 %v1335_v38, %v1357_v7  ;;  %v1612_v38 = vrot.slane %v1572_v36, %v5333_v27 }
 0x972   :  { %4736 = vpow2.f32 %v1373_v5  ;;  %v1364_v10 = vsub.f32 %v1332_v40, %v1348_v8  ;;  %v5337_v40 = vsub.s32 2, %v5005_v39 }
 0x973   :  { %4738 = vpow2.f32 %v1377_v6  ;;  %v1381_v12 = vmul.f32 1.442695, %v1367_v9 }
 0x974   :  { %v1375_v11 = vmul.f32 1.442695, %v1364_v10  ;;  %7236 = vst [vmem:[#allocation13_spill] sm:$0xff] %v5337_v40  ;;  %v1647_v41 = vrot.slane %v1572_v36, %v5337_v40 }
 0x975   :  { %v1354_v13 = vpop.xlane.xlu0 %1353 }
 0x976   :  { %4740 = vpow2.f32 %v1375_v11  ;;  %v1366_v14 = vsub.f32 %v1334_v47, %v1354_v13  ;;  %v1717_v47 = vrot.slane %v1572_v36, %v5345_v46 }
 0x977   :  { %v5293_v15 = vpop.eup %4732  ;;  %4742 = vpow2.f32 %v1381_v12 }
 0x978   :  { %v5295_v16 = vpop.eup %4734  ;;  %v1379_v17 = vmul.f32 1.442695, %v1366_v14  ;;  %v1388_v18 = vsel %vm357_vm7, %v5293_v15, 0.0 }
 0x979   :  { %v1360_v19 = vpop.xlane.xlu0 %1359  ;;  %v1385_v20 = vsel %vm357_vm7, %v5295_v16, 0.0  ;;  %1389 = vadd.xlane.f32.xlu0 %v1388_v18 }
 0x97a   :  { %4744 = vpow2.f32 %v1379_v17  ;;  %v1368_v21 = vsub.f32 %v1336_v51, %v1360_v19  ;;  %1386 = vadd.xlane.f32.xlu1 %v1385_v20  ;;  %v5356_v51 = vsub.s32 6, %v5005_v39 }
 0x97c   :  { %v5301_v22 = vpop.eup %4736  ;;  %v1383_v23 = vmul.f32 1.442695, %v1368_v21  ;;  %7240 = vst [vmem:[#allocation17_spill] sm:$0xff] %v5356_v51  ;;  %v5360_v52 = vrot.slane %v1572_v36, %v5356_v51 }
 0x97d   :  { %v1391_v24 = vsel %vm357_vm7, %v5301_v22, 0.0  ;;  %v5305_v25 = vpop.eup %4738 }
 0x97e   :  { %4746 = vpow2.f32 %v1383_v23  ;;  %1392 = vadd.xlane.f32.xlu1 %v1391_v24  ;;  %v1397_v28 = vsel %vm357_vm7, %v5305_v25, 0.0 }
 0x980   :  { %v5307_v26 = vpop.eup %4740 }
 0x981   :  { %v1394_v30 = vsel %vm357_vm7, %v5307_v26, 0.0  ;;  %v5313_v29 = vpop.eup %4742 }
 0x982   :  { %1395 = vadd.xlane.f32.xlu0 %v1394_v30  ;;  %1398 = vadd.xlane.f32.xlu1 %v1397_v28  ;;  %v1403_v33 = vsel %vm357_vm7, %v5313_v29, 0.0 }
 0x984   :  { %v5315_v31 = vpop.eup %4744 }
 0x985   :  { %v1400_v32 = vsel %vm357_vm7, %v5315_v31, 0.0 }
 0x986   :  { %1401 = vadd.xlane.f32.xlu0 %v1400_v32  ;;  %1404 = vadd.xlane.f32.xlu1 %v1403_v33 }
 0x988   :  { %v5321_v1 = vpop.eup %4746 }
 0x989   :  { %v1406_v34 = vsel %vm357_vm7, %v5321_v1, 0.0 }
 0x98a   :  { %1407 = vadd.xlane.f32.xlu0 %v1406_v34 }
 0x997   :  { %1579 = vbcast.lane.b32.xlu1 %v1577_v37, 256 }
 0x99b   :  { %1587 = vbcast.lane.b32.xlu1 %v1577_v37, 272 }
 0x99f   :  { %1591 = vbcast.lane.b32.xlu1 %v1577_v37, 280 }
 0x9a0   :  { %1583 = vbcast.lane.b32.xlu0 %v1577_v37, 264 }
 0x9a3   :  { %1599 = vbcast.lane.b32.xlu1 %v1577_v37, 296 }
 0x9a4   :  { %1595 = vbcast.lane.b32.xlu0 %v1577_v37, 288 }
 0x9a7   :  { %1607 = vbcast.lane.b32.xlu1 %v1577_v37, 312 }
 0x9a8   :  { %1603 = vbcast.lane.b32.xlu0 %v1577_v37, 304 }
 0x9ab   :  { %1618 = vbcast.lane.b32.xlu1 %v1612_v38, 264 }
 0x9ac   :  { %1614 = vbcast.lane.b32.xlu0 %v1612_v38, 256 }
 0x9af   :  { %1626 = vbcast.lane.b32.xlu1 %v1612_v38, 280 }
 0x9b0   :  { %1622 = vbcast.lane.b32.xlu0 %v1612_v38, 272 }
 0x9b3   :  { %1634 = vbcast.lane.b32.xlu1 %v1612_v38, 296 }
 0x9b4   :  { %1630 = vbcast.lane.b32.xlu0 %v1612_v38, 288 }
 0x9b7   :  { %1642 = vbcast.lane.b32.xlu1 %v1612_v38, 312 }
 0x9b8   :  { %1638 = vbcast.lane.b32.xlu0 %v1612_v38, 304 }
 0x9bb   :  { %1653 = vbcast.lane.b32.xlu1 %v1647_v41, 264 }
 0x9bc   :  { %1649 = vbcast.lane.b32.xlu0 %v1647_v41, 256 }
 0x9bf   :  { %1661 = vbcast.lane.b32.xlu1 %v1647_v41, 280 }
 0x9c0   :  { %1657 = vbcast.lane.b32.xlu0 %v1647_v41, 272 }
 0x9c3   :  { %1669 = vbcast.lane.b32.xlu1 %v1647_v41, 296 }
 0x9c4   :  { %1665 = vbcast.lane.b32.xlu0 %v1647_v41, 288 }
 0x9c7   :  { %1677 = vbcast.lane.b32.xlu1 %v1647_v41, 312 }
 0x9c8   :  { %1673 = vbcast.lane.b32.xlu0 %v1647_v41, 304 }
 0x9cb   :  { %1688 = vbcast.lane.b32.xlu1 %v1682_v45, 264 }
 0x9cc   :  { %1684 = vbcast.lane.b32.xlu0 %v1682_v45, 256 }
 0x9cf   :  { %1719 = vbcast.lane.b32.xlu1 %v1717_v47, 256 }
 0x9d0   :  { %1692 = vbcast.lane.b32.xlu0 %v1682_v45, 272 }
 0x9d3   :  { %1696 = vbcast.lane.b32.xlu1 %v1682_v45, 280 }
 0x9d4   :  { %1723 = vbcast.lane.b32.xlu0 %v1717_v47, 264 }
 0x9d7   :  { %1754 = vbcast.lane.b32.xlu1 %v5352_v50, 256 }
 0x9d8   :  { %1727 = vbcast.lane.b32.xlu0 %v1717_v47, 272 }
 0x9db   :  { %1700 = vbcast.lane.b32.xlu1 %v1682_v45, 288 }
 0x9dc   :  { %1758 = vbcast.lane.b32.xlu0 %v5352_v50, 264 }
 0x9df   :  { %1762 = vbcast.lane.b32.xlu1 %v5352_v50, 272 }
 0x9e0   :  { %1731 = vbcast.lane.b32.xlu0 %v1717_v47, 280 }
 0x9e3   :  { %1793 = vbcast.lane.b32.xlu1 %v5360_v52, 264 }
 0x9e4   :  { %1789 = vbcast.lane.b32.xlu0 %v5360_v52, 256 }
 0x9e7   :  { %1735 = vbcast.lane.b32.xlu1 %v1717_v47, 288 }
 0x9e8   :  { %1704 = vbcast.lane.b32.xlu0 %v1682_v45, 296 }
 0x9eb   :  { %1797 = vbcast.lane.b32.xlu1 %v5360_v52, 272 }
 0x9ec   :  { %1766 = vbcast.lane.b32.xlu0 %v5352_v50, 280 }
 0x9ef   :  { %1828 = vbcast.lane.b32.xlu1 %v5370_v55, 264 }
 0x9f0   :  { %1824 = vbcast.lane.b32.xlu0 %v5370_v55, 256 }
 0x9f3   :  { %1739 = vbcast.lane.b32.xlu1 %v1717_v47, 296 }
 0x9f4   :  { %1708 = vbcast.lane.b32.xlu0 %v1682_v45, 304 }
 0x9f7   :  { %1801 = vbcast.lane.b32.xlu1 %v5360_v52, 280 }
 0x9f8   :  { %1770 = vbcast.lane.b32.xlu0 %v5352_v50, 288 }
 0x9fb   :  { %1712 = vbcast.lane.b32.xlu1 %v1682_v45, 312 }
 0x9fc   :  { %1832 = vbcast.lane.b32.xlu0 %v5370_v55, 272 }
 0x9ff   :  { %1774 = vbcast.lane.b32.xlu1 %v5352_v50, 296 }
 0xa00   :  { %1743 = vbcast.lane.b32.xlu0 %v1717_v47, 304 }
 0xa03   :  { %1836 = vbcast.lane.b32.xlu1 %v5370_v55, 280 }
 0xa04   :  { %1805 = vbcast.lane.b32.xlu0 %v5360_v52, 288 }
 0xa06   :  { %v1390_v56 = vpop.xlane.xlu0 %1389 }
 0xa07   :  { %v1410_v39 = vmax.f32 %v1390_v56, 1e-30  ;;  %v1387_v57 = vpop.xlane.xlu1 %1386  ;;  %1778 = vbcast.lane.b32.xlu1 %v5352_v50, 304 }
 0xa08   :  { %v1409_v58 = vmax.f32 %v1387_v57, 1e-30  ;;  %1747 = vbcast.lane.b32.xlu0 %v1717_v47, 312 }
 0xa09   :  { %4748 = vrcp.f32 %v1410_v39  ;;  %v4368_v39 = vld [vmem:[%s7064_s3 + $0x2] ss:$0 sm:$0xff] }
 0xa0a   :  { %4750 = vrcp.f32 %v1409_v58 }
 0xa0b   :  { %v1393_v59 = vpop.xlane.xlu1 %1392  ;;  %1840 = vbcast.lane.b32.xlu1 %v5370_v55, 288 }
 0xa0c   :  { %v1411_v62 = vmax.f32 %v1393_v59, 1e-30  ;;  %1809 = vbcast.lane.b32.xlu0 %v5360_v52, 296  ;;  %v4373_v59 = vld [vmem:[%s7067_s5] ss:$0 sm:$0xff] }
 0xa0e   :  { %4752 = vrcp.f32 %v1411_v62 }
 0xa0f   :  { %v1396_v0 = vpop.xlane.xlu0 %1395  ;;  %v1399_v3 = vpop.xlane.xlu1 %1398  ;;  %1813 = vbcast.lane.b32.xlu1 %v5360_v52, 304 }
 0xa10   :  { %v1412_v4 = vmax.f32 %v1396_v0, 1e-30  ;;  %v1413_v5 = vmax.f32 %v1399_v3, 1e-30  ;;  %1782 = vbcast.lane.b32.xlu0 %v5352_v50, 312 }
 0xa12   :  { %4754 = vrcp.f32 %v1412_v4 }
 0xa13   :  { %v4749_v6 = vpop.eup %4748  ;;  %v1402_v7 = vpop.xlane.xlu0 %1401  ;;  %4756 = vrcp.f32 %v1413_v5  ;;  %1817 = vbcast.lane.b32.xlu1 %v5360_v52, 312 }
 0xa14   :  { %v1405_v8 = vpop.xlane.xlu1 %1404  ;;  %v4751_v9 = vpop.eup %4750  ;;  %v1414_v10 = vmax.f32 %v1402_v7, 1e-30  ;;  %v1426_v12 = vmul.f32 %v4749_v6, %v5293_v15  ;;  %1844 = vbcast.lane.b32.xlu0 %v5370_v55, 296 }
 0xa15   :  { %v1415_v11 = vmax.f32 %v1405_v8, 1e-30  ;;  %v1425_v13 = vmul.f32 %v4751_v9, %v5295_v16 }
 0xa16   :  { %4758 = vrcp.f32 %v1414_v10 }
 0xa17   :  { %v1408_v14 = vpop.xlane.xlu0 %1407  ;;  %v1433_v17 = vpack.c.bf16 %v1426_v12, %v1425_v13  ;;  %4760 = vrcp.f32 %v1415_v11  ;;  %1852 = vbcast.lane.b32.xlu1 %v5370_v55, 312 }
 0xa18   :  { %v1416_v18 = vmax.f32 %v1408_v14, 1e-30  ;;  %v4753_v19 = vpop.eup %4752  ;;  %1848 = vbcast.lane.b32.xlu0 %v5370_v55, 304 }
 0xa19   :  { %4571 = vmatprep.mubr.msk.bf16.mxu1 %vm357_vm7, %v1433_v17  ;;  %v1427_v15 = vmul.f32 %v4753_v19, %v5301_v22 }
 0xa1a   :  { %4762 = vrcp.f32 %v1416_v18 }
 0xa1b   :  { %v5421_v50 = vpop.permute.xlu0 %1583 }
 0xa1c   :  { %v4755_v20 = vpop.eup %4754 }
 0xa1d   :  { %v1428_v16 = vmul.f32 %v4755_v20, %v5307_v26  ;;  %v4757_v21 = vpop.eup %4756 }
 0xa1e   :  { %v1429_v30 = vmul.f32 %v4757_v21, %v5305_v25 }
 0xa1f   :  { %v1434_v23 = vpack.c.bf16 %v1428_v16, %v1427_v15  ;;  %v5425_v55 = vpop.permute.xlu0 %1595 }
 0xa20   :  { %v4759_v24 = vpop.eup %4758 }
 0xa21   :  { %4572 = vmatmul.mubr.msk.bf16.vlgmr.msra.gmra.mrb[24].mxu1 %vm357_vm7, %v1434_v23  ;;  %v1430_v28 = vmul.f32 %v4759_v24, %v5315_v31  ;;  %v4761_v32 = vpop.eup %4760  ;;  %v7071_v31 = vmov 0.0  }
 0xa22   :  { %v1431_v33 = vmul.f32 %v4761_v32, %v5313_v29  ;;  %4579 = vmatprep.subr.bf16.mxu1 %v7071_v31  ;;  %4591 = vmatprep.subr.bf16.mxu0 %v7071_v31  ;;  %v14_v29 = vstv %s7066_s6 }
 0xa23   :  { %v1435_v22 = vpack.c.bf16 %v1430_v28, %v1429_v30  ;;  %15 = vst [vmem:[#allocation2] sm:$0x1] %v14_v29  ;;  %v5432_v57 = vpop.permute.xlu0 %1603 }
 0xa24   :  { %v4763_v26 = vpop.eup %4762 }
 0xa25   :  { %4575 = vmatprep.mubr.msk.bf16.mxu1 %vm357_vm7, %v1435_v22  ;;  %v1432_v34 = vmul.f32 %v4763_v26, %v5321_v1  ;;  %v5407_v1 = vpop.permute.xlu1 %1579 }
 0xa27   :  { %v1436_v25 = vpack.c.bf16 %v1432_v34, %v1431_v33  ;;  %v5439_v10 = vpop.permute.xlu0 %1614 }
 0xa29   :  { %4576 = vmatmul.mubr.msk.bf16.gmra.mrb[28].mxu1 %vm357_vm7, %v1436_v25  ;;  %v5409_v36 = vpop.permute.xlu1 %1587 }
 0xa2a   :  { %v5518_v54 = vld [vmem:[#allocation2] ss:$0 sm:$0xff] }
 0xa2b   :  { %v5444_v21 = vpop.permute.xlu0 %1622 }
 0xa2d   :  { %v5411_v37 = vpop.permute.xlu1 %1591 }
 0xa2f   :  { %v5449_v29 = vpop.permute.xlu0 %1630 }
 0xa31   :  { %v5413_v38 = vpop.permute.xlu1 %1599 }
 0xa32   :  { %7242 = vst [vmem:[#allocation19_spill] sm:$0xff] %v5413_v38 }
 0xa35   :  { %v5415_v41 = vpop.permute.xlu1 %1607 }
 0xa39   :  { %v5417_v45 = vpop.permute.xlu1 %1618 }
 0xa3d   :  { %v5419_v47 = vpop.permute.xlu1 %1626 }
 0xa41   :  { %v5423_v52 = vpop.permute.xlu1 %1634 }
 0xa45   :  { %v5427_v56 = vpop.permute.xlu1 %1642 }
 0xa49   :  { %v5437_v4 = vpop.permute.xlu1 %1653 }
 0xa4d   :  { %v5441_v18 = vpop.permute.xlu1 %1661 }
 0xa51   :  { %v5447_v25 = vpop.permute.xlu1 %1669 }
 0xa52   :  { %7243 = vst [vmem:[#allocation20_spill] sm:$0xff] %v5447_v25 }
 0xaf4   :  { %v4573_v58 = vpop.f32.mrb[24].mxu1 }
 0xaf5   :  { %v1504_v62 = vadd.f32 %v4573_v58, %v4368_v39  ;;  %v1495_v0 = vpop.f32.mrb[25].mxu1 }
 0xaf6   :  { %v4574_v3 = vpop.f32.mrb[26].mxu1  ;;  %v1496_v6 = vadd.f32 %v4368_v39, %v1495_v0  ;;  %v4897_v0 = vmov 0  }
 0xaf7   :  { %v1535_v5 = vmul.f32 %v4373_v59, %v1504_v62  ;;  %v1507_v7 = vadd.f32 %v4574_v3, %v4368_v39  ;;  %v1498_v8 = vpop.f32.mrb[27].mxu1  ;;  %4635 = vset.pattern.permute.xlu0 %v4897_v0  ;;  %4634 = vset.pattern.permute.xlu1 %v4897_v0 }
 0xaf8   :  { %v1499_v9 = vadd.f32 %v4368_v39, %v1498_v8  ;;  %v1533_v14 = vmul.f32 %v4373_v59, %v1496_v6 }
 0xaf9   :  { %v1536_v11 = vmul.f32 %v4373_v59, %v1507_v7  ;;  %v3513_v12 = vpack.c.bf16 %v1507_v7, %v1504_v62  ;;  %1545 = vadd.xlane.f32.xlu1 %v1535_v5  ;;  %v5454_v62 = vpop.permute.xlu0 %1638 }
 0xafa   :  { %v3512_v13 = vpack.c.bf16 %v1499_v9, %v1496_v6  ;;  %v1534_v19 = vmul.f32 %v4373_v59, %v1499_v9 }
 0xafb   :  { %1547 = vadd.xlane.f32.xlu0 %v1536_v11 }
 0xafc   :  { %v4577_v17 = vpop.f32.mrb[28].mxu1  ;;  %4580 = vmatpush3.bf16.msra.mxu1 %v3512_v13 }
 0xafd   :  { %v1520_v20 = vadd.f32 %v4577_v17, %v4368_v39  ;;  %v1511_v15 = vpop.f32.mrb[29].mxu1  ;;  %1541 = vadd.xlane.f32.xlu1 %v1533_v14  ;;  %4581 = vmatprep.subr.bf16.mxu1 %v7071_v31  ;;  %v5458_v5 = vpop.permute.xlu0 %1649 }
 0xafe   :  { %v4578_v16 = vpop.f32.mrb[30].mxu1  ;;  %v1512_v24 = vadd.f32 %v4368_v39, %v1511_v15 }
 0xaff   :  { %v1539_v23 = vmul.f32 %v4373_v59, %v1520_v20  ;;  %v1523_v30 = vadd.f32 %v4578_v16, %v4368_v39  ;;  %v1514_v28 = vpop.f32.mrb[31].mxu1  ;;  %1543 = vadd.xlane.f32.xlu0 %v1534_v19 }
 0xb00   :  { %v1515_v32 = vadd.f32 %v4368_v39, %v1514_v28  ;;  %4582 = vmatpush3.bf16.msra.mxu1 %v3513_v12  ;;  %v1537_v34 = vmul.f32 %v4373_v59, %v1512_v24  ;;  %v5452_v39 = vpop.permute.xlu1 %1677 }
 0xb01   :  { %v1540_v22 = vmul.f32 %v4373_v59, %v1523_v30  ;;  %v3515_v26 = vpack.c.bf16 %v1523_v30, %v1520_v20  ;;  %1553 = vadd.xlane.f32.xlu1 %v1539_v23  ;;  %4583 = vmatprep.subr.bf16.mxu1 %v7071_v31  ;;  %v1658_v7 = vpop.permute.xlu0 %1657 }
 0xb02   :  { %v3514_v33 = vpack.c.bf16 %v1515_v32, %v1512_v24  ;;  %v1538_v58 = vmul.f32 %v4373_v59, %v1515_v32 }
 0xb03   :  { %1555 = vadd.xlane.f32.xlu0 %v1540_v22 }
 0xb04   :  { %4584 = vmatpush3.bf16.msra.mxu1 %v3514_v33  ;;  %v5456_v3 = vpop.permute.xlu1 %1688 }
 0xb05   :  { %1549 = vadd.xlane.f32.xlu1 %v1537_v34  ;;  %4585 = vmatprep.subr.bf16.mxu1 %v7071_v31  ;;  %v5464_v8 = vpop.permute.xlu0 %1665 }
 0xb07   :  { %1551 = vadd.xlane.f32.xlu0 %v1538_v58 }
 0xb08   :  { %4586 = vmatpush3.bf16.msra.mxu1 %v3515_v26  ;;  %v5460_v6 = vpop.permute.xlu1 %1719 }
 0xb09   :  { %v5468_v11 = vpop.permute.xlu0 %1673 }
 0xb0c   :  { %v5462_v59 = vpop.permute.xlu1 %1696 }
 0xb0d   :  { %v1685_v13 = vpop.permute.xlu0 %1684 }
 0xb10   :  { %v5466_v9 = vpop.permute.xlu1 %1754 }
 0xb11   :  { %v1693_v17 = vpop.permute.xlu0 %1692 }
 0xb14   :  { %v5470_v12 = vpop.permute.xlu1 %1700 }
 0xb15   :  { %v5474_v20 = vpop.permute.xlu0 %1723 }
 0xb18   :  { %v1763_v14 = vpop.permute.xlu1 %1762 }
 0xb19   :  { %v1728_v16 = vpop.permute.xlu0 %1727 }
 0xb1c   :  { %v5472_v19 = vpop.permute.xlu1 %1793 }
 0xb1d   :  { %v5478_v24 = vpop.permute.xlu0 %1758 }
 0xb20   :  { %v5476_v15 = vpop.permute.xlu1 %1735 }
 0xb21   :  { %v5482_v28 = vpop.permute.xlu0 %1731 }
 0xb24   :  { %v1798_v23 = vpop.permute.xlu1 %1797 }
 0xb25   :  { %v1790_v22 = vpop.permute.xlu0 %1789 }
 0xb28   :  { %v5480_v30 = vpop.permute.xlu1 %1828 }
 0xb29   :  { %v5488_v33 = vpop.permute.xlu0 %1704 }
 0xb2a   :  { %7245 = vst [vmem:[#allocation22_spill] sm:$0xff] %v5488_v33 }
 0xb2c   :  { %v5484_v32 = vpop.permute.xlu1 %1739 }
 0xb2d   :  { %7244 = vst [vmem:[#allocation21_spill] sm:$0xff] %v5484_v32  ;;  %v5492_v58 = vpop.permute.xlu0 %1766 }
 0xb30   :  { %v5486_v26 = vpop.permute.xlu1 %1801 }
 0xb31   :  { %v1825_v31 = vpop.permute.xlu0 %1824 }
 0xb34   :  { %v5490_v34 = vpop.permute.xlu1 %1712 }
 0xb35   :  { %v5498_v51 = vpop.permute.xlu0 %1708 }
 0xb38   :  { %v5494_v0 = vpop.permute.xlu1 %1774 }
 0xb39   :  { %7246 = vst [vmem:[#allocation23_spill] sm:$0xff] %v5494_v0  ;;  %v5502_v49 = vpop.permute.xlu0 %1770 }
 0xb3c   :  { %v5496_v53 = vpop.permute.xlu1 %1836 }
 0xb3d   :  { %v1833_v42 = vpop.permute.xlu0 %1832 }
 0xb40   :  { %v5500_v40 = vpop.permute.xlu1 %1778 }
 0xb41   :  { %v5508_v35 = vpop.permute.xlu0 %1743 }
 0xb44   :  { %v5504_v46 = vpop.permute.xlu1 %1840 }
 0xb45   :  { %v5512_v63 = vpop.permute.xlu0 %1805 }
 0xb48   :  { %v5506_v27 = vpop.permute.xlu1 %1813 }
 0xb49   :  { %v5516_v60 = vpop.permute.xlu0 %1747 }
 0xb4c   :  { %v5510_v2 = vpop.permute.xlu1 %1817 }
 0xb4d   :  { %v5521_v48 = vpop.permute.xlu0 %1809 }
 0xb50   :  { %v5514_v61 = vpop.permute.xlu1 %1852 }
 0xb51   :  { %7247 = vst [vmem:[#allocation24_spill] sm:$0xff] %v5514_v61  ;;  %v5535_v25 = vpop.permute.xlu0 %1782 }
 0xb86   :  { %v1546_v44 = vpop.xlane.xlu1 %1545 }
 0xb87   :  { %v1566_v43 = vadd.f32 %v5518_v54, %v1546_v44 }
 0xb89   :  { %v5524_v0 = vadd.f32 %v5444_v21, %v1566_v43  ;;  %v5527_v32 = vadd.f32 %v5409_v36, %v1566_v43  ;;  %v5531_v61 = vadd.f32 %v1728_v16, %v1566_v43  ;;  %v5533_v33 = vadd.f32 %v1658_v7, %v1566_v43  ;;  %v5546_v16 = vpop.permute.xlu0 %1844 }
 0xb8a   :  { %v1542_v38 = vpop.xlane.xlu1 %1541  ;;  %v5540_v21 = vadd.f32 %v1763_v14, %v1566_v43  ;;  %v5542_v36 = vadd.f32 %v1693_v17, %v1566_v43  ;;  %v5548_v7 = vadd.f32 %v1798_v23, %v1566_v43 }
 0xb8b   :  { %7248 = vst [vmem:[#allocation25_spill] sm:$0xff] %v5524_v0  ;;  %7249 = vst [vmem:[#allocation26_spill] sm:$0xff] %v5527_v32  ;;  %2077 = vperm.xlu0 %4635, %v5524_v0   ;;  %2053 = vperm.xlu1 %4634, %v5527_v32   ;;  %v1564_v44 = vadd.f32 %v5518_v54, %v1542_v38  ;;  %v5555_v38 = vadd.f32 %v1833_v42, %v1566_v43 }
 0xb8c   :  { %7250 = vst [vmem:[#allocation27_spill] sm:$0xff] %v5531_v61  ;;  %7251 = vst [vmem:[#allocation28_spill] sm:$0xff] %v5533_v33 }
 0xb8d   :  { %7252 = vst [vmem:[#allocation29_spill] sm:$0xff] %v5540_v21  ;;  %7253 = vst [vmem:[#allocation30_spill] sm:$0xff] %v5542_v36  ;;  %v5551_v0 = vadd.f32 %v5407_v1, %v1564_v44  ;;  %v5557_v14 = vadd.f32 %v1685_v13, %v1564_v44  ;;  %v5559_v17 = vpop.permute.xlu0 %1848  ;;  %v5564_v23 = vadd.f32 %v5439_v10, %v1564_v44 }
 0xb8e   :  { %7254 = vst [vmem:[#allocation31_spill] sm:$0xff] %v5548_v7  ;;  %7256 = vst [vmem:[#allocation33_spill] sm:$0xff] %v5555_v38  ;;  %v5567_v1 = vadd.f32 %v5460_v6, %v1564_v44  ;;  %v5573_v42 = vadd.f32 %v5458_v5, %v1564_v44  ;;  %v5575_v13 = vadd.f32 %v1825_v31, %v1564_v44 }
 0xb8f   :  { %2149 = vperm.xlu0 %4635, %v5531_v61   ;;  %2101 = vperm.xlu1 %4634, %v5533_v33   ;;  %7255 = vst [vmem:[#allocation32_spill] sm:$0xff] %v5551_v0  ;;  %7257 = vst [vmem:[#allocation34_spill] sm:$0xff] %v5557_v14  ;;  %v5580_v10 = vadd.f32 %v5466_v9, %v1564_v44 }
 0xb90   :  { %7258 = vst [vmem:[#allocation35_spill] sm:$0xff] %v5564_v23  ;;  %7259 = vst [vmem:[#allocation36_spill] sm:$0xff] %v5567_v1 }
 0xb91   :  { %7260 = vst [vmem:[#allocation37_spill] sm:$0xff] %v5573_v42  ;;  %7261 = vst [vmem:[#allocation38_spill] sm:$0xff] %v5575_v13 }
 0xb92   :  { %7262 = vst [vmem:[#allocation39_spill] sm:$0xff] %v5580_v10 }
 0xb93   :  { %2173 = vperm.xlu0 %4635, %v5540_v21   ;;  %2125 = vperm.xlu1 %4634, %v5542_v36   ;;  %v1548_v21 = vpop.xlane.xlu0 %1547 }
 0xb94   :  { %v1567_v43 = vadd.f32 %v5518_v54, %v1548_v21  ;;  %v5587_v21 = vadd.f32 %v1790_v22, %v1564_v44 }
 0xb96   :  { %v5583_v6 = vadd.f32 %v5419_v47, %v1567_v43  ;;  %7263 = vst [vmem:[#allocation40_spill] sm:$0xff] %v5587_v21  ;;  %v5590_v5 = vadd.f32 %v5441_v18, %v1567_v43  ;;  %v5595_v31 = vadd.f32 %v5411_v37, %v1567_v43  ;;  %v5598_v9 = vadd.f32 %v5492_v58, %v1567_v43 }
 0xb97   :  { %2197 = vperm.xlu1 %4634, %v5548_v7   ;;  %2047 = vperm.xlu0 %4635, %v5551_v0   ;;  %v5603_v47 = vadd.f32 %v5462_v59, %v1567_v43  ;;  %v5606_v18 = vadd.f32 %v5486_v26, %v1567_v43  ;;  %v1544_v22 = vpop.xlane.xlu0 %1543  ;;  %v5612_v58 = vadd.f32 %v5482_v28, %v1567_v43 }
 0xb98   :  { %7264 = vst [vmem:[#allocation41_spill] sm:$0xff] %v5590_v5  ;;  %7265 = vst [vmem:[#allocation42_spill] sm:$0xff] %v5595_v31  ;;  %v1565_v37 = vadd.f32 %v5518_v54, %v1544_v22  ;;  %v5615_v44 = vadd.f32 %v5496_v53, %v1567_v43  ;;  %v1554_v43 = vpop.xlane.xlu1 %1553 }
 0xb99   :  { %7266 = vst [vmem:[#allocation43_spill] sm:$0xff] %v5598_v9  ;;  %7267 = vst [vmem:[#allocation44_spill] sm:$0xff] %v5603_v47 }
 0xb9a   :  { %7268 = vst [vmem:[#allocation45_spill] sm:$0xff] %v5606_v18  ;;  %7269 = vst [vmem:[#allocation46_spill] sm:$0xff] %v5612_v58  ;;  %v5620_v59 = vadd.f32 %v5421_v50, %v1565_v37  ;;  %v5623_v26 = vadd.f32 %v5417_v45, %v1565_v37  ;;  %v5628_v28 = vadd.f32 %v5456_v3, %v1565_v37 }
 0xb9b   :  { %2221 = vperm.xlu1 %4634, %v5555_v38   ;;  %2119 = vperm.xlu0 %4635, %v5557_v14   ;;  %7270 = vst [vmem:[#allocation47_spill] sm:$0xff] %v5615_v44  ;;  %v5631_v53 = vadd.f32 %v5437_v4, %v1565_v37  ;;  %v5636_v50 = vadd.f32 %v5474_v20, %v1565_v37 }
 0xb9c   :  { %7271 = vst [vmem:[#allocation48_spill] sm:$0xff] %v5620_v59  ;;  %7272 = vst [vmem:[#allocation49_spill] sm:$0xff] %v5623_v26  ;;  %v5639_v45 = vadd.f32 %v5478_v24, %v1565_v37  ;;  %v5644_v3 = vadd.f32 %v5518_v54, %v1554_v43  ;;  %v5647_v4 = vadd.f32 %v5480_v30, %v1565_v37 }
 0xb9d   :  { %7273 = vst [vmem:[#allocation50_spill] sm:$0xff] %v5628_v28  ;;  %7274 = vst [vmem:[#allocation51_spill] sm:$0xff] %v5631_v53  ;;  %v5650_v22 = vadd.f32 %v5472_v19, %v1565_v37  ;;  %v1550_v37 = vpop.xlane.xlu1 %1549 }
 0xb9e   :  { %7275 = vst [vmem:[#allocation52_spill] sm:$0xff] %v5636_v50  ;;  %7276 = vst [vmem:[#allocation53_spill] sm:$0xff] %v5639_v45  ;;  %v5656_v20 = vadd.f32 %v5454_v62, %v5644_v3  ;;  %v5660_v24 = vadd.f32 %v5432_v57, %v5644_v3  ;;  %v5666_v19 = vadd.f32 %v5500_v40, %v5644_v3 }
 0xb9f   :  { %2071 = vperm.xlu1 %4634, %v5564_v23   ;;  %2143 = vperm.xlu0 %4635, %v5567_v1   ;;  %7277 = vst [vmem:[#allocation54_spill] sm:$0xff] %v5647_v4  ;;  %7278 = vst [vmem:[#allocation55_spill] sm:$0xff] %v5650_v22  ;;  %v5670_v30 = vadd.f32 %v5468_v11, %v5644_v3  ;;  %v1568_v57 = vadd.f32 %v5518_v54, %v1550_v37  ;;  %v1556_v37 = vpop.xlane.xlu0 %1555  ;;  %v7319_v23 = vld [vmem:[#allocation4_spill] sm:$0xff] }
 0xba0   :  { %7279 = vst [vmem:[#allocation56_spill] sm:$0xff] %v5656_v20  ;;  %7280 = vst [vmem:[#allocation57_spill] sm:$0xff] %v5660_v24  ;;  %v5677_v62 = vadd.f32 %v5506_v27, %v5644_v3  ;;  %v5681_v43 = vadd.f32 %v5498_v51, %v5644_v3  ;;  %v5687_v40 = vadd.f32 %v5508_v35, %v5644_v3 }
 0xba1   :  { %7281 = vst [vmem:[#allocation58_spill] sm:$0xff] %v5666_v19  ;;  %7282 = vst [vmem:[#allocation59_spill] sm:$0xff] %v5670_v30  ;;  %v5690_v11 = vadd.f32 %v5425_v55, %v1568_v57  ;;  %v5695_v27 = vadd.f32 %v5449_v29, %v1568_v57  ;;  %v5698_v51 = vadd.f32 %v5464_v8, %v1568_v57 }
 0xba2   :  { %7283 = vst [vmem:[#allocation60_spill] sm:$0xff] %v5677_v62  ;;  %7284 = vst [vmem:[#allocation61_spill] sm:$0xff] %v5681_v43  ;;  %v5703_v35 = vadd.f32 %v5476_v15, %v1568_v57  ;;  %v5706_v55 = vadd.f32 %v5470_v12, %v1568_v57  ;;  %v1571_v29 = vadd.f32 %v5518_v54, %v1556_v37 }
 0xba3   :  { %2095 = vperm.xlu1 %4634, %v5573_v42   ;;  %2215 = vperm.xlu0 %4635, %v5575_v13   ;;  %7285 = vst [vmem:[#allocation62_spill] sm:$0xff] %v5687_v40  ;;  %7286 = vst [vmem:[#allocation63_spill] sm:$0xff] %v5690_v11  ;;  %v5712_v8 = vadd.f32 %v5502_v49, %v1568_v57  ;;  %v5720_v12 = vadd.f32 %v5512_v63, %v1568_v57 }
 0xba4   :  { %7287 = vst [vmem:[#allocation64_spill] sm:$0xff] %v5695_v27  ;;  %7288 = vst [vmem:[#allocation65_spill] sm:$0xff] %v5698_v51  ;;  %v5723_v15 = vadd.f32 %v5427_v56, %v1571_v29  ;;  %v5728_v49 = vadd.f32 %v5415_v41, %v1571_v29  ;;  %v5736_v63 = vadd.f32 %v5516_v60, %v1571_v29 }
 0xba5   :  { %7289 = vst [vmem:[#allocation66_spill] sm:$0xff] %v5703_v35  ;;  %7290 = vst [vmem:[#allocation67_spill] sm:$0xff] %v5706_v55  ;;  %v5739_v56 = vadd.f32 %v5490_v34, %v1571_v29  ;;  %v5748_v37 = vadd.f32 %v5510_v2, %v1571_v29  ;;  %v7302_v34 = vld [vmem:[#allocation19_spill] sm:$0xff] }
 0xba6   :  { %7291 = vst [vmem:[#allocation68_spill] sm:$0xff] %v5712_v8  ;;  %7293 = vst [vmem:[#allocation70_spill] sm:$0xff] %v5720_v12 }
 0xba7   :  { %2167 = vperm.xlu1 %4634, %v5580_v10   ;;  %2080 = vperm.xlu0 %4635, %v5583_v6   ;;  %7294 = vst [vmem:[#allocation71_spill] sm:$0xff] %v5723_v15  ;;  %7295 = vst [vmem:[#allocation72_spill] sm:$0xff] %v5728_v49 }
 0xba8   :  { %7297 = vst [vmem:[#allocation74_spill] sm:$0xff] %v5736_v63  ;;  %7298 = vst [vmem:[#allocation75_spill] sm:$0xff] %v5739_v56 }
 0xba9   :  { %7300 = vst [vmem:[#allocation77_spill] sm:$0xff] %v5748_v37 }
 0xbab   :  { %2191 = vperm.xlu1 %4634, %v5587_v21   ;;  %2104 = vperm.xlu0 %4635, %v5590_v5  }
 0xbaf   :  { %2056 = vperm.xlu1 %4634, %v5595_v31   ;;  %2176 = vperm.xlu0 %4635, %v5598_v9  }
 0xbb3   :  { %2128 = vperm.xlu1 %4634, %v5603_v47   ;;  %2200 = vperm.xlu0 %4635, %v5606_v18  }
 0xbb7   :  { %2152 = vperm.xlu1 %4634, %v5612_v58   ;;  %2224 = vperm.xlu0 %4635, %v5615_v44  }
 0xbbb   :  { %2050 = vperm.xlu1 %4634, %v5620_v59   ;;  %2074 = vperm.xlu0 %4635, %v5623_v26  }
 0xbbf   :  { %2122 = vperm.xlu1 %4634, %v5628_v28   ;;  %2098 = vperm.xlu0 %4635, %v5631_v53  }
 0xbc3   :  { %2146 = vperm.xlu1 %4634, %v5636_v50   ;;  %2170 = vperm.xlu0 %4635, %v5639_v45  }
 0xbc7   :  { %2218 = vperm.xlu1 %4634, %v5647_v4   ;;  %2194 = vperm.xlu0 %4635, %v5650_v22  }
 0xbcb   :  { %2089 = vperm.xlu0 %4635, %v5656_v20   ;;  %2065 = vperm.xlu1 %4634, %v5660_v24  }
 0xbcf   :  { %2185 = vperm.xlu0 %4635, %v5666_v19   ;;  %2113 = vperm.xlu1 %4634, %v5670_v30   ;;  %v7312_v19 = vld [vmem:[#allocation23_spill] sm:$0xff] }
 0xbd3   :  { %2209 = vperm.xlu0 %4635, %v5677_v62   ;;  %2137 = vperm.xlu1 %4634, %v5681_v43   ;;  %v5715_v62 = vadd.f32 %v5504_v46, %v1568_v57  ;;  %v5731_v46 = vadd.f32 %v5452_v39, %v1571_v29  ;;  %v1552_v57 = vpop.xlane.xlu0 %1551  ;;  %v5745_v39 = vadd.f32 %v5535_v25, %v1571_v29 }
 0xbd4   :  { %v1569_v41 = vadd.f32 %v5518_v54, %v1552_v57  ;;  %v7304_v54 = vld [vmem:[#allocation20_spill] sm:$0xff]  ;;  %v7306_v57 = vld [vmem:[#allocation22_spill] sm:$0xff] }
 0xbd5   :  { %7292 = vst [vmem:[#allocation69_spill] sm:$0xff] %v5715_v62  ;;  %7296 = vst [vmem:[#allocation73_spill] sm:$0xff] %v5731_v46 }
 0xbd6   :  { %7299 = vst [vmem:[#allocation76_spill] sm:$0xff] %v5745_v39  ;;  %v5753_v60 = vadd.f32 %v5423_v52, %v1569_v41  ;;  %v5761_v25 = vadd.f32 %v7304_v54, %v1569_v41  ;;  %v5764_v2 = vadd.f32 %v7306_v57, %v1569_v41  ;;  %v5769_v52 = vadd.f32 %v5521_v48, %v1569_v41 }
 0xbd7   :  { %2161 = vperm.xlu1 %4634, %v5687_v40   ;;  %2059 = vperm.xlu0 %4635, %v5690_v11   ;;  %v5777_v54 = vadd.f32 %v5546_v16, %v1569_v41  ;;  %v5780_v57 = vadd.f32 %v7312_v19, %v1569_v41  ;;  %v5786_v48 = vadd.f32 %v5559_v17, %v5644_v3 }
 0xbd8   :  { %7301 = vst [vmem:[#allocation78_spill] sm:$0xff] %v5753_v60  ;;  %7305 = vst [vmem:[#allocation20_spill] sm:$0xff] %v5761_v25 }
 0xbd9   :  { %7307 = vst [vmem:[#allocation22_spill] sm:$0xff] %v5764_v2  ;;  %7308 = vst [vmem:[#allocation79_spill] sm:$0xff] %v5769_v52 }
 0xbda   :  { %7311 = vst [vmem:[#allocation80_spill] sm:$0xff] %v5777_v54  ;;  %7313 = vst [vmem:[#allocation23_spill] sm:$0xff] %v5780_v57 }
 0xbdb   :  { %2083 = vperm.xlu1 %4634, %v5695_v27   ;;  %2107 = vperm.xlu0 %4635, %v5698_v51   ;;  %7314 = vst [vmem:[#allocation81_spill] sm:$0xff] %v5786_v48 }
 0xbdf   :  { %2155 = vperm.xlu1 %4634, %v5703_v35   ;;  %2131 = vperm.xlu0 %4635, %v5706_v55  }
 0xbe3   :  { %2179 = vperm.xlu1 %4634, %v5712_v8   ;;  %2227 = vperm.xlu0 %4635, %v5715_v62   ;;  %v5756_v62 = vadd.f32 %v7302_v34, %v1569_v41 }
 0xbe5   :  { %7303 = vst [vmem:[#allocation19_spill] sm:$0xff] %v5756_v62 }
 0xbe7   :  { %2203 = vperm.xlu1 %4634, %v5720_v12   ;;  %2092 = vperm.xlu0 %4635, %v5723_v15  }
 0xbeb   :  { %2068 = vperm.xlu1 %4634, %v5728_v49   ;;  %2116 = vperm.xlu0 %4635, %v5731_v46  }
 0xbef   :  { %2164 = vperm.xlu1 %4634, %v5736_v63   ;;  %2140 = vperm.xlu0 %4635, %v5739_v56  }
 0xbf3   :  { %2188 = vperm.xlu1 %4634, %v5745_v39   ;;  %2212 = vperm.xlu0 %4635, %v5748_v37   ;;  %v7309_v37 = vld [vmem:[#allocation21_spill] sm:$0xff] }
 0xbf4   :  { %v5772_v34 = vadd.f32 %v7309_v37, %v1569_v41  ;;  %v7315_v37 = vld [vmem:[#allocation24_spill] sm:$0xff] }
 0xbf5   :  { %v5789_v44 = vadd.f32 %v7315_v37, %v1571_v29 }
 0xbf6   :  { %7310 = vst [vmem:[#allocation21_spill] sm:$0xff] %v5772_v34 }
 0xbf7   :  { %2086 = vperm.xlu1 %4634, %v5753_v60   ;;  %2062 = vperm.xlu0 %4635, %v5756_v62   ;;  %7316 = vst [vmem:[#allocation24_spill] sm:$0xff] %v5789_v44 }
 0xbfb   :  { %2110 = vperm.xlu1 %4634, %v5761_v25   ;;  %2134 = vperm.xlu0 %4635, %v5764_v2   ;;  %v7317_v25 = vld [vmem:[#allocation5_spill] sm:$0xff] }
 0xbff   :  { %2206 = vperm.xlu1 %4634, %v5769_v52   ;;  %2158 = vperm.xlu0 %4635, %v5772_v34  }
 0xc03   :  { %2230 = vperm.xlu1 %4634, %v5777_v54   ;;  %2182 = vperm.xlu0 %4635, %v5780_v57  }
 0xc07   :  { %2233 = vperm.xlu1 %4634, %v5786_v48   ;;  %2236 = vperm.xlu0 %4635, %v5789_v44  }
 0xc0a   :  { %v5793_v16 = vpop.permute.xlu0 %2077  ;;  %v5795_v56 = vpop.permute.xlu1 %2053 }
 0xc0b   :  { %v2289_v53 = vrot.slane %v5793_v16, %v7317_v25  ;;  %v2250_v24 = vrot.slane %v5795_v56, %v7317_v25  ;;  %v7318_v16 = vld [vmem:[#allocation3_spill] sm:$0xff] }
 0xc0e   :  { %v5797_v19 = vpop.permute.xlu0 %2149  ;;  %v5799_v41 = vpop.permute.xlu1 %2101 }
 0xc0f   :  { %v2406_v42 = vrot.slane %v5797_v19, %v7317_v25  ;;  %v2328_v10 = vrot.slane %v5799_v41, %v7317_v25 }
 0xc12   :  { %v5801_v57 = vpop.permute.xlu0 %2173  ;;  %v5803_v18 = vpop.permute.xlu1 %2125 }
 0xc13   :  { %v2445_v60 = vrot.slane %v5801_v57, %v7317_v25  ;;  %v2367_v26 = vrot.slane %v5803_v18, %v7317_v25 }
 0xc16   :  { %v5805_v17 = vpop.permute.xlu0 %2047  ;;  %v5807_v3 = vpop.permute.xlu1 %2197 }
 0xc17   :  { %v2241_v19 = vrot.slane %v5805_v17, %v7319_v23  ;;  %v2484_v41 = vrot.slane %v5807_v3, %v7317_v25  ;;  %v7320_v3 = vld [vmem:[#allocation6_spill] sm:$0xff] }
 0xc1a   :  { %v5809_v29 = vpop.permute.xlu0 %2119  ;;  %v5811_v37 = vpop.permute.xlu1 %2221 }
 0xc1b   :  { %v2358_v57 = vrot.slane %v5809_v29, %v7319_v23  ;;  %v2523_v18 = vrot.slane %v5811_v37, %v7317_v25 }
 0xc1e   :  { %v5813_v44 = vpop.permute.xlu0 %2143  ;;  %v5815_v34 = vpop.permute.xlu1 %2071 }
 0xc22   :  { %v5817_v46 = vpop.permute.xlu0 %2215  ;;  %v5819_v13 = vpop.permute.xlu1 %2095 }
 0xc23   :  { %v2514_v17 = vrot.slane %v5817_v46, %v7319_v23 }
 0xc26   :  { %v5821_v9 = vpop.permute.xlu0 %2080  ;;  %v5823_v48 = vpop.permute.xlu1 %2167 }
 0xc2a   :  { %v5825_v2 = vpop.permute.xlu0 %2104  ;;  %v5827_v54 = vpop.permute.xlu1 %2191 }
 0xc2e   :  { %v5829_v15 = vpop.permute.xlu0 %2176  ;;  %v5831_v39 = vpop.permute.xlu1 %2056 }
 0xc32   :  { %v5833_v22 = vpop.permute.xlu0 %2200  ;;  %v5835_v52 = vpop.permute.xlu1 %2128 }
 0xc36   :  { %v5837_v63 = vpop.permute.xlu0 %2224  ;;  %v5839_v55 = vpop.permute.xlu1 %2152 }
 0xc3a   :  { %v2075_v12 = vpop.permute.xlu0 %2074  ;;  %v2051_v20 = vpop.permute.xlu1 %2050 }
 0xc3b   :  { %v2284_v50 = vrot.slane %v2075_v12, %v7318_v16  ;;  %v2245_v56 = vrot.slane %v2051_v20, %v7318_v16  ;;  %v2397_v12 = vrot.slane %v5813_v44, %v7319_v23  ;;  %v2280_v20 = vrot.slane %v5815_v34, %v7319_v23 }
 0xc3c   :  { %v2436_v44 = vrot.slane %v5823_v48, %v7319_v23  ;;  %v2475_v48 = vrot.slane %v5827_v54, %v7319_v23 }
 0xc3d   :  { %v2285_v34 = vsel %vm251_vm0, %v2284_v50, %v2280_v20  ;;  %v2246_v25 = vsel %vm251_vm0, %v2245_v56, %v2241_v19  ;;  %v2450_v50 = vrot.slane %v5829_v15, %v7320_v3  ;;  %v2255_v56 = vrot.slane %v5831_v39, %v7320_v3 }
 0xc3e   :  { %v2099_v40 = vpop.permute.xlu0 %2098  ;;  %v2123_v45 = vpop.permute.xlu1 %2122  ;;  %v2372_v15 = vrot.slane %v5835_v52, %v7320_v3  ;;  %v2411_v52 = vrot.slane %v5839_v55, %v7320_v3 }
 0xc3f   :  { %v2323_v36 = vrot.slane %v2099_v40, %v7318_v16  ;;  %v2362_v59 = vrot.slane %v2123_v45, %v7318_v16  ;;  %v2319_v40 = vrot.slane %v5819_v13, %v7319_v23  ;;  %v2294_v45 = vrot.slane %v5821_v9, %v7320_v3 }
 0xc40   :  { %v2333_v13 = vrot.slane %v5825_v2, %v7320_v3  ;;  %v2290_v2 = vsel %vm258_vm1, %v2289_v53, %v2285_v34 }
 0xc41   :  { %v2324_v9 = vsel %vm251_vm0, %v2323_v36, %v2319_v40  ;;  %v2251_v36 = vsel %vm258_vm1, %v2250_v24, %v2246_v25  ;;  %v2528_v24 = vrot.slane %v5837_v63, %v7320_v3  ;;  %v2295_v20 = vsel %vm265_vm2, %v2294_v45, %v2290_v2 }
 0xc42   :  { %v5841_v38 = vpop.permute.xlu0 %2170  ;;  %v2147_v61 = vpop.permute.xlu1 %2146  ;;  %v2329_v39 = vsel %vm258_vm1, %v2328_v10, %v2324_v9 }
 0xc43   :  { %v2401_v29 = vrot.slane %v2147_v61, %v7318_v16  ;;  %v2440_v46 = vrot.slane %v5841_v38, %v7318_v16  ;;  %v2363_v61 = vsel %vm251_vm0, %v2362_v59, %v2358_v57  ;;  %v2489_v38 = vrot.slane %v5833_v22, %v7320_v3  ;;  %v7321_v57 = vld [vmem:[#allocation7_spill] sm:$0xff] }
 0xc44   :  { %v2368_v22 = vsel %vm258_vm1, %v2367_v26, %v2363_v61  ;;  %v2256_v26 = vsel %vm265_vm2, %v2255_v56, %v2251_v36  ;;  %v7323_v56 = vld [vmem:[#allocation9_spill] sm:$0xff] }
 0xc45   :  { %v2402_v59 = vsel %vm251_vm0, %v2401_v29, %v2397_v12  ;;  %v2441_v53 = vsel %vm251_vm0, %v2440_v46, %v2436_v44 }
 0xc46   :  { %v5843_v8 = vpop.permute.xlu0 %2194  ;;  %v5845_v51 = vpop.permute.xlu1 %2218  ;;  %v2407_v10 = vsel %vm258_vm1, %v2406_v42, %v2402_v59  ;;  %v2446_v40 = vsel %vm258_vm1, %v2445_v60, %v2441_v53  ;;  %v7322_v42 = vld [vmem:[#allocation8_spill] sm:$0xff] }
 0xc47   :  { %v2479_v0 = vrot.slane %v5843_v8, %v7318_v16  ;;  %v2518_v8 = vrot.slane %v5845_v51, %v7318_v16  ;;  %v2412_v9 = vsel %vm265_vm2, %v2411_v52, %v2407_v10  ;;  %v2451_v61 = vsel %vm265_vm2, %v2450_v50, %v2446_v40 }
 0xc49   :  { %v2480_v25 = vsel %vm251_vm0, %v2479_v0, %v2475_v48  ;;  %v2519_v29 = vsel %vm251_vm0, %v2518_v8, %v2514_v17  ;;  %v2334_v0 = vsel %vm265_vm2, %v2333_v13, %v2329_v39 }
 0xc4a   :  { %v5847_v43 = vpop.permute.xlu0 %2089  ;;  %v5849_v62 = vpop.permute.xlu1 %2065 }
 0xc4b   :  { %v2309_v2 = vrot.slane %v5847_v43, %v7323_v56  ;;  %v2270_v36 = vrot.slane %v5849_v62, %v7323_v56  ;;  %v7324_v62 = vld [vmem:[#allocation10_spill] sm:$0xff] }
 0xc4e   :  { %v5851_v4 = vpop.permute.xlu0 %2185  ;;  %v5853_v1 = vpop.permute.xlu1 %2113 }
 0xc52   :  { %v5855_v7 = vpop.permute.xlu0 %2209  ;;  %v5857_v5 = vpop.permute.xlu1 %2137 }
 0xc53   :  { %v2387_v52 = vrot.slane %v5857_v5, %v7323_v56 }
 0xc56   :  { %v5859_v35 = vpop.permute.xlu0 %2059  ;;  %v5861_v11 = vpop.permute.xlu1 %2161 }
 0xc57   :  { %v2260_v51 = vrot.slane %v5859_v35, %v7321_v57  ;;  %v2373_v35 = vsel %vm265_vm2, %v2372_v15, %v2368_v22 }
 0xc59   :  { %v2261_v60 = vsel %vm272_vm3, %v2260_v51, %v2256_v26 }
 0xc5a   :  { %v5863_v30 = vpop.permute.xlu0 %2107  ;;  %v5865_v28 = vpop.permute.xlu1 %2083 }
 0xc5b   :  { %v2299_v12 = vrot.slane %v5865_v28, %v7321_v57  ;;  %v2485_v28 = vsel %vm258_vm1, %v2484_v41, %v2480_v25  ;;  %v2338_v55 = vrot.slane %v5863_v30, %v7321_v57  ;;  %v2524_v41 = vsel %vm258_vm1, %v2523_v18, %v2519_v29 }
 0xc5c   :  { %v2490_v59 = vsel %vm265_vm2, %v2489_v38, %v2485_v28 }
 0xc5d   :  { %v2300_v17 = vsel %vm272_vm3, %v2299_v12, %v2295_v20  ;;  %v2339_v18 = vsel %vm272_vm3, %v2338_v55, %v2334_v0 }
 0xc5e   :  { %v5867_v49 = vpop.permute.xlu0 %2131  ;;  %v5869_v14 = vpop.permute.xlu1 %2155 }
 0xc5f   :  { %v2377_v13 = vrot.slane %v5867_v49, %v7321_v57  ;;  %v2348_v49 = vrot.slane %v5853_v1, %v7323_v56  ;;  %v2416_v50 = vrot.slane %v5869_v14, %v7321_v57 }
 0xc61   :  { %v2378_v43 = vsel %vm272_vm3, %v2377_v13, %v2373_v35  ;;  %v2417_v5 = vsel %vm272_vm3, %v2416_v50, %v2412_v9 }
 0xc62   :  { %v5871_v21 = vpop.permute.xlu0 %2227  ;;  %v5873_v33 = vpop.permute.xlu1 %2179 }
 0xc66   :  { %v5875_v58 = vpop.permute.xlu0 %2092  ;;  %v5877_v31 = vpop.permute.xlu1 %2203 }
 0xc67   :  { %v2314_v53 = vrot.slane %v5875_v58, %v7324_v62  ;;  %v2494_v25 = vrot.slane %v5877_v31, %v7321_v57  ;;  %v2426_v58 = vrot.slane %v5861_v11, %v7323_v56  ;;  %v2455_v11 = vrot.slane %v5873_v33, %v7321_v57 }
 0xc6a   :  { %v5887_v47 = vpop.permute.xlu0 %2116  ;;  %v5889_v32 = vpop.permute.xlu1 %2068 }
 0xc6b   :  { %v2275_v14 = vrot.slane %v5889_v32, %v7324_v62  ;;  %v2353_v10 = vrot.slane %v5887_v47, %v7324_v62 }
 0xc6e   :  { %v5918_v27 = vpop.permute.xlu0 %2140  ;;  %v5920_v37 = vpop.permute.xlu1 %2164 }
 0xc6f   :  { %v2392_v28 = vrot.slane %v5918_v27, %v7324_v62 }
 0xc72   :  { %v5947_v19 = vpop.permute.xlu0 %2212  ;;  %v5949_v54 = vpop.permute.xlu1 %2188 }
 0xc76   :  { %v2063_v44 = vpop.permute.xlu0 %2062  ;;  %v2087_v34 = vpop.permute.xlu1 %2086 }
 0xc77   :  { %v2265_v46 = vrot.slane %v2063_v44, %v7322_v42  ;;  %v2304_v45 = vrot.slane %v2087_v34, %v7322_v42  ;;  %v2533_v44 = vrot.slane %v5871_v21, %v7321_v57  ;;  %v2495_v34 = vsel %vm272_vm3, %v2494_v25, %v2490_v59 }
 0xc78   :  { %v2504_v21 = vrot.slane %v5855_v7, %v7323_v56  ;;  %v2529_v7 = vsel %vm265_vm2, %v2528_v24, %v2524_v41 }
 0xc79   :  { %v2266_v30 = vsel %vm279_vm4, %v2265_v46, %v2261_v60  ;;  %v2305_v48 = vsel %vm279_vm4, %v2304_v45, %v2300_v17  ;;  %v2431_v46 = vrot.slane %v5920_v37, %v7324_v62  ;;  %v2465_v37 = vrot.slane %v5851_v4, %v7323_v56 }
 0xc7a   :  { %v2135_v8 = vpop.permute.xlu0 %2134  ;;  %v2111_v15 = vpop.permute.xlu1 %2110  ;;  %v2271_v1 = vsel %vm286_vm5, %v2270_v36, %v2266_v30  ;;  %v2310_v38 = vsel %vm286_vm5, %v2309_v2, %v2305_v48  ;;  %v2456_v48 = vsel %vm272_vm3, %v2455_v11, %v2451_v61  ;;  %v2534_v4 = vsel %vm272_vm3, %v2533_v44, %v2529_v7  ;;  %v7331_v44 = vld [vmem:[#allocation15_spill] sm:$0xff] }
 0xc7b   :  { %v2382_v39 = vrot.slane %v2135_v8, %v7322_v42  ;;  %v2343_v22 = vrot.slane %v2111_v15, %v7322_v42  ;;  %v2276_v32 = vsel %vm293_vm6, %v2275_v14, %v2271_v1  ;;  %v2315_v40 = vsel %vm293_vm6, %v2314_v53, %v2310_v38 }
 0xc7c   :  { %v2550_v45 = vsel %vm295_vm8, %v2315_v40, %v2276_v32  ;;  %v2509_v61 = vrot.slane %v5947_v19, %v7324_v62  ;;  %v7328_v32 = vld [vmem:[#allocation32_spill] sm:$0xff] }
 0xc7d   :  { %v2383_v51 = vsel %vm279_vm4, %v2382_v39, %v2378_v43  ;;  %v2344_v12 = vsel %vm279_vm4, %v2343_v22, %v2339_v18 }
 0xc7e   :  { %v2349_v26 = vsel %vm286_vm5, %v2348_v49, %v2344_v12  ;;  %v2159_v31 = vpop.permute.xlu0 %2158  ;;  %v2207_v20 = vpop.permute.xlu1 %2206  ;;  %v2388_v47 = vsel %vm286_vm5, %v2387_v52, %v2383_v51  ;;  %v2470_v49 = vrot.slane %v5949_v54, %v7324_v62  ;;  %v7325_v12 = vld [vmem:[#allocation11_spill] sm:$0xff] }
 0xc7f   :  { %v2421_v29 = vrot.slane %v2159_v31, %v7322_v42  ;;  %v2499_v0 = vrot.slane %v2207_v20, %v7322_v42  ;;  %v2354_v35 = vsel %vm293_vm6, %v2353_v10, %v2349_v26  ;;  %v2393_v9 = vsel %vm293_vm6, %v2392_v28, %v2388_v47  ;;  %v7327_v26 = vld [vmem:[#allocation14_spill] sm:$0xff] }
 0xc80   :  { %v2551_v27 = vsel %vm296_vm9, %v2354_v35, %v2550_v45  ;;  %v7333_v45 = vld [vmem:[#allocation35_spill] sm:$0xff] }
 0xc81   :  { %v2422_v55 = vsel %vm279_vm4, %v2421_v29, %v2417_v5  ;;  %v2500_v60 = vsel %vm279_vm4, %v2499_v0, %v2495_v34  ;;  %v2552_v63 = vsel %vm298_vm10, %v2393_v9, %v2551_v27  ;;  %v7329_v29 = vld [vmem:[#allocation64_spill] sm:$0xff]  ;;  %v7335_v9 = vld [vmem:[#allocation49_spill] sm:$0xff] }
 0xc82   :  { %v2427_v33 = vsel %vm286_vm5, %v2426_v58, %v2422_v55  ;;  %v2183_v17 = vpop.permute.xlu0 %2182  ;;  %v2231_v13 = vpop.permute.xlu1 %2230  ;;  %v2505_v59 = vsel %vm286_vm5, %v2504_v21, %v2500_v60  ;;  %v7326_v58 = vld [vmem:[#allocation12_spill] sm:$0xff]  ;;  %v7332_v55 = vld [vmem:[#allocation30_spill] sm:$0xff] }
 0xc83   :  { %v2460_v30 = vrot.slane %v2183_v17, %v7322_v42  ;;  %v2432_v2 = vsel %vm293_vm6, %v2431_v46, %v2427_v33  ;;  %v2538_v36 = vrot.slane %v2231_v13, %v7322_v42  ;;  %v2510_v43 = vsel %vm293_vm6, %v2509_v61, %v2505_v59  ;;  %v7330_v5 = vld [vmem:[#allocation48_spill] sm:$0xff] }
 0xc84   :  { %v2553_v39 = vsel %vm300_vm11, %v2432_v2, %v2552_v63  ;;  %v7334_v17 = vld [vmem:[#allocation52_spill] sm:$0xff] }
 0xc85   :  { %v2461_v8 = vsel %vm279_vm4, %v2460_v30, %v2456_v48  ;;  %v2539_v22 = vsel %vm279_vm4, %v2538_v36, %v2534_v4  ;;  %v7337_v36 = vld [vmem:[#allocation26_spill] sm:$0xff] }
 0xc86   :  { %v2466_v15 = vsel %vm286_vm5, %v2465_v37, %v2461_v8  ;;  %v2237_v18 = vpop.permute.xlu0 %2236  ;;  %v2234_v50 = vpop.permute.xlu1 %2233  ;;  %v7336_v37 = vld [vmem:[#allocation78_spill] sm:$0xff]  ;;  %v7338_v8 = vld [vmem:[#allocation16_spill] sm:$0xff] }
 0xc87   :  { %v2548_v24 = vrot.slane %v2237_v18, %v7324_v62  ;;  %v2543_v41 = vrot.slane %v2234_v50, %v7323_v56  ;;  %v2471_v54 = vsel %vm293_vm6, %v2470_v49, %v2466_v15  ;;  %v7339_v15 = vld [vmem:[#allocation44_spill] sm:$0xff]  ;;  %v7340_v50 = vld [vmem:[#allocation13_spill] sm:$0xff] }
 0xc88   :  { %v2554_v19 = vsel %vm302_vm12, %v2471_v54, %v2553_v39 }
 0xc89   :  { %v2544_v53 = vsel %vm286_vm5, %v2543_v41, %v2539_v22  ;;  %v2555_v1 = vsel %vm304_vm13, %v2510_v43, %v2554_v19  ;;  %v7341_v41 = vld [vmem:[#allocation25_spill] sm:$0xff]  ;;  %v7342_v19 = vld [vmem:[#allocation39_spill] sm:$0xff] }
 0xc8a   :  { %v2549_v38 = vsel %vm293_vm6, %v2548_v24, %v2544_v53 }
 0xc8b   :  { %v2556_v25 = vsel %vm306_vm14, %v2549_v38, %v2555_v1  ;;  %v7343_v38 = vld [vmem:[#allocation37_spill] sm:$0xff] }
 0xc8c   :  { %v2558_v14 = vsel %vm357_vm7, %v2556_v25, -inf }
 0xc8d   :  { %2559 = vmax.xlane.f32.xlu1 %v2558_v14 }
 0xd1a   :  { %v6071_v51 = vpop.xlane.xlu1 %2559 }
 0xd1b   :  { %v6075_v52 = vrot.slane %v6071_v51, %v7325_v12  ;;  %v6079_v10 = vrot.slane %v6071_v51, %v7326_v58  ;;  %v6083_v31 = vrot.slane %v6071_v51, %v7327_v26  ;;  %v6095_v34 = vrot.slane %v6071_v51, %v7331_v44 }
 0xd1c   :  { %v6116_v4 = vrot.slane %v6071_v51, %v7338_v8  ;;  %v6123_v63 = vrot.slane %v6071_v51, %v7340_v50 }
 0xd1d   :  { %v2613_v20 = vsub.f32 %v5583_v6, %v6079_v10  ;;  %v2602_v40 = vsub.f32 %v7328_v32, %v6075_v52  ;;  %v2614_v0 = vsub.f32 %v7329_v29, %v6079_v10  ;;  %v2603_v11 = vsub.f32 %v7330_v5, %v6075_v52  ;;  %v7346_v5 = vld [vmem:[#allocation51_spill] sm:$0xff] }
 0xd1e   :  { %v2628_v6 = vsub.f32 %v7332_v55, %v6083_v31  ;;  %v2610_v33 = vsub.f32 %v7333_v45, %v6079_v10  ;;  %v2635_v13 = vsub.f32 %v7334_v17, %v6095_v34  ;;  %v2611_v27 = vsub.f32 %v7335_v9, %v6079_v10  ;;  %v7349_v55 = vld [vmem:[#allocation20_spill] sm:$0xff]  ;;  %v7350_v45 = vld [vmem:[#allocation42_spill] sm:$0xff] }
 0xd1f   :  { %v2688_v47 = vmul.f32 1.442695, %v2613_v20  ;;  %v2666_v35 = vmul.f32 1.442695, %v2602_v40  ;;  %v2690_v28 = vmul.f32 1.442695, %v2614_v0  ;;  %v2615_v48 = vsub.f32 %v7336_v37, %v6079_v10 }
 0xd20   :  { %v2668_v46 = vmul.f32 1.442695, %v2603_v11  ;;  %v2718_v60 = vmul.f32 1.442695, %v2628_v6  ;;  %v2682_v21 = vmul.f32 1.442695, %v2610_v33  ;;  %v2604_v7 = vsub.f32 %v7337_v36, %v6075_v52 }
 0xd21   :  { %4764 = vpow2.f32 %v2688_v47  ;;  %v2732_v30 = vmul.f32 1.442695, %v2635_v13  ;;  %v2684_v2 = vmul.f32 1.442695, %v2611_v27  ;;  %v2692_v61 = vmul.f32 1.442695, %v2615_v48 }
 0xd22   :  { %4766 = vpow2.f32 %v2666_v35  ;;  %v2629_v18 = vsub.f32 %v7339_v15, %v6083_v31  ;;  %v2670_v24 = vmul.f32 1.442695, %v2604_v7  ;;  %v2612_v54 = vsub.f32 %v7341_v41, %v6079_v10  ;;  %v7345_v40 = vld [vmem:[#allocation57_spill] sm:$0xff]  ;;  %v7353_v27 = vld [vmem:[#allocation46_spill] sm:$0xff]  ;;  %v7354_v48 = vld [vmem:[#allocation28_spill] sm:$0xff] }
 0xd23   :  { %4768 = vpow2.f32 %v2690_v28  ;;  %v2642_v53 = vsub.f32 %v7342_v19, %v6116_v4  ;;  %v2618_v25 = vsub.f32 %v7343_v38, %v6123_v63  ;;  %v2608_v29 = vsub.f32 %v7345_v40, %v6075_v52  ;;  %v7352_v13 = vld [vmem:[#allocation17_spill] sm:$0xff]  ;;  %v7356_v15 = vld [vmem:[#allocation40_spill] sm:$0xff]  ;;  %v7357_v41 = vld [vmem:[#allocation34_spill] sm:$0xff] }
 0xd24   :  { %4770 = vpow2.f32 %v2668_v46  ;;  %v2720_v43 = vmul.f32 1.442695, %v2629_v18  ;;  %v2686_v1 = vmul.f32 1.442695, %v2612_v54  ;;  %v2619_v11 = vsub.f32 %v7346_v5, %v6123_v63 }
 0xd25   :  { %4772 = vpow2.f32 %v2718_v60  ;;  %v2746_v32 = vmul.f32 1.442695, %v2642_v53  ;;  %v2698_v0 = vmul.f32 1.442695, %v2618_v25  ;;  %v2678_v28 = vmul.f32 1.442695, %v2608_v29 }
 0xd26   :  { %4774 = vpow2.f32 %v2682_v21  ;;  %v2623_v6 = vsub.f32 %v7349_v55, %v6123_v63  ;;  %v2700_v46 = vmul.f32 1.442695, %v2619_v11  ;;  %v2605_v33 = vsub.f32 %v7350_v45, %v6075_v52  ;;  %v7364_v11 = vld [vmem:[#allocation59_spill] sm:$0xff] }
 0xd27   :  { %4776 = vpow2.f32 %v2732_v30  ;;  %v6164_v21 = vrot.slane %v6071_v51, %v7352_v13  ;;  %v2637_v30 = vsub.f32 %v7353_v27, %v6095_v34  ;;  %v2626_v54 = vsub.f32 %v7357_v41, %v6083_v31  ;;  %v7368_v27 = vld [vmem:[#allocation66_spill] sm:$0xff] }
 0xd28   :  { %4778 = vpow2.f32 %v2684_v2  ;;  %v2708_v9 = vmul.f32 1.442695, %v2623_v6  ;;  %v2672_v37 = vmul.f32 1.442695, %v2605_v33  ;;  %v2620_v2 = vsub.f32 %v7354_v48, %v6123_v63  ;;  %v7365_v6 = vld [vmem:[#allocation63_spill] sm:$0xff]  ;;  %v7369_v48 = vld [vmem:[#allocation41_spill] sm:$0xff] }
 0xd29   :  { %4780 = vpow2.f32 %v2692_v61  ;;  %v2736_v61 = vmul.f32 1.442695, %v2637_v30  ;;  %v2650_v18 = vsub.f32 %v7356_v15, %v6164_v21  ;;  %v2714_v25 = vmul.f32 1.442695, %v2626_v54  ;;  %v7373_v54 = vld [vmem:[#allocation31_spill] sm:$0xff] }
 0xd2a   :  { %4782 = vpow2.f32 %v2670_v24  ;;  %v2702_v24 = vmul.f32 1.442695, %v2620_v2  ;;  %v2638_v30 = vsub.f32 %v7368_v27, %v6095_v34  ;;  %v2621_v2 = vsub.f32 %v7369_v48, %v6123_v63 }
 0xd2b   :  { %v6109_v49 = vpop.eup %4764  ;;  %4784 = vpow2.f32 %v2720_v43  ;;  %v2762_v53 = vmul.f32 1.442695, %v2650_v18  ;;  %v7372_v18 = vld [vmem:[#allocation18_spill] sm:$0xff] }
 0xd2c   :  { %v6111_v59 = vpop.eup %4766  ;;  %2892 = vperm.xlu1 %4634, %v6109_v49   ;;  %4786 = vpow2.f32 %v2686_v1  ;;  %v7360_v1 = vld [vmem:[#allocation72_spill] sm:$0xff]  ;;  %v2738_v41 = vmul.f32 1.442695, %v2638_v30  ;;  %v7381_v30 = vld [vmem:[#allocation61_spill] sm:$0xff] }
 0xd2d   :  { %2859 = vperm.xlu0 %4635, %v6111_v59   ;;  %v6127_v39 = vpop.eup %4768  ;;  %4788 = vpow2.f32 %v2746_v32  ;;  %v2609_v38 = vsub.f32 %v7360_v1, %v6075_v52  ;;  %v7361_v32 = vld [vmem:[#allocation50_spill] sm:$0xff]  ;;  %v2704_v1 = vmul.f32 1.442695, %v2621_v2  ;;  %v7382_v2 = vld [vmem:[#allocation65_spill] sm:$0xff] }
 0xd2e   :  { %v6129_v22 = vpop.eup %4770  ;;  %4790 = vpow2.f32 %v2698_v0  ;;  %v2627_v40 = vsub.f32 %v7361_v32, %v6083_v31 }
 0xd2f   :  { %v6137_v14 = vpop.eup %4772  ;;  %4792 = vpow2.f32 %v2678_v28  ;;  %v2680_v5 = vmul.f32 1.442695, %v2609_v38  ;;  %v2624_v28 = vsub.f32 %v7364_v11, %v6123_v63  ;;  %v7374_v38 = vld [vmem:[#allocation36_spill] sm:$0xff] }
 0xd30   :  { %2895 = vperm.xlu1 %4634, %v6127_v39   ;;  %v6139_v20 = vpop.eup %4774  ;;  %4794 = vpow2.f32 %v2700_v46  ;;  %v2716_v55 = vmul.f32 1.442695, %v2627_v40  ;;  %v2606_v46 = vsub.f32 %v7365_v6, %v6075_v52 }
 0xd31   :  { %2862 = vperm.xlu0 %4635, %v6129_v22   ;;  %7344 = vst [vmem:[#allocation3_spill] sm:$0xff] %v6139_v20  ;;  %v6147_v47 = vpop.eup %4776  ;;  %4796 = vpow2.f32 %v2708_v9  ;;  %v2710_v9 = vmul.f32 1.442695, %v2624_v28 }
 0xd32   :  { %7347 = vst [vmem:[#allocation4_spill] sm:$0xff] %v6147_v47  ;;  %v6149_v35 = vpop.eup %4778  ;;  %4798 = vpow2.f32 %v2672_v37  ;;  %v2674_v37 = vmul.f32 1.442695, %v2606_v46 }
 0xd33   :  { %7348 = vst [vmem:[#allocation6_spill] sm:$0xff] %v6149_v35  ;;  %v6157_v60 = vpop.eup %4780  ;;  %4800 = vpow2.f32 %v2736_v61 }
 0xd34   :  { %2937 = vperm.xlu1 %4634, %v6137_v14   ;;  %v6159_v17 = vpop.eup %4782  ;;  %4802 = vpow2.f32 %v2702_v24  ;;  %v6218_v24 = vrot.slane %v6071_v51, %v7372_v18 }
 0xd35   :  { %2883 = vperm.xlu0 %4635, %v6139_v20   ;;  %7351 = vst [vmem:[#allocation7_spill] sm:$0xff] %v6159_v17  ;;  %v6171_v36 = vpop.eup %4784  ;;  %4804 = vpow2.f32 %v2762_v53  ;;  %v2652_v53 = vsub.f32 %v7373_v54, %v6164_v21 }
 0xd36   :  { %7355 = vst [vmem:[#allocation8_spill] sm:$0xff] %v6171_v36  ;;  %v6173_v7 = vpop.eup %4786  ;;  %4806 = vpow2.f32 %v2714_v25  ;;  %v2634_v25 = vsub.f32 %v7374_v38, %v6095_v34 }
 0xd37   :  { %v6181_v43 = vpop.eup %4788  ;;  %4808 = vpow2.f32 %v2680_v5  ;;  %v2766_v51 = vmul.f32 1.442695, %v2652_v53  ;;  %v7377_v5 = vld [vmem:[#allocation54_spill] sm:$0xff] }
 0xd38   :  { %2958 = vperm.xlu1 %4634, %v6147_v47   ;;  %7358 = vst [vmem:[#allocation9_spill] sm:$0xff] %v6181_v43  ;;  %v6183_v19 = vpop.eup %4790  ;;  %4810 = vpow2.f32 %v2716_v55  ;;  %v2659_v11 = vsub.f32 %v7377_v5, %v6218_v24  ;;  %v2730_v28 = vmul.f32 1.442695, %v2634_v25  ;;  %v7378_v55 = vld [vmem:[#allocation19_spill] sm:$0xff] }
 0xd39   :  { %2886 = vperm.xlu0 %4635, %v6149_v35   ;;  %7359 = vst [vmem:[#allocation10_spill] sm:$0xff] %v6183_v19  ;;  %v6191_v29 = vpop.eup %4792  ;;  %4812 = vpow2.f32 %v2710_v9  ;;  %v2607_v6 = vsub.f32 %v7378_v55, %v6075_v52 }
 0xd3a   :  { %7362 = vst [vmem:[#allocation11_spill] sm:$0xff] %v6191_v29  ;;  %v6193_v0 = vpop.eup %4794  ;;  %4814 = vpow2.f32 %v2674_v37  ;;  %v2780_v27 = vmul.f32 1.442695, %v2659_v11  ;;  %v2632_v37 = vsub.f32 %v7381_v30, %v6083_v31 }
 0xd3b   :  { %7363 = vst [vmem:[#allocation12_spill] sm:$0xff] %v6193_v0  ;;  %v6201_v45 = vpop.eup %4796  ;;  %4816 = vpow2.f32 %v2738_v41  ;;  %v2676_v48 = vmul.f32 1.442695, %v2607_v6  ;;  %v2622_v41 = vsub.f32 %v7382_v2, %v6123_v63  ;;  %v7389_v6 = vld [vmem:[#allocation33_spill] sm:$0xff] }
 0xd3c   :  { %2898 = vperm.xlu1 %4634, %v6157_v60   ;;  %7366 = vst [vmem:[#allocation14_spill] sm:$0xff] %v6201_v45  ;;  %v6203_v33 = vpop.eup %4798  ;;  %4818 = vpow2.f32 %v2704_v1  ;;  %v2726_v53 = vmul.f32 1.442695, %v2632_v37  ;;  %v7385_v1 = vld [vmem:[#allocation68_spill] sm:$0xff]  ;;  %v7390_v37 = vld [vmem:[#allocation53_spill] sm:$0xff] }
 0xd3d   :  { %2865 = vperm.xlu0 %4635, %v6159_v17   ;;  %7367 = vst [vmem:[#allocation32_spill] sm:$0xff] %v6203_v33  ;;  %v6211_v61 = vpop.eup %4800  ;;  %4820 = vpow2.f32 %v2766_v51  ;;  %v2646_v38 = vsub.f32 %v7385_v1, %v6116_v4  ;;  %v2706_v25 = vmul.f32 1.442695, %v2622_v41  ;;  %v7386_v51 = vld [vmem:[#allocation27_spill] sm:$0xff] }
 0xd3e   :  { %7370 = vst [vmem:[#allocation64_spill] sm:$0xff] %v6211_v61  ;;  %v6213_v15 = vpop.eup %4802  ;;  %4822 = vpow2.f32 %v2730_v28  ;;  %v2636_v5 = vsub.f32 %v7386_v51, %v6095_v34 }
 0xd3f   :  { %7371 = vst [vmem:[#allocation48_spill] sm:$0xff] %v6213_v15  ;;  %v6225_v32 = vpop.eup %4804  ;;  %4824 = vpow2.f32 %v2780_v27  ;;  %v2754_v55 = vmul.f32 1.442695, %v2646_v38  ;;  %v2660_v27 = vsub.f32 %v7389_v6, %v6218_v24 }
 0xd40   :  { %2940 = vperm.xlu1 %4634, %v6171_v36   ;;  %7375 = vst [vmem:[#allocation30_spill] sm:$0xff] %v6225_v32  ;;  %v6227_v40 = vpop.eup %4806  ;;  %4826 = vpow2.f32 %v2676_v48  ;;  %v2734_v30 = vmul.f32 1.442695, %v2636_v5  ;;  %v2643_v48 = vsub.f32 %v7390_v37, %v6116_v4 }
 0xd41   :  { %2889 = vperm.xlu0 %4635, %v6173_v7   ;;  %7376 = vst [vmem:[#allocation35_spill] sm:$0xff] %v6227_v40  ;;  %v6235_v46 = vpop.eup %4808  ;;  %4828 = vpow2.f32 %v2726_v53  ;;  %v2782_v1 = vmul.f32 1.442695, %v2660_v27  ;;  %v7393_v53 = vld [vmem:[#allocation62_spill] sm:$0xff] }
 0xd42   :  { %7379 = vst [vmem:[#allocation52_spill] sm:$0xff] %v6235_v46  ;;  %v6237_v9 = vpop.eup %4810  ;;  %4830 = vpow2.f32 %v2706_v25  ;;  %v2640_v38 = vsub.f32 %v7393_v53, %v6095_v34  ;;  %v2748_v51 = vmul.f32 1.442695, %v2643_v48  ;;  %v7394_v25 = vld [vmem:[#allocation56_spill] sm:$0xff] }
 0xd43   :  { %7380 = vst [vmem:[#allocation49_spill] sm:$0xff] %v6237_v9  ;;  %v6245_v54 = vpop.eup %4812  ;;  %4832 = vpow2.f32 %v2754_v55  ;;  %v2616_v5 = vsub.f32 %v7394_v25, %v6079_v10  ;;  %v7397_v55 = vld [vmem:[#allocation70_spill] sm:$0xff] }
 0xd44   :  { %2979 = vperm.xlu1 %4634, %v6181_v43   ;;  %7383 = vst [vmem:[#allocation78_spill] sm:$0xff] %v6245_v54  ;;  %v6247_v52 = vpop.eup %4814  ;;  %4834 = vpow2.f32 %v2734_v30  ;;  %v2654_v27 = vsub.f32 %v7397_v55, %v6164_v21  ;;  %v7398_v30 = vld [vmem:[#allocation67_spill] sm:$0xff]  ;;  %v7453_v43 = vld [vmem:[#allocation5_spill] sm:$0xff] }
 0xd45   :  { %2907 = vperm.xlu0 %4635, %v6183_v19   ;;  %7384 = vst [vmem:[#allocation26_spill] sm:$0xff] %v6247_v52  ;;  %v6255_v11 = vpop.eup %4816  ;;  %4836 = vpow2.f32 %v2782_v1  ;;  %v2694_v53 = vmul.f32 1.442695, %v2616_v5  ;;  %v2630_v48 = vsub.f32 %v7398_v30, %v6083_v31  ;;  %v7401_v1 = vld [vmem:[#allocation74_spill] sm:$0xff] }
 0xd46   :  { %7387 = vst [vmem:[#allocation44_spill] sm:$0xff] %v6255_v11  ;;  %v6257_v28 = vpop.eup %4818  ;;  %4838 = vpow2.f32 %v2748_v51  ;;  %v7402_v51 = vld [vmem:[#allocation29_spill] sm:$0xff] }
 0xd47   :  { %7388 = vst [vmem:[#allocation25_spill] sm:$0xff] %v6257_v28  ;;  %v6265_v2 = vpop.eup %4820  ;;  %v2722_v55 = vmul.f32 1.442695, %v2630_v48  ;;  %v2644_v5 = vsub.f32 %v7402_v51, %v6116_v4 }
 0xd48   :  { %2877 = vperm.xlu1 %4634, %v6191_v29   ;;  %7391 = vst [vmem:[#allocation39_spill] sm:$0xff] %v6265_v2  ;;  %v6267_v41 = vpop.eup %4822 }
 0xd49   :  { %2910 = vperm.xlu0 %4635, %v6193_v0   ;;  %7392 = vst [vmem:[#allocation37_spill] sm:$0xff] %v6267_v41  ;;  %v6275_v6 = vpop.eup %4824 }
 0xd4a   :  { %7395 = vst [vmem:[#allocation57_spill] sm:$0xff] %v6275_v6  ;;  %v6277_v37 = vpop.eup %4826 }
 0xd4b   :  { %7396 = vst [vmem:[#allocation51_spill] sm:$0xff] %v6277_v37  ;;  %v6285_v18 = vpop.eup %4828 }
 0xd4c   :  { %2922 = vperm.xlu1 %4634, %v6201_v45   ;;  %7399 = vst [vmem:[#allocation20_spill] sm:$0xff] %v6285_v18  ;;  %v6287_v25 = vpop.eup %4830 }
 0xd4d   :  { %2868 = vperm.xlu0 %4635, %v6203_v33   ;;  %7400 = vst [vmem:[#allocation42_spill] sm:$0xff] %v6287_v25 }
 0xd50   :  { %2964 = vperm.xlu1 %4634, %v6211_v61  }
 0xd51   :  { %2913 = vperm.xlu0 %4635, %v6213_v15  }
 0xd54   :  { %3003 = vperm.xlu1 %4634, %v6225_v32  }
 0xd55   :  { %2931 = vperm.xlu0 %4635, %v6227_v40  }
 0xd58   :  { %2880 = vperm.xlu1 %4634, %v6235_v46  }
 0xd59   :  { %2934 = vperm.xlu0 %4635, %v6237_v9  }
 0xd5c   :  { %2925 = vperm.xlu1 %4634, %v6245_v54  }
 0xd5d   :  { %2871 = vperm.xlu0 %4635, %v6247_v52  }
 0xd60   :  { %2967 = vperm.xlu1 %4634, %v6255_v11   ;;  %v6295_v11 = vpop.eup %4832 }
 0xd61   :  { %2916 = vperm.xlu0 %4635, %v6257_v28   ;;  %7403 = vst [vmem:[#allocation46_spill] sm:$0xff] %v6295_v11  ;;  %v6297_v30 = vpop.eup %4834 }
 0xd62   :  { %7404 = vst [vmem:[#allocation28_spill] sm:$0xff] %v6297_v30 }
 0xd64   :  { %3009 = vperm.xlu1 %4634, %v6265_v2   ;;  %v2742_v2 = vmul.f32 1.442695, %v2640_v38  ;;  %v2641_v38 = vsub.f32 %v7401_v1, %v6095_v34  ;;  %v2750_v1 = vmul.f32 1.442695, %v2644_v5 }
 0xd65   :  { %2955 = vperm.xlu0 %4635, %v6267_v41  }
 0xd66   :  { %4840 = vpow2.f32 %v2742_v2  ;;  %v7405_v2 = vld [vmem:[#allocation79_spill] sm:$0xff] }
 0xd67   :  { %4842 = vpow2.f32 %v2694_v53  ;;  %v7406_v53 = vld [vmem:[#allocation55_spill] sm:$0xff] }
 0xd68   :  { %3030 = vperm.xlu1 %4634, %v6275_v6   ;;  %v2770_v6 = vmul.f32 1.442695, %v2654_v27  ;;  %v2655_v27 = vsub.f32 %v7405_v2, %v6164_v21  ;;  %v2651_v48 = vsub.f32 %v7406_v53, %v6164_v21 }
 0xd69   :  { %2874 = vperm.xlu0 %4635, %v6277_v37   ;;  %v6305_v37 = vpop.eup %4836 }
 0xd6a   :  { %4844 = vpow2.f32 %v2770_v6  ;;  %7407 = vst [vmem:[#allocation40_spill] sm:$0xff] %v6305_v37  ;;  %v6307_v51 = vpop.eup %4838  ;;  %v7409_v6 = vld [vmem:[#allocation76_spill] sm:$0xff]  ;;  %v2764_v2 = vmul.f32 1.442695, %v2651_v48 }
 0xd6b   :  { %4846 = vpow2.f32 %v2722_v55  ;;  %7408 = vst [vmem:[#allocation34_spill] sm:$0xff] %v6307_v51  ;;  %v7410_v55 = vld [vmem:[#allocation71_spill] sm:$0xff] }
 0xd6c   :  { %2949 = vperm.xlu1 %4634, %v6285_v18   ;;  %v2744_v18 = vmul.f32 1.442695, %v2641_v38  ;;  %v2649_v38 = vsub.f32 %v7409_v6, %v6116_v4  ;;  %v2617_v5 = vsub.f32 %v7410_v55, %v6079_v10 }
 0xd6d   :  { %2919 = vperm.xlu0 %4635, %v6287_v25  }
 0xd6e   :  { %4848 = vpow2.f32 %v2744_v18  ;;  %v7413_v18 = vld [vmem:[#allocation80_spill] sm:$0xff]  ;;  %v2696_v6 = vmul.f32 1.442695, %v2617_v5 }
 0xd6f   :  { %4850 = vpow2.f32 %v2750_v1  ;;  %v7414_v1 = vld [vmem:[#allocation22_spill] sm:$0xff] }
 0xd70   :  { %2991 = vperm.xlu1 %4634, %v6295_v11   ;;  %v2772_v11 = vmul.f32 1.442695, %v2655_v27  ;;  %v6315_v52 = vpop.eup %4840  ;;  %v2663_v27 = vsub.f32 %v7413_v18, %v6218_v24  ;;  %v2631_v48 = vsub.f32 %v7414_v1, %v6083_v31 }
 0xd71   :  { %2961 = vperm.xlu0 %4635, %v6297_v30   ;;  %7411 = vst [vmem:[#allocation72_spill] sm:$0xff] %v6315_v52  ;;  %v6317_v53 = vpop.eup %4842 }
 0xd72   :  { %7412 = vst [vmem:[#allocation50_spill] sm:$0xff] %v6317_v53  ;;  %4852 = vpow2.f32 %v2772_v11  ;;  %v2788_v55 = vmul.f32 1.442695, %v2663_v27  ;;  %v7417_v11 = vld [vmem:[#allocation81_spill] sm:$0xff]  ;;  %v2724_v18 = vmul.f32 1.442695, %v2631_v48 }
 0xd73   :  { %4854 = vpow2.f32 %v2764_v2  ;;  %v7418_v2 = vld [vmem:[#allocation43_spill] sm:$0xff]  ;;  %v7421_v27 = vld [vmem:[#allocation38_spill] sm:$0xff] }
 0xd74   :  { %3033 = vperm.xlu1 %4634, %v6305_v37   ;;  %v2760_v37 = vmul.f32 1.442695, %v2649_v38  ;;  %v6325_v54 = vpop.eup %4844  ;;  %v2664_v38 = vsub.f32 %v7417_v11, %v6218_v24  ;;  %v2645_v5 = vsub.f32 %v7418_v2, %v6116_v4  ;;  %v2658_v11 = vsub.f32 %v7421_v27, %v6218_v24  ;;  %v7427_v27 = vld [vmem:[#allocation21_spill] sm:$0xff] }
 0xd75   :  { %2982 = vperm.xlu0 %4635, %v6307_v51   ;;  %7415 = vst [vmem:[#allocation59_spill] sm:$0xff] %v6325_v54  ;;  %v6327_v10 = vpop.eup %4846 }
 0xd76   :  { %7416 = vst [vmem:[#allocation63_spill] sm:$0xff] %v6327_v10  ;;  %4856 = vpow2.f32 %v2760_v37  ;;  %v2752_v37 = vmul.f32 1.442695, %v2645_v5  ;;  %v2778_v2 = vmul.f32 1.442695, %v2658_v11 }
 0xd77   :  { %4858 = vpow2.f32 %v2696_v6 }
 0xd78   :  { %2973 = vperm.xlu1 %4634, %v6315_v52   ;;  %4860 = vpow2.f32 %v2788_v55 }
 0xd79   :  { %2901 = vperm.xlu0 %4635, %v6317_v53   ;;  %v6335_v53 = vpop.eup %4848  ;;  %4862 = vpow2.f32 %v2724_v18 }
 0xd7a   :  { %7419 = vst [vmem:[#allocation66_spill] sm:$0xff] %v6335_v53  ;;  %v6337_v1 = vpop.eup %4850 }
 0xd7b   :  { %7420 = vst [vmem:[#allocation41_spill] sm:$0xff] %v6337_v1 }
 0xd7c   :  { %3015 = vperm.xlu1 %4634, %v6325_v54   ;;  %v6343_v6 = vpop.eup %4852 }
 0xd7d   :  { %2943 = vperm.xlu0 %4635, %v6327_v10   ;;  %v2790_v10 = vmul.f32 1.442695, %v2664_v38  ;;  %7422 = vst [vmem:[#allocation31_spill] sm:$0xff] %v6343_v6  ;;  %v6345_v48 = vpop.eup %4854 }
 0xd7e   :  { %7423 = vst [vmem:[#allocation36_spill] sm:$0xff] %v6345_v48 }
 0xd7f   :  { %4864 = vpow2.f32 %v2790_v10 }
 0xd80   :  { %2976 = vperm.xlu1 %4634, %v6335_v53   ;;  %4866 = vpow2.f32 %v2752_v37  ;;  %v6351_v38 = vpop.eup %4856 }
 0xd81   :  { %2985 = vperm.xlu0 %4635, %v6337_v1   ;;  %v7424_v1 = vld [vmem:[#allocation73_spill] sm:$0xff]  ;;  %7425 = vst [vmem:[#allocation54_spill] sm:$0xff] %v6351_v38  ;;  %v6353_v18 = vpop.eup %4858  ;;  %4868 = vpow2.f32 %v2778_v2 }
 0xd82   :  { %v2625_v55 = vsub.f32 %v7424_v1, %v6123_v63  ;;  %7426 = vst [vmem:[#allocation19_spill] sm:$0xff] %v6353_v18  ;;  %v6359_v54 = vpop.eup %4860  ;;  %v7430_v1 = vld [vmem:[#allocation45_spill] sm:$0xff] }
 0xd83   :  { %7428 = vst [vmem:[#allocation61_spill] sm:$0xff] %v6359_v54  ;;  %v6361_v10 = vpop.eup %4862  ;;  %v2653_v37 = vsub.f32 %v7430_v1, %v6164_v21 }
 0xd84   :  { %3018 = vperm.xlu1 %4634, %v6343_v6   ;;  %v2712_v5 = vmul.f32 1.442695, %v2625_v55  ;;  %v2639_v6 = vsub.f32 %v7427_v27, %v6095_v34  ;;  %7429 = vst [vmem:[#allocation65_spill] sm:$0xff] %v6361_v10  ;;  %v7433_v55 = vld [vmem:[#allocation75_spill] sm:$0xff] }
 0xd85   :  { %3006 = vperm.xlu0 %4635, %v6345_v48   ;;  %v2768_v34 = vmul.f32 1.442695, %v2653_v37  ;;  %v2633_v27 = vsub.f32 %v7433_v55, %v6083_v31 }
 0xd86   :  { %4870 = vpow2.f32 %v2712_v5  ;;  %v2740_v63 = vmul.f32 1.442695, %v2639_v6  ;;  %v7435_v5 = vld [vmem:[#allocation23_spill] sm:$0xff] }
 0xd87   :  { %v2728_v6 = vmul.f32 1.442695, %v2633_v27  ;;  %v2647_v1 = vsub.f32 %v7435_v5, %v6116_v4 }
 0xd88   :  { %3000 = vperm.xlu1 %4634, %v6351_v38   ;;  %4872 = vpow2.f32 %v2740_v63  ;;  %v7437_v63 = vld [vmem:[#allocation47_spill] sm:$0xff] }
 0xd89   :  { %2904 = vperm.xlu0 %4635, %v6353_v18   ;;  %v6367_v11 = vpop.eup %4864  ;;  %4874 = vpow2.f32 %v2768_v34  ;;  %v2661_v37 = vsub.f32 %v7437_v63, %v6218_v24  ;;  %v7439_v34 = vld [vmem:[#allocation58_spill] sm:$0xff] }
 0xd8a   :  { %7431 = vst [vmem:[#allocation68_spill] sm:$0xff] %v6367_v11  ;;  %v6369_v2 = vpop.eup %4866  ;;  %4876 = vpow2.f32 %v2728_v6  ;;  %v2648_v55 = vsub.f32 %v7439_v34, %v6116_v4  ;;  %v7441_v6 = vld [vmem:[#allocation69_spill] sm:$0xff] }
 0xd8b   :  { %7432 = vst [vmem:[#allocation27_spill] sm:$0xff] %v6369_v2  ;;  %v2784_v31 = vmul.f32 1.442695, %v2661_v37 }
 0xd8c   :  { %3042 = vperm.xlu1 %4634, %v6359_v54   ;;  %v6375_v54 = vpop.eup %4868  ;;  %v2758_v5 = vmul.f32 1.442695, %v2648_v55 }
 0xd8d   :  { %2946 = vperm.xlu0 %4635, %v6361_v10   ;;  %7434 = vst [vmem:[#allocation33_spill] sm:$0xff] %v6375_v54 }
 0xd90   :  { %3045 = vperm.xlu1 %4634, %v6367_v11   ;;  %v6380_v38 = vpop.eup %4870  ;;  %v2756_v11 = vmul.f32 1.442695, %v2647_v1  ;;  %v2662_v1 = vsub.f32 %v7441_v6, %v6218_v24 }
 0xd91   :  { %2988 = vperm.xlu0 %4635, %v6369_v2   ;;  %7436 = vst [vmem:[#allocation53_spill] sm:$0xff] %v6380_v38 }
 0xd92   :  { %v6385_v2 = vpop.eup %4872  ;;  %4878 = vpow2.f32 %v2756_v11  ;;  %v2786_v63 = vmul.f32 1.442695, %v2662_v1  ;;  %v7443_v11 = vld [vmem:[#allocation60_spill] sm:$0xff] }
 0xd93   :  { %7438 = vst [vmem:[#allocation62_spill] sm:$0xff] %v6385_v2  ;;  %v6390_v27 = vpop.eup %4874  ;;  %4880 = vpow2.f32 %v2784_v31  ;;  %v2656_v37 = vsub.f32 %v7443_v11, %v6164_v21  ;;  %v7445_v31 = vld [vmem:[#allocation77_spill] sm:$0xff]  ;;  %v7447_v1 = vld [vmem:[#allocation24_spill] sm:$0xff] }
 0xd94   :  { %7440 = vst [vmem:[#allocation56_spill] sm:$0xff] %v6390_v27  ;;  %v6395_v10 = vpop.eup %4876  ;;  %4882 = vpow2.f32 %v2758_v5  ;;  %v2657_v34 = vsub.f32 %v7445_v31, %v6164_v21  ;;  %v2665_v11 = vsub.f32 %v7447_v1, %v6218_v24 }
 0xd95   :  { %3027 = vperm.xlu0 %4635, %v6375_v54   ;;  %7442 = vst [vmem:[#allocation70_spill] sm:$0xff] %v6395_v10  ;;  %4884 = vpow2.f32 %v2786_v63  ;;  %v2774_v4 = vmul.f32 1.442695, %v2656_v37 }
 0xd96   :  { %v2776_v5 = vmul.f32 1.442695, %v2657_v34  ;;  %v2792_v21 = vmul.f32 1.442695, %v2665_v11 }
 0xd97   :  { %4886 = vpow2.f32 %v2774_v4 }
 0xd98   :  { %4888 = vpow2.f32 %v2776_v5 }
 0xd99   :  { %2928 = vperm.xlu0 %4635, %v6380_v38   ;;  %4890 = vpow2.f32 %v2792_v21 }
 0xd9c   :  { %v6400_v18 = vpop.eup %4878 }
 0xd9d   :  { %2970 = vperm.xlu0 %4635, %v6385_v2   ;;  %7444 = vst [vmem:[#allocation67_spill] sm:$0xff] %v6400_v18  ;;  %v6407_v6 = vpop.eup %4880 }
 0xd9e   :  { %7446 = vst [vmem:[#allocation74_spill] sm:$0xff] %v6407_v6  ;;  %v6416_v63 = vpop.eup %4882 }
 0xd9f   :  { %7448 = vst [vmem:[#allocation29_spill] sm:$0xff] %v6416_v63 }
 0xda1   :  { %3012 = vperm.xlu0 %4635, %v6390_v27  }
 0xda5   :  { %2952 = vperm.xlu0 %4635, %v6395_v10  }
 0xda9   :  { %2994 = vperm.xlu0 %4635, %v6400_v18   ;;  %v6421_v18 = vpop.eup %4884 }
 0xdaa   :  { %7449 = vst [vmem:[#allocation79_spill] sm:$0xff] %v6421_v18  ;;  %v6426_v24 = vpop.eup %4886 }
 0xdab   :  { %v6405_v55 = vpop.permute.xlu1 %2892  ;;  %7450 = vst [vmem:[#allocation55_spill] sm:$0xff] %v6426_v24  ;;  %v6429_v1 = vpop.eup %4888 }
 0xdac   :  { %v6409_v53 = vpop.permute.xlu0 %2859  ;;  %7451 = vst [vmem:[#allocation76_spill] sm:$0xff] %v6429_v1  ;;  %v6432_v11 = vpop.eup %4890 }
 0xdad   :  { %3036 = vperm.xlu0 %4635, %v6407_v6   ;;  %7452 = vst [vmem:[#allocation71_spill] sm:$0xff] %v6432_v11  ;;  %v3053_v41 = vrot.slane %v6409_v53, %v7319_v23 }
 0xdaf   :  { %v6414_v52 = vpop.permute.xlu1 %2895 }
 0xdb0   :  { %v2863_v37 = vpop.permute.xlu0 %2862 }
 0xdb1   :  { %2997 = vperm.xlu0 %4635, %v6416_v63   ;;  %v3057_v33 = vrot.slane %v2863_v37, %v7318_v16 }
 0xdb3   :  { %v6419_v31 = vpop.permute.xlu1 %2937 }
 0xdb4   :  { %v2884_v10 = vpop.permute.xlu0 %2883 }
 0xdb5   :  { %3039 = vperm.xlu0 %4635, %v6421_v18   ;;  %v3092_v17 = vrot.slane %v2884_v10, %v7319_v23  ;;  %v3106_v10 = vrot.slane %v6405_v55, %v7320_v3 }
 0xdb7   :  { %v6424_v4 = vpop.permute.xlu1 %2958 }
 0xdb8   :  { %v2887_v34 = vpop.permute.xlu0 %2886 }
 0xdb9   :  { %3021 = vperm.xlu0 %4635, %v6426_v24   ;;  %v3096_v51 = vrot.slane %v2887_v34, %v7318_v16 }
 0xdbb   :  { %v2899_v5 = vpop.permute.xlu1 %2898  ;;  %v3097_v35 = vsel %vm251_vm0, %v3096_v51, %v3092_v17 }
 0xdbc   :  { %v2866_v63 = vpop.permute.xlu0 %2865 }
 0xdbd   :  { %3024 = vperm.xlu0 %4635, %v6429_v1   ;;  %v3062_v47 = vrot.slane %v2866_v63, %v7453_v43  ;;  %v3058_v63 = vsel %vm251_vm0, %v3057_v33, %v3053_v41  ;;  %v3116_v41 = vrot.slane %v2899_v5, %v7322_v42 }
 0xdbf   :  { %v6435_v18 = vpop.permute.xlu1 %2940  ;;  %v3063_v53 = vsel %vm258_vm1, %v3062_v47, %v3058_v63 }
 0xdc0   :  { %v2890_v6 = vpop.permute.xlu0 %2889 }
 0xdc1   :  { %3048 = vperm.xlu0 %4635, %v6432_v11   ;;  %v3101_v50 = vrot.slane %v2890_v6, %v7453_v43 }
 0xdc3   :  { %v6441_v27 = vpop.permute.xlu1 %2979  ;;  %v3102_v34 = vsel %vm258_vm1, %v3101_v50, %v3097_v35  ;;  %v3111_v50 = vrot.slane %v6414_v52, %v7321_v57 }
 0xdc4   :  { %v6437_v21 = vpop.permute.xlu0 %2907  ;;  %v3107_v17 = vsel %vm265_vm2, %v3106_v10, %v3102_v34 }
 0xdc7   :  { %v2878_v2 = vpop.permute.xlu1 %2877 }
 0xdc8   :  { %v6439_v54 = vpop.permute.xlu0 %2910  ;;  %v3082_v33 = vrot.slane %v2878_v2, %v7323_v56 }
 0xdcb   :  { %v6447_v1 = vpop.permute.xlu1 %2922 }
 0xdcc   :  { %v2869_v24 = vpop.permute.xlu0 %2868 }
 0xdcd   :  { %v3067_v44 = vrot.slane %v2869_v24, %v7320_v3 }
 0xdcf   :  { %v6451_v48 = vpop.permute.xlu1 %2964  ;;  %v3068_v51 = vsel %vm265_vm2, %v3067_v44, %v3063_v53 }
 0xdd0   :  { %v6443_v38 = vpop.permute.xlu0 %2913 }
 0xdd3   :  { %v6455_v28 = vpop.permute.xlu1 %3003 }
 0xdd4   :  { %v6445_v9 = vpop.permute.xlu0 %2931 }
 0xdd7   :  { %v2881_v13 = vpop.permute.xlu1 %2880 }
 0xdd8   :  { %v6449_v40 = vpop.permute.xlu0 %2934  ;;  %v3087_v52 = vrot.slane %v2881_v13, %v7324_v62 }
 0xddb   :  { %v6461_v45 = vpop.permute.xlu1 %2925 }
 0xddc   :  { %v2872_v11 = vpop.permute.xlu0 %2871 }
 0xddd   :  { %v3072_v6 = vrot.slane %v2872_v11, %v7321_v57 }
 0xddf   :  { %v6465_v46 = vpop.permute.xlu1 %2967  ;;  %v3073_v35 = vsel %vm272_vm3, %v3072_v6, %v3068_v51 }
 0xde0   :  { %v6453_v32 = vpop.permute.xlu0 %2916 }
 0xde3   :  { %v6469_v19 = vpop.permute.xlu1 %3009 }
 0xde4   :  { %v6457_v15 = vpop.permute.xlu0 %2955 }
 0xde7   :  { %v6482_v20 = vpop.permute.xlu1 %3030 }
 0xde8   :  { %v2875_v61 = vpop.permute.xlu0 %2874 }
 0xde9   :  { %v3077_v37 = vrot.slane %v2875_v61, %v7322_v42  ;;  %v3112_v61 = vsel %vm272_vm3, %v3111_v50, %v3107_v17  ;;  %v3135_v50 = vrot.slane %v6439_v54, %v7318_v16 }
 0xdea   :  { %v3117_v6 = vsel %vm279_vm4, %v3116_v41, %v3112_v61  ;;  %v3131_v61 = vrot.slane %v6437_v21, %v7319_v23 }
 0xdeb   :  { %v3078_v11 = vsel %vm279_vm4, %v3077_v37, %v3073_v35  ;;  %v2950_v55 = vpop.permute.xlu1 %2949  ;;  %v3140_v35 = vrot.slane %v6443_v38, %v7453_v43 }
 0xdec   :  { %v6459_v30 = vpop.permute.xlu0 %2919  ;;  %v3083_v44 = vsel %vm286_vm5, %v3082_v33, %v3078_v11  ;;  %v3174_v11 = vrot.slane %v6449_v40, %v7318_v16  ;;  %v3136_v38 = vsel %vm251_vm0, %v3135_v50, %v3131_v61 }
 0xded   :  { %v3088_v2 = vsel %vm293_vm6, %v3087_v52, %v3083_v44  ;;  %v3170_v44 = vrot.slane %v6445_v9, %v7319_v23  ;;  %v3150_v54 = vrot.slane %v6459_v30, %v7321_v57  ;;  %v3179_v52 = vrot.slane %v6419_v31, %v7453_v43 }
 0xdee   :  { %v3155_v9 = vrot.slane %v6447_v1, %v7322_v42  ;;  %v3209_v1 = vrot.slane %v6457_v15, %v7319_v23 }
 0xdef   :  { %v6510_v37 = vpop.permute.xlu1 %2991  ;;  %v3175_v40 = vsel %vm251_vm0, %v3174_v11, %v3170_v44  ;;  %v3160_v11 = vrot.slane %v6461_v45, %v7323_v56  ;;  %v3199_v45 = vrot.slane %v2950_v55, %v7323_v56 }
 0xdf0   :  { %v6463_v25 = vpop.permute.xlu0 %2961  ;;  %v3180_v30 = vsel %vm258_vm1, %v3179_v52, %v3175_v40 }
 0xdf3   :  { %v6517_v51 = vpop.permute.xlu1 %3033 }
 0xdf4   :  { %v6467_v29 = vpop.permute.xlu0 %2982 }
 0xdf5   :  { %v3252_v55 = vrot.slane %v6467_v29, %v7318_v16 }
 0xdf7   :  { %v6527_v33 = vpop.permute.xlu1 %2973 }
 0xdf8   :  { %v2902_v0 = vpop.permute.xlu0 %2901 }
 0xdf9   :  { %v3121_v47 = vrot.slane %v2902_v0, %v7323_v56 }
 0xdfb   :  { %v3122_v63 = vsel %vm286_vm5, %v3121_v47, %v3117_v6  ;;  %v3145_v47 = vrot.slane %v6453_v32, %v7320_v3 }
 0xdfc   :  { %v6473_v8 = vpop.permute.xlu0 %2943 }
 0xe00   :  { %v6486_v36 = vpop.permute.xlu0 %2985 }
 0xe04   :  { %v6498_v24 = vpop.permute.xlu0 %3006 }
 0xe08   :  { %v2905_v34 = vpop.permute.xlu0 %2904 }
 0xe09   :  { %v3126_v10 = vrot.slane %v2905_v34, %v7324_v62  ;;  %v3141_v34 = vsel %vm258_vm1, %v3140_v35, %v3136_v38 }
 0xe0a   :  { %v3146_v21 = vsel %vm265_vm2, %v3145_v47, %v3141_v34 }
 0xe0b   :  { %v3127_v53 = vsel %vm293_vm6, %v3126_v10, %v3122_v63  ;;  %v3151_v32 = vsel %vm272_vm3, %v3150_v54, %v3146_v21  ;;  %v6544_v10 = vpop.permute.xlu1 %3015  ;;  %v3189_v63 = vrot.slane %v6473_v8, %v7321_v57  ;;  %v3218_v8 = vrot.slane %v6463_v25, %v7453_v43 }
 0xe0c   :  { %v3362_v0 = vsel %vm295_vm8, %v3127_v53, %v3088_v2  ;;  %v2947_v5 = vpop.permute.xlu0 %2946  ;;  %v3184_v2 = vrot.slane %v6435_v18, %v7320_v3  ;;  %v3156_v53 = vsel %vm279_vm4, %v3155_v9, %v3151_v32 }
 0xe0d   :  { %v3194_v31 = vrot.slane %v2947_v5, %v7322_v42  ;;  %v3213_v5 = vrot.slane %v6424_v4, %v7318_v16  ;;  %v3161_v44 = vsel %vm286_vm5, %v3160_v11, %v3156_v53  ;;  %v3223_v4 = vrot.slane %v6451_v48, %v7320_v3 }
 0xe0e   :  { %v3185_v61 = vsel %vm265_vm2, %v3184_v2, %v3180_v30  ;;  %v3248_v48 = vrot.slane %v6441_v27, %v7319_v23 }
 0xe0f   :  { %v3190_v18 = vsel %vm272_vm3, %v3189_v63, %v3185_v61  ;;  %v2977_v47 = vpop.permute.xlu1 %2976  ;;  %v3214_v38 = vsel %vm251_vm0, %v3213_v5, %v3209_v1  ;;  %v3257_v63 = vrot.slane %v6486_v36, %v7453_v43 }
 0xe10   :  { %v6515_v17 = vpop.permute.xlu0 %2988  ;;  %v3219_v25 = vsel %vm258_vm1, %v3218_v8, %v3214_v38  ;;  %v3253_v53 = vsel %vm251_vm0, %v3252_v55, %v3248_v48  ;;  %v3291_v8 = vrot.slane %v6498_v24, %v7318_v16 }
 0xe11   :  { %v3224_v30 = vsel %vm265_vm2, %v3223_v4, %v3219_v25  ;;  %v3262_v29 = vrot.slane %v6515_v17, %v7320_v3  ;;  %v3258_v1 = vsel %vm258_vm1, %v3257_v63, %v3253_v53  ;;  %v3296_v4 = vrot.slane %v6469_v19, %v7453_v43 }
 0xe13   :  { %v3019_v2 = vpop.permute.xlu1 %3018  ;;  %v3263_v27 = vsel %vm265_vm2, %v3262_v29, %v3258_v1 }
 0xe14   :  { %v6519_v13 = vpop.permute.xlu0 %3027  ;;  %v3311_v53 = vrot.slane %v3019_v2, %v7322_v42 }
 0xe17   :  { %v3001_v17 = vpop.permute.xlu1 %3000 }
 0xe18   :  { %v2929_v41 = vpop.permute.xlu0 %2928 }
 0xe19   :  { %v3165_v50 = vrot.slane %v2929_v41, %v7324_v62  ;;  %v3195_v41 = vsel %vm279_vm4, %v3194_v31, %v3190_v18 }
 0xe1a   :  { %v3200_v40 = vsel %vm286_vm5, %v3199_v45, %v3195_v41  ;;  %v3243_v41 = vrot.slane %v2977_v47, %v7324_v62  ;;  %v3287_v45 = vrot.slane %v6455_v28, %v7319_v23 }
 0xe1b   :  { %v3166_v54 = vsel %vm293_vm6, %v3165_v50, %v3161_v44 }
 0xe1c   :  { %v2971_v6 = vpop.permute.xlu0 %2970  ;;  %v3363_v52 = vsel %vm296_vm9, %v3166_v54, %v3362_v0  ;;  %v3228_v0 = vrot.slane %v6465_v46, %v7321_v57  ;;  %v3267_v46 = vrot.slane %v6510_v37, %v7321_v57  ;;  %v3282_v54 = vrot.slane %v3001_v17, %v7324_v62 }
 0xe1d   :  { %v3233_v31 = vrot.slane %v2971_v6, %v7322_v42  ;;  %v3238_v6 = vrot.slane %v6527_v33, %v7323_v56  ;;  %v3292_v47 = vsel %vm251_vm0, %v3291_v8, %v3287_v45 }
 0xe1e   :  { %v3229_v50 = vsel %vm272_vm3, %v3228_v0, %v3224_v30  ;;  %v3268_v44 = vsel %vm272_vm3, %v3267_v46, %v3263_v27  ;;  %v3335_v30 = vrot.slane %v6517_v51, %v7453_v43 }
 0xe1f   :  { %v3234_v36 = vsel %vm279_vm4, %v3233_v31, %v3229_v50 }
 0xe20   :  { %v6556_v35 = vpop.permute.xlu0 %3012  ;;  %v3239_v18 = vsel %vm286_vm5, %v3238_v6, %v3234_v36 }
 0xe21   :  { %v3244_v24 = vsel %vm293_vm6, %v3243_v41, %v3239_v18 }
 0xe24   :  { %v2953_v15 = vpop.permute.xlu0 %2952 }
 0xe25   :  { %v3204_v34 = vrot.slane %v2953_v15, %v7324_v62  ;;  %v3326_v15 = vrot.slane %v6519_v13, %v7319_v23  ;;  %v3330_v13 = vrot.slane %v6482_v20, %v7318_v16  ;;  %v3306_v20 = vrot.slane %v6544_v10, %v7321_v57 }
 0xe27   :  { %v3205_v21 = vsel %vm293_vm6, %v3204_v34, %v3200_v40  ;;  %v3301_v34 = vrot.slane %v6556_v35, %v7320_v3  ;;  %v3331_v55 = vsel %vm251_vm0, %v3330_v13, %v3326_v15  ;;  %v7456_v13 = vld [vmem:[#allocation15_spill] sm:$0xff] }
 0xe28   :  { %v3364_v32 = vsel %vm298_vm10, %v3205_v21, %v3363_v52  ;;  %v2995_v9 = vpop.permute.xlu0 %2994  ;;  %v3043_v21 = vpop.permute.xlu1 %3042  ;;  %v3336_v31 = vsel %vm258_vm1, %v3335_v30, %v3331_v55 }
 0xe29   :  { %v3272_v61 = vrot.slane %v2995_v9, %v7322_v42  ;;  %v3365_v28 = vsel %vm300_vm11, %v3244_v24, %v3364_v32  ;;  %v3297_v9 = vsel %vm258_vm1, %v3296_v4, %v3292_v47  ;;  %v7455_v4 = vld [vmem:[#allocation3_spill] sm:$0xff] }
 0xe2a   :  { %v3302_v32 = vsel %vm265_vm2, %v3301_v34, %v3297_v9 }
 0xe2b   :  { %v3273_v37 = vsel %vm279_vm4, %v3272_v61, %v3268_v44  ;;  %v3307_v48 = vsel %vm272_vm3, %v3306_v20, %v3302_v32 }
 0xe2c   :  { %v3037_v11 = vpop.permute.xlu0 %3036  ;;  %v3046_v1 = vpop.permute.xlu1 %3045  ;;  %v3312_v10 = vsel %vm279_vm4, %v3311_v53, %v3307_v48 }
 0xe2d   :  { %v3340_v35 = vrot.slane %v3037_v11, %v7320_v3  ;;  %v3350_v11 = vrot.slane %v3043_v21, %v7322_v42  ;;  %v3355_v61 = vrot.slane %v3046_v1, %v7323_v56 }
 0xe2f   :  { %v3341_v0 = vsel %vm265_vm2, %v3340_v35, %v3336_v31 }
 0xe30   :  { %v2998_v5 = vpop.permute.xlu0 %2997 }
 0xe31   :  { %v3277_v33 = vrot.slane %v2998_v5, %v7323_v56 }
 0xe33   :  { %v3278_v38 = vsel %vm286_vm5, %v3277_v33, %v3273_v37 }
 0xe34   :  { %v3283_v25 = vsel %vm293_vm6, %v3282_v54, %v3278_v38  ;;  %v3040_v40 = vpop.permute.xlu0 %3039 }
 0xe35   :  { %v3366_v52 = vsel %vm302_vm12, %v3283_v25, %v3365_v28  ;;  %v3345_v63 = vrot.slane %v3040_v40, %v7321_v57  ;;  %v7454_v28 = vld [vmem:[#allocation8_spill] sm:$0xff] }
 0xe37   :  { %v3346_v51 = vsel %vm272_vm3, %v3345_v63, %v3341_v0 }
 0xe38   :  { %v3022_v19 = vpop.permute.xlu0 %3021  ;;  %v3351_v6 = vsel %vm279_vm4, %v3350_v11, %v3346_v51  ;;  %v7461_v51 = vld [vmem:[#allocation32_spill] sm:$0xff] }
 0xe39   :  { %v3316_v29 = vrot.slane %v3022_v19, %v7323_v56  ;;  %v3356_v8 = vsel %vm286_vm5, %v3355_v61, %v3351_v6  ;;  %v7459_v19 = vld [vmem:[#allocation4_spill] sm:$0xff] }
 0xe3a   :  { %v7462_v11 = vld [vmem:[#allocation16_spill] sm:$0xff] }
 0xe3b   :  { %v3317_v27 = vsel %vm286_vm5, %v3316_v29, %v3312_v10  ;;  %v7460_v29 = vld [vmem:[#allocation7_spill] sm:$0xff] }
 0xe3c   :  { %v3025_v50 = vpop.permute.xlu0 %3024 }
 0xe3d   :  { %v3321_v36 = vrot.slane %v3025_v50, %v7324_v62 }
 0xe3f   :  { %v3322_v46 = vsel %vm293_vm6, %v3321_v36, %v3317_v27  ;;  %v7463_v27 = vld [vmem:[#allocation13_spill] sm:$0xff] }
 0xe40   :  { %v3049_v17 = vpop.permute.xlu0 %3048  ;;  %v3367_v5 = vsel %vm304_vm13, %v3322_v46, %v3366_v52 }
 0xe41   :  { %v3360_v2 = vrot.slane %v3049_v17, %v7324_v62  ;;  %v7464_v17 = vld [vmem:[#allocation9_spill] sm:$0xff] }
 0xe43   :  { %v3361_v18 = vsel %vm293_vm6, %v3360_v2, %v3356_v8 }
 0xe44   :  { %v3368_v41 = vsel %vm306_vm14, %v3361_v18, %v3367_v5  ;;  %v7465_v18 = vld [vmem:[#allocation34_spill] sm:$0xff] }
 0xe45   :  { %v3370_v44 = vsel %vm357_vm7, %v3368_v41, 0.0  ;;  %v7466_v41 = vld [vmem:[#allocation10_spill] sm:$0xff] }
 0xe46   :  { %3371 = vadd.xlane.f32.xlu1 %v3370_v44 }
 0xed3   :  { %v3372_v33 = vpop.xlane.xlu1 %3371 }
 0xed4   :  { %v3373_v45 = vmax.f32 %v3372_v33, 1e-30  ;;  %v7467_v33 = vld [vmem:[#allocation12_spill] sm:$0xff] }
 0xed6   :  { %4892 = vrcp.f32 %v3373_v45 }
 0xee0   :  { %v6655_v54 = vpop.eup %4892 }
 0xee1   :  { %v6659_v37 = vrot.slane %v6655_v54, %v7326_v58  ;;  %v6663_v15 = vrot.slane %v6655_v54, %v7325_v12  ;;  %v6667_v24 = vrot.slane %v6655_v54, %v7327_v26  ;;  %v6705_v1 = vrot.slane %v6655_v54, %v7462_v11 }
 0xee2   :  { %v3387_v61 = vrot.slane %v6655_v54, %v7463_v27  ;;  %v7479_v27 = vld [vmem:[#allocation35_spill] sm:$0xff] }
 0xee3   :  { %v3426_v38 = vmul.f32 %v6173_v7, %v6659_v37  ;;  %v3427_v47 = vmul.f32 %v6109_v49, %v6659_v37  ;;  %v3416_v34 = vmul.f32 %v6111_v59, %v6663_v15  ;;  %v3417_v58 = vmul.f32 %v6129_v22, %v6663_v15 }
 0xee4   :  { %v3428_v12 = vmul.f32 %v6127_v39, %v6659_v37  ;;  %v3429_v25 = vmul.f32 %v6157_v60, %v6659_v37  ;;  %v3442_v7 = vmul.f32 %v6137_v14, %v6667_v24  ;;  %v3443_v49 = vmul.f32 %v7454_v28, %v6667_v24  ;;  %v7457_v60 = vld [vmem:[#allocation6_spill] sm:$0xff]  ;;  %v7458_v14 = vld [vmem:[#allocation37_spill] sm:$0xff] }
 0xee5   :  { %v3485_v26 = vpack.c.bf16 %v3427_v47, %v3426_v38  ;;  %v3480_v40 = vpack.c.bf16 %v3417_v58, %v3416_v34  ;;  %v3424_v59 = vmul.f32 %v7455_v4, %v6659_v37  ;;  %v6689_v22 = vrot.slane %v6655_v54, %v7456_v13  ;;  %v7470_v28 = vld [vmem:[#allocation42_spill] sm:$0xff] }
 0xee6   :  { %v3486_v21 = vpack.c.bf16 %v3429_v25, %v3428_v12  ;;  %v3425_v55 = vmul.f32 %v7457_v60, %v6659_v37  ;;  %v3493_v9 = vpack.c.bf16 %v3443_v49, %v3442_v7  ;;  %v3418_v53 = vmul.f32 %v7460_v29, %v6663_v15  ;;  %v7468_v12 = vld [vmem:[#allocation11_spill] sm:$0xff]  ;;  %v7471_v4 = vld [vmem:[#allocation14_spill] sm:$0xff] }
 0xee7   :  { %v3559_v52 = vunpack.c.h.b16 %v3485_v26  ;;  %v3548_v39 = vunpack.c.l.b16 %v3480_v40  ;;  %v3448_v35 = vmul.f32 %v7458_v14, %v6689_v22  ;;  %v3549_v32 = vunpack.c.h.b16 %v3480_v40  ;;  %v7469_v40 = vld [vmem:[#allocation52_spill] sm:$0xff]  ;;  %v7474_v14 = vld [vmem:[#allocation17_spill] sm:$0xff] }
 0xee8   :  { %v3560_v30 = vunpack.c.l.b16 %v3486_v21  ;;  %v3484_v63 = vpack.c.bf16 %v3425_v55, %v3424_v59  ;;  %v3449_v20 = vmul.f32 %v7459_v19, %v6689_v22  ;;  %v3574_v31 = vunpack.c.l.b16 %v3493_v9  ;;  %v7473_v55 = vld [vmem:[#allocation64_spill] sm:$0xff] }
 0xee9   :  { %3646 = vperm.xlu1 %4634, %v3559_v52   ;;  %3613 = vperm.xlu0 %4635, %v3548_v39   ;;  %v3419_v50 = vmul.f32 %v7461_v51, %v6663_v15  ;;  %v3561_v46 = vunpack.c.h.b16 %v3486_v21  ;;  %v3456_v2 = vmul.f32 %v7464_v17, %v6705_v1  ;;  %v3457_v5 = vmul.f32 %v7465_v18, %v6705_v1  ;;  %v7472_v21 = vld [vmem:[#allocation28_spill] sm:$0xff]  ;;  %v7477_v51 = vld [vmem:[#allocation30_spill] sm:$0xff]  ;;  %v7480_v17 = vld [vmem:[#allocation49_spill] sm:$0xff] }
 0xeea   :  { %v3556_v48 = vunpack.c.l.b16 %v3484_v63  ;;  %v6697_v0 = vpack.c.bf16 %v3449_v20, %v3448_v35  ;;  %v3557_v10 = vunpack.c.h.b16 %v3484_v63  ;;  %v3432_v44 = vmul.f32 %v7466_v41, %v3387_v61  ;;  %v7475_v63 = vld [vmem:[#allocation48_spill] sm:$0xff]  ;;  %v7476_v20 = vld [vmem:[#allocation25_spill] sm:$0xff]  ;;  %v7481_v41 = vld [vmem:[#allocation78_spill] sm:$0xff] }
 0xeeb   :  { %v3481_v6 = vpack.c.bf16 %v3419_v50, %v3418_v53  ;;  %v3433_v45 = vmul.f32 %v7467_v33, %v3387_v61  ;;  %v3575_v38 = vunpack.c.h.b16 %v3493_v9  ;;  %v3558_v47 = vunpack.c.l.b16 %v3485_v26  ;;  %v7482_v33 = vld [vmem:[#allocation53_spill] sm:$0xff] }
 0xeec   :  { %v3581_v36 = vunpack.c.h.b16 %v6697_v0  ;;  %v6716_v34 = vpack.c.bf16 %v3457_v5, %v3456_v2  ;;  %v3422_v25 = vmul.f32 %v7468_v12, %v6663_v15  ;;  %v3423_v7 = vmul.f32 %v7469_v40, %v6663_v15 }
 0xeed   :  { %3649 = vperm.xlu1 %4634, %v3560_v30   ;;  %3616 = vperm.xlu0 %4635, %v3549_v32   ;;  %v3550_v8 = vunpack.c.l.b16 %v3481_v6  ;;  %v3488_v58 = vpack.c.bf16 %v3433_v45, %v3432_v44  ;;  %v3436_v49 = vmul.f32 %v7470_v28, %v3387_v61  ;;  %v3437_v59 = vmul.f32 %v7471_v4, %v3387_v61 }
 0xeee   :  { %v3588_v13 = vunpack.c.l.b16 %v6716_v34  ;;  %v3483_v39 = vpack.c.bf16 %v3423_v7, %v3422_v25  ;;  %v3450_v60 = vmul.f32 %v7472_v21, %v6689_v22  ;;  %v3451_v9 = vmul.f32 %v7473_v55, %v6689_v22  ;;  %v7484_v25 = vld [vmem:[#allocation51_spill] sm:$0xff]  ;;  %v7485_v7 = vld [vmem:[#allocation44_spill] sm:$0xff] }
 0xeef   :  { %v3564_v52 = vunpack.c.l.b16 %v3488_v58  ;;  %v6725_v26 = vpack.c.bf16 %v3437_v59, %v3436_v49  ;;  %v6733_v35 = vrot.slane %v6655_v54, %v7474_v14  ;;  %v3565_v32 = vunpack.c.h.b16 %v3488_v58  ;;  %v7483_v58 = vld [vmem:[#allocation26_spill] sm:$0xff]  ;;  %v7488_v14 = vld [vmem:[#allocation39_spill] sm:$0xff] }
 0xef0   :  { %v3554_v30 = vunpack.c.l.b16 %v3483_v39  ;;  %v3434_v19 = vmul.f32 %v7475_v63, %v3387_v61  ;;  %v3551_v29 = vunpack.c.h.b16 %v3481_v6  ;;  %v6738_v53 = vpack.c.bf16 %v3451_v9, %v3450_v60  ;;  %v7486_v49 = vld [vmem:[#allocation62_spill] sm:$0xff] }
 0xef1   :  { %3691 = vperm.xlu1 %4634, %v3574_v31   ;;  %3637 = vperm.xlu0 %4635, %v3556_v48   ;;  %v3435_v31 = vmul.f32 %v7476_v20, %v3387_v61  ;;  %v3569_v48 = vunpack.c.h.b16 %v6725_v26  ;;  %v3464_v50 = vmul.f32 %v7477_v51, %v6733_v35  ;;  %v3441_v2 = vmul.f32 %v7480_v17, %v6667_v24  ;;  %v7487_v60 = vld [vmem:[#allocation18_spill] sm:$0xff] }
 0xef2   :  { %v3438_v44 = vmul.f32 %v7481_v41, %v3387_v61  ;;  %v3439_v45 = vmul.f32 %v7482_v33, %v3387_v61  ;;  %v3420_v12 = vmul.f32 %v7483_v58, %v6663_v15  ;;  %v3421_v40 = vmul.f32 %v7484_v25, %v6663_v15 }
 0xef3   :  { %v3489_v11 = vpack.c.bf16 %v3435_v31, %v3434_v19  ;;  %v3452_v28 = vmul.f32 %v7485_v7, %v6689_v22  ;;  %v3453_v4 = vmul.f32 %v7486_v49, %v6689_v22  ;;  %v3555_v59 = vunpack.c.h.b16 %v3483_v39  ;;  %v7489_v39 = vld [vmem:[#allocation56_spill] sm:$0xff]  ;;  %v7490_v31 = vld [vmem:[#allocation33_spill] sm:$0xff] }
 0xef4   :  { %v6762_v61 = vpack.c.bf16 %v3439_v45, %v3438_v44  ;;  %v6768_v15 = vrot.slane %v6655_v54, %v7487_v60  ;;  %v3580_v51 = vunpack.c.l.b16 %v6697_v0  ;;  %v7496_v44 = vld [vmem:[#allocation40_spill] sm:$0xff]  ;;  %v7497_v45 = vld [vmem:[#allocation74_spill] sm:$0xff]  ;;  %v3568_v58 = vunpack.c.l.b16 %v6725_v26  ;;  %v7501_v26 = vld [vmem:[#allocation19_spill] sm:$0xff] }
 0xef5   :  { %3712 = vperm.xlu1 %4634, %v3581_v36   ;;  %3640 = vperm.xlu0 %4635, %v3557_v10   ;;  %v7478_v36 = vld [vmem:[#allocation36_spill] sm:$0xff]  ;;  %v3566_v6 = vunpack.c.l.b16 %v3489_v11  ;;  %v6764_v21 = vpack.c.bf16 %v3453_v4, %v3452_v28  ;;  %v3567_v63 = vunpack.c.h.b16 %v3489_v11  ;;  %v3582_v25 = vunpack.c.l.b16 %v6738_v53  ;;  %v7499_v4 = vld [vmem:[#allocation66_spill] sm:$0xff] }
 0xef6   :  { %v3465_v10 = vmul.f32 %v7478_v36, %v6733_v35  ;;  %v3570_v55 = vunpack.c.l.b16 %v6762_v61  ;;  %v3472_v54 = vmul.f32 %v7490_v31, %v6768_v15  ;;  %v7492_v11 = vld [vmem:[#allocation20_spill] sm:$0xff]  ;;  %v3474_v33 = vmul.f32 %v7496_v44, %v6768_v15  ;;  %v7505_v31 = vld [vmem:[#allocation65_spill] sm:$0xff] }
 0xef7   :  { %v3584_v19 = vunpack.c.l.b16 %v6764_v21  ;;  %v7498_v7 = vld [vmem:[#allocation72_spill] sm:$0xff]  ;;  %v3431_v60 = vmul.f32 %v7501_v26, %v6659_v37 }
 0xef8   :  { %v6749_v18 = vpack.c.bf16 %v3465_v10, %v3464_v50  ;;  %v3446_v10 = vmul.f32 %v7492_v11, %v6667_v24  ;;  %v3454_v28 = vmul.f32 %v7498_v7, %v6689_v22  ;;  %v7507_v11 = vld [vmem:[#allocation27_spill] sm:$0xff] }
 0xef9   :  { %3652 = vperm.xlu1 %4634, %v3561_v46   ;;  %3619 = vperm.xlu0 %4635, %v3550_v8   ;;  %v3440_v46 = vmul.f32 %v7479_v27, %v6667_v24  ;;  %v3583_v8 = vunpack.c.h.b16 %v6738_v53  ;;  %v7493_v27 = vld [vmem:[#allocation70_spill] sm:$0xff] }
 0xefa   :  { %v3597_v44 = vunpack.c.h.b16 %v6749_v18 }
 0xefb   :  { %v3492_v5 = vpack.c.bf16 %v3441_v2, %v3440_v46  ;;  %v3447_v46 = vmul.f32 %v7493_v27, %v6667_v24 }
 0xefd   :  { %3694 = vperm.xlu1 %4634, %v3575_v38   ;;  %3643 = vperm.xlu0 %4635, %v3558_v47   ;;  %v3596_v38 = vunpack.c.l.b16 %v6749_v18  ;;  %v3572_v47 = vunpack.c.l.b16 %v3492_v5 }
 0xf01   :  { %3733 = vperm.xlu1 %4634, %v3588_v13   ;;  %3661 = vperm.xlu0 %4635, %v3564_v52   ;;  %v3573_v13 = vunpack.c.h.b16 %v3492_v5  ;;  %v3482_v52 = vpack.c.bf16 %v3421_v40, %v3420_v12  ;;  %v7495_v5 = vld [vmem:[#allocation67_spill] sm:$0xff] }
 0xf02   :  { %v3461_v41 = vmul.f32 %v7495_v5, %v6705_v1  ;;  %v7509_v5 = vld [vmem:[#allocation54_spill] sm:$0xff] }
 0xf03   :  { %v3552_v9 = vunpack.c.l.b16 %v3482_v52  ;;  %v3553_v17 = vunpack.c.h.b16 %v3482_v52 }
 0xf05   :  { %3631 = vperm.xlu1 %4634, %v3554_v30   ;;  %3664 = vperm.xlu0 %4635, %v3565_v32   ;;  %v3466_v30 = vmul.f32 %v7488_v14, %v6733_v35  ;;  %v3467_v32 = vmul.f32 %v7489_v39, %v6733_v35 }
 0xf07   :  { %v6776_v20 = vpack.c.bf16 %v3467_v32, %v3466_v30  ;;  %v7503_v30 = vld [vmem:[#allocation31_spill] sm:$0xff] }
 0xf08   :  { %v3469_v39 = vmul.f32 %v7503_v30, %v6733_v35 }
 0xf09   :  { %3676 = vperm.xlu1 %4634, %v3569_v48   ;;  %3622 = vperm.xlu0 %4635, %v3551_v29   ;;  %v7491_v48 = vld [vmem:[#allocation57_spill] sm:$0xff]  ;;  %v3598_v50 = vunpack.c.l.b16 %v6776_v20 }
 0xf0a   :  { %v3473_v29 = vmul.f32 %v7491_v48, %v6768_v15  ;;  %v7506_v48 = vld [vmem:[#allocation41_spill] sm:$0xff] }
 0xf0c   :  { %v6784_v36 = vpack.c.bf16 %v3473_v29, %v3472_v54 }
 0xf0d   :  { %3718 = vperm.xlu1 %4634, %v3583_v8   ;;  %3667 = vperm.xlu0 %4635, %v3566_v6   ;;  %v6791_v8 = vpack.c.bf16 %v3447_v46, %v3446_v10  ;;  %v7494_v6 = vld [vmem:[#allocation46_spill] sm:$0xff]  ;;  %v3459_v10 = vmul.f32 %v7507_v11, %v6705_v1 }
 0xf0e   :  { %v3605_v2 = vunpack.c.h.b16 %v6784_v36  ;;  %v3460_v0 = vmul.f32 %v7494_v6, %v6705_v1  ;;  %v7508_v6 = vld [vmem:[#allocation29_spill] sm:$0xff] }
 0xf0f   :  { %v3579_v30 = vunpack.c.h.b16 %v6791_v8 }
 0xf10   :  { %v6803_v12 = vpack.c.bf16 %v3461_v41, %v3460_v0  ;;  %v3462_v0 = vmul.f32 %v7508_v6, %v6705_v1  ;;  %v3463_v41 = vmul.f32 %v7509_v5, %v6705_v1 }
 0xf11   :  { %3757 = vperm.xlu1 %4634, %v3596_v38   ;;  %3685 = vperm.xlu0 %4635, %v3572_v47   ;;  %v3475_v38 = vmul.f32 %v7497_v45, %v6768_v15  ;;  %v3578_v47 = vunpack.c.l.b16 %v6791_v8 }
 0xf12   :  { %v3592_v49 = vunpack.c.l.b16 %v6803_v12  ;;  %v3503_v45 = vpack.c.bf16 %v3463_v41, %v3462_v0 }
 0xf13   :  { %v6806_v40 = vpack.c.bf16 %v3475_v38, %v3474_v33  ;;  %v7510_v38 = vld [vmem:[#allocation79_spill] sm:$0xff] }
 0xf15   :  { %3634 = vperm.xlu1 %4634, %v3555_v59   ;;  %3688 = vperm.xlu0 %4635, %v3573_v13   ;;  %v3455_v59 = vmul.f32 %v7499_v4, %v6689_v22  ;;  %v7500_v13 = vld [vmem:[#allocation50_spill] sm:$0xff]  ;;  %v3606_v53 = vunpack.c.l.b16 %v6806_v40  ;;  %v7512_v4 = vld [vmem:[#allocation68_spill] sm:$0xff] }
 0xf16   :  { %v3430_v52 = vmul.f32 %v7500_v13, %v6659_v37  ;;  %v3445_v37 = vmul.f32 %v7505_v31, %v6667_v24 }
 0xf17   :  { %v3499_v32 = vpack.c.bf16 %v3455_v59, %v3454_v28  ;;  %v3595_v28 = vunpack.c.h.b16 %v3503_v45  ;;  %v7513_v59 = vld [vmem:[#allocation71_spill] sm:$0xff] }
 0xf18   :  { %v3487_v22 = vpack.c.bf16 %v3431_v60, %v3430_v52  ;;  %v3479_v13 = vmul.f32 %v7513_v59, %v6768_v15 }
 0xf19   :  { %3679 = vperm.xlu1 %4634, %v3570_v55   ;;  %3625 = vperm.xlu0 %4635, %v3552_v9   ;;  %v3589_v55 = vunpack.c.h.b16 %v6716_v34  ;;  %v7502_v9 = vld [vmem:[#allocation59_spill] sm:$0xff]  ;;  %v3458_v34 = vmul.f32 %v7506_v48, %v6705_v1  ;;  %v3586_v29 = vunpack.c.l.b16 %v3499_v32  ;;  %v3478_v1 = vmul.f32 %v7512_v4, %v6768_v15 }
 0xf1a   :  { %v3468_v14 = vmul.f32 %v7502_v9, %v6733_v35  ;;  %v3563_v7 = vunpack.c.h.b16 %v3487_v22  ;;  %v3571_v9 = vunpack.c.h.b16 %v6762_v61  ;;  %v7514_v61 = vld [vmem:[#allocation55_spill] sm:$0xff] }
 0xf1b   :  { %v3511_v26 = vpack.c.bf16 %v3479_v13, %v3478_v1  ;;  %v4660_v1 = vld [vmem:[%s7068_s7] sm:$0xff]  }
 0xf1c   :  { %v3506_v54 = vpack.c.bf16 %v3469_v39, %v3468_v14  ;;  %v3585_v14 = vunpack.c.h.b16 %v6764_v21  ;;  %v3593_v39 = vunpack.c.h.b16 %v6803_v12  ;;  %v7515_v21 = vld [vmem:[#allocation76_spill] sm:$0xff]  ;;  %4592 = vmatpush3.bf16.msra.mxu0 %v4660_v1 }
 0xf1d   :  { %3721 = vperm.xlu1 %4634, %v3584_v19   ;;  %3670 = vperm.xlu0 %4635, %v3567_v63   ;;  %v7504_v63 = vld [vmem:[#allocation63_spill] sm:$0xff]  ;;  %v3610_v60 = vunpack.c.l.b16 %v3511_v26  ;;  %v3471_v31 = vmul.f32 %v7515_v21, %v6733_v35  ;;  %v3611_v0 = vunpack.c.h.b16 %v3511_v26 }
 0xf1e   :  { %v3444_v19 = vmul.f32 %v7504_v63, %v6667_v24  ;;  %v3600_v27 = vunpack.c.l.b16 %v3506_v54  ;;  %v3587_v24 = vunpack.c.h.b16 %v3499_v32  ;;  %v3601_v33 = vunpack.c.h.b16 %v3506_v54 }
 0xf1f   :  { %v3607_v32 = vunpack.c.h.b16 %v6806_v40  ;;  %v3594_v63 = vunpack.c.l.b16 %v3503_v45 }
 0xf21   :  { %3763 = vperm.xlu1 %4634, %v3598_v50   ;;  %3709 = vperm.xlu0 %4635, %v3580_v51   ;;  %v3562_v51 = vunpack.c.l.b16 %v3487_v22  ;;  %v3494_v50 = vpack.c.bf16 %v3445_v37, %v3444_v19  ;;  %v3470_v19 = vmul.f32 %v7514_v61, %v6733_v35 }
 0xf23   :  { %v3576_v46 = vunpack.c.l.b16 %v3494_v50  ;;  %v3577_v52 = vunpack.c.h.b16 %v3494_v50  ;;  %v3507_v48 = vpack.c.bf16 %v3471_v31, %v3470_v19 }
 0xf25   :  { %3784 = vperm.xlu1 %4634, %v3605_v2   ;;  %3628 = vperm.xlu0 %4635, %v3553_v17   ;;  %v3501_v17 = vpack.c.bf16 %v3459_v10, %v3458_v34 }
 0xf27   :  { %v3590_v2 = vunpack.c.l.b16 %v3501_v17 }
 0xf29   :  { %3703 = vperm.xlu1 %4634, %v3578_v47   ;;  %3673 = vperm.xlu0 %4635, %v3568_v58   ;;  %v3476_v47 = vmul.f32 %v7510_v38, %v6768_v15  ;;  %v7511_v58 = vld [vmem:[#allocation61_spill] sm:$0xff] }
 0xf2d   :  { %3745 = vperm.xlu1 %4634, %v3592_v49   ;;  %3715 = vperm.xlu0 %4635, %v3582_v25   ;;  %v3477_v25 = vmul.f32 %v7511_v58, %v6768_v15  ;;  %v3599_v15 = vunpack.c.h.b16 %v6776_v20 }
 0xf2f   :  { %v3510_v49 = vpack.c.bf16 %v3477_v25, %v3476_v47 }
 0xf31   :  { %3787 = vperm.xlu1 %4634, %v3606_v53   ;;  %3736 = vperm.xlu0 %4635, %v3589_v55   ;;  %v3609_v18 = vunpack.c.h.b16 %v3510_v49  ;;  %v3591_v53 = vunpack.c.h.b16 %v3501_v17  ;;  %v3604_v55 = vunpack.c.l.b16 %v6784_v36  ;;  %v3608_v40 = vunpack.c.l.b16 %v3510_v49 }
 0xf32   :  { %v7516_v49 = vmov 0.0  }
 0xf33   :  { %4587 = vmatprep.mubr.msk.bf16.mxu1 %vm4898_vm15, %v7516_v49  ;;  %4607 = vmatprep.mubr.msk.bf16.mxu0 %vm4898_vm15, %v7516_v49 }
 0xf34   :  { %4593 = vmatprep.subr.bf16.mxu0 %v7516_v49 }
 0xf35   :  { %3727 = vperm.xlu1 %4634, %v3586_v29   ;;  %3655 = vperm.xlu0 %4635, %v3562_v51   ;;  %v3602_v51 = vunpack.c.l.b16 %v3507_v48 }
 0xf39   :  { %3769 = vperm.xlu1 %4634, %v3600_v27   ;;  %3697 = vperm.xlu0 %4635, %v3576_v46   ;;  %v3603_v46 = vunpack.c.h.b16 %v3507_v48 }
 0xf3d   :  { %3730 = vperm.xlu1 %4634, %v3587_v24   ;;  %3739 = vperm.xlu0 %4635, %v3590_v2  }
 0xf41   :  { %3772 = vperm.xlu1 %4634, %v3601_v33   ;;  %3760 = vperm.xlu0 %4635, %v3597_v44  }
 0xf45   :  { %3754 = vperm.xlu1 %4634, %v3595_v28   ;;  %3658 = vperm.xlu0 %4635, %v3563_v7  }
 0xf49   :  { %3796 = vperm.xlu1 %4634, %v3609_v18   ;;  %3700 = vperm.xlu0 %4635, %v3577_v52   ;;  %v4661_v52 = vld [vmem:[%s7068_s7 + $0x8] sm:$0xff]  }
 0xf4a   :  { %4594 = vmatpush3.bf16.msra.mxu0 %v4661_v52 }
 0xf4b   :  { %4595 = vmatprep.subr.bf16.mxu0 %v7516_v49 }
 0xf4d   :  { %3799 = vperm.xlu1 %4634, %v3610_v60   ;;  %3742 = vperm.xlu0 %4635, %v3591_v53  }
 0xf51   :  { %3781 = vperm.xlu0 %4635, %v3604_v55   ;;  %v4662_v55 = vld [vmem:[%s7068_s7 + $0x10] sm:$0xff]  }
 0xf52   :  { %4596 = vmatpush3.bf16.msra.mxu0 %v4662_v55 }
 0xf53   :  { %4597 = vmatprep.subr.bf16.mxu0 %v7516_v49 }
 0xf55   :  { %3682 = vperm.xlu0 %4635, %v3571_v9  }
 0xf59   :  { %3724 = vperm.xlu0 %4635, %v3585_v14  }
 0xf5d   :  { %3766 = vperm.xlu0 %4635, %v3599_v15  }
 0xf61   :  { %3706 = vperm.xlu0 %4635, %v3579_v30  }
 0xf65   :  { %3748 = vperm.xlu0 %4635, %v3593_v39   ;;  %v4663_v39 = vld [vmem:[%s7068_s7 + $0x18] sm:$0xff]  }
 0xf66   :  { %4598 = vmatpush3.bf16.msra.mxu0 %v4663_v39 }
 0xf67   :  { %4599 = vmatprep.subr.bf16.mxu0 %v7516_v49 }
 0xf68   :  { %v3647_v22 = vpop.permute.xlu1 %3646  ;;  %v3614_v36 = vpop.permute.xlu0 %3613 }
 0xf69   :  { %3790 = vperm.xlu0 %4635, %v3607_v32   ;;  %v3807_v8 = vrot.slane %v3614_v36, %v7319_v23  ;;  %v3860_v44 = vrot.slane %v3647_v22, %v7320_v3 }
 0xf6c   :  { %v3650_v20 = vpop.permute.xlu1 %3649  ;;  %v3617_v37 = vpop.permute.xlu0 %3616 }
 0xf6d   :  { %v3811_v54 = vrot.slane %v3617_v37, %v7318_v16  ;;  %3751 = vperm.xlu0 %4635, %v3594_v63   ;;  %v3865_v33 = vrot.slane %v3650_v20, %v7321_v57  ;;  %v4664_v63 = vld [vmem:[%s7068_s7 + $0x20] sm:$0xff]   ;;  %v4665_v20 = vld [vmem:[%s7068_s7 + $0x28] sm:$0xff]  }
 0xf6e   :  { %4600 = vmatpush3.bf16.msra.mxu0 %v4664_v63 }
 0xf6f   :  { %v3812_v12 = vsel %vm251_vm0, %v3811_v54, %v3807_v8  ;;  %4601 = vmatprep.subr.bf16.mxu0 %v7516_v49 }
 0xf70   :  { %v6858_v34 = vpop.permute.xlu1 %3691  ;;  %v3638_v29 = vpop.permute.xlu0 %3637 }
 0xf71   :  { %3793 = vperm.xlu0 %4635, %v3608_v40   ;;  %v3846_v35 = vrot.slane %v3638_v29, %v7319_v23  ;;  %v3933_v31 = vrot.slane %v6858_v34, %v7453_v43  ;;  %v4666_v29 = vld [vmem:[%s7068_s7 + $0x30] sm:$0xff]  }
 0xf72   :  { %4602 = vmatpush3.bf16.msra.mxu0 %v4665_v20 }
 0xf73   :  { %4603 = vmatprep.subr.bf16.mxu0 %v7516_v49 }
 0xf74   :  { %v6860_v50 = vpop.permute.xlu1 %3712  ;;  %v3641_v11 = vpop.permute.xlu0 %3640 }
 0xf75   :  { %v3850_v10 = vrot.slane %v3641_v11, %v7318_v16  ;;  %3775 = vperm.xlu0 %4635, %v3602_v51  }
 0xf76   :  { %4604 = vmatpush3.bf16.msra.mxu0 %v4666_v29 }
 0xf77   :  { %v3851_v27 = vsel %vm251_vm0, %v3850_v10, %v3846_v35  ;;  %4605 = vmatprep.subr.bf16.mxu0 %v7516_v49 }
 0xf78   :  { %v3620_v17 = vpop.permute.xlu0 %3619  ;;  %v3653_v24 = vpop.permute.xlu1 %3652 }
 0xf79   :  { %v3816_v2 = vrot.slane %v3620_v17, %v7453_v43  ;;  %3778 = vperm.xlu0 %4635, %v3603_v46   ;;  %v3870_v47 = vrot.slane %v3653_v24, %v7322_v42  ;;  %v3967_v17 = vrot.slane %v6860_v50, %v7318_v16 }
 0xf7b   :  { %v3817_v6 = vsel %vm258_vm1, %v3816_v2, %v3812_v12 }
 0xf7c   :  { %v3644_v5 = vpop.permute.xlu0 %3643  ;;  %v3695_v45 = vpop.permute.xlu1 %3694 }
 0xf7d   :  { %v3855_v41 = vrot.slane %v3644_v5, %v7453_v43  ;;  %3802 = vperm.xlu0 %4635, %v3611_v0   ;;  %v3938_v37 = vrot.slane %v3695_v45, %v7320_v3 }
 0xf7f   :  { %v3856_v38 = vsel %vm258_vm1, %v3855_v41, %v3851_v27 }
 0xf80   :  { %v3861_v58 = vsel %vm265_vm2, %v3860_v44, %v3856_v38  ;;  %v3662_v25 = vpop.permute.xlu0 %3661  ;;  %v6882_v59 = vpop.permute.xlu1 %3733 }
 0xf81   :  { %v3866_v7 = vsel %vm272_vm3, %v3865_v33, %v3861_v58  ;;  %v3885_v13 = vrot.slane %v3662_v25, %v7319_v23  ;;  %v4002_v1 = vrot.slane %v6882_v59, %v7319_v23 }
 0xf82   :  { %v6875_v28 = vsel %vm279_vm4, %v3870_v47, %v3866_v7 }
 0xf84   :  { %v3665_v4 = vpop.permute.xlu0 %3664  ;;  %v3632_v9 = vpop.permute.xlu1 %3631 }
 0xf85   :  { %v3889_v18 = vrot.slane %v3665_v4, %v7318_v16  ;;  %v3836_v41 = vrot.slane %v3632_v9, %v7323_v56 }
 0xf87   :  { %v3890_v26 = vsel %vm251_vm0, %v3889_v18, %v3885_v13 }
 0xf88   :  { %v3623_v60 = vpop.permute.xlu0 %3622  ;;  %v6903_v36 = vpop.permute.xlu1 %3676 }
 0xf89   :  { %v3821_v53 = vrot.slane %v3623_v60, %v7320_v3 }
 0xf8b   :  { %v3822_v14 = vsel %vm265_vm2, %v3821_v53, %v3817_v6 }
 0xf8c   :  { %v3668_v15 = vpop.permute.xlu0 %3667  ;;  %v6917_v8 = vpop.permute.xlu1 %3718 }
 0xf8d   :  { %v3894_v30 = vrot.slane %v3668_v15, %v7453_v43 }
 0xf8f   :  { %v3895_v32 = vsel %vm258_vm1, %v3894_v30, %v3890_v26 }
 0xf90   :  { %v3686_v22 = vpop.permute.xlu0 %3685  ;;  %v6931_v35 = vpop.permute.xlu1 %3757 }
 0xf91   :  { %v3924_v19 = vrot.slane %v3686_v22, %v7319_v23 }
 0xf94   :  { %v3689_v61 = vpop.permute.xlu0 %3688  ;;  %v3635_v2 = vpop.permute.xlu1 %3634 }
 0xf95   :  { %v3928_v21 = vrot.slane %v3689_v61, %v7318_v16  ;;  %v3841_v39 = vrot.slane %v3635_v2, %v7324_v62 }
 0xf97   :  { %v3929_v54 = vsel %vm251_vm0, %v3928_v21, %v3924_v19 }
 0xf98   :  { %v3934_v12 = vsel %vm258_vm1, %v3933_v31, %v3929_v54  ;;  %v3626_v40 = vpop.permute.xlu0 %3625  ;;  %v3680_v38 = vpop.permute.xlu1 %3679 }
 0xf99   :  { %v3826_v48 = vrot.slane %v3626_v40, %v7321_v57  ;;  %v6924_v34 = vsel %vm265_vm2, %v3938_v37, %v3934_v12  ;;  %v3909_v37 = vrot.slane %v6903_v36, %v7322_v42  ;;  %v3914_v40 = vrot.slane %v3680_v38, %v7323_v56 }
 0xf9b   :  { %v3827_v51 = vsel %vm272_vm3, %v3826_v48, %v3822_v14 }
 0xf9c   :  { %v3671_v11 = vpop.permute.xlu0 %3670  ;;  %v3722_v7 = vpop.permute.xlu1 %3721 }
 0xf9d   :  { %v3899_v10 = vrot.slane %v3671_v11, %v7320_v3 }
 0xf9f   :  { %v3900_v27 = vsel %vm265_vm2, %v3899_v10, %v3895_v32  ;;  %v3977_v10 = vrot.slane %v6917_v8, %v7320_v3 }
 0xfa0   :  { %v3710_v46 = vpop.permute.xlu0 %3709  ;;  %v6952_v26 = vpop.permute.xlu1 %3763 }
 0xfa1   :  { %v3963_v24 = vrot.slane %v3710_v46, %v7319_v23 }
 0xfa3   :  { %v3968_v6 = vsel %vm251_vm0, %v3967_v17, %v3963_v24 }
 0xfa4   :  { %v3629_v0 = vpop.permute.xlu0 %3628  ;;  %v6957_v9 = vpop.permute.xlu1 %3784 }
 0xfa5   :  { %v3831_v5 = vrot.slane %v3629_v0, %v7322_v42 }
 0xfa7   :  { %v3832_v44 = vsel %vm279_vm4, %v3831_v5, %v3827_v51 }
 0xfa8   :  { %v3837_v33 = vsel %vm286_vm5, %v3836_v41, %v3832_v44  ;;  %v3674_v45 = vpop.permute.xlu0 %3673  ;;  %v3704_v30 = vpop.permute.xlu1 %3703 }
 0xfa9   :  { %v3904_v47 = vrot.slane %v3674_v45, %v7321_v57  ;;  %v3842_v63 = vsel %vm293_vm6, %v3841_v39, %v3837_v33 }
 0xfab   :  { %v3905_v50 = vsel %vm272_vm3, %v3904_v47, %v3900_v27  ;;  %v3953_v47 = vrot.slane %v3704_v30, %v7323_v56 }
 0xfac   :  { %v3716_v58 = vpop.permute.xlu0 %3715  ;;  %v3746_v22 = vpop.permute.xlu1 %3745  ;;  %v3910_v54 = vsel %vm279_vm4, %v3909_v37, %v3905_v50 }
 0xfad   :  { %v3972_v25 = vrot.slane %v3716_v58, %v7453_v43  ;;  %v3915_v51 = vsel %vm286_vm5, %v3914_v40, %v3910_v54 }
 0xfaf   :  { %v3973_v49 = vsel %vm258_vm1, %v3972_v25, %v3968_v6  ;;  %v3982_v6 = vrot.slane %v3722_v7, %v7321_v57 }
 0xfb0   :  { %v3737_v4 = vpop.permute.xlu0 %3736  ;;  %v6966_v31 = vpop.permute.xlu1 %3787  ;;  %v3978_v36 = vsel %vm265_vm2, %v3977_v10, %v3973_v49 }
 0xfb1   :  { %v4006_v13 = vrot.slane %v3737_v4, %v7318_v16  ;;  %v3983_v41 = vsel %vm272_vm3, %v3982_v6, %v3978_v36 }
 0xfb3   :  { %v4007_v18 = vsel %vm251_vm0, %v4006_v13, %v4002_v1 }
 0xfb4   :  { %v3656_v52 = vpop.permute.xlu0 %3655  ;;  %v3728_v12 = vpop.permute.xlu1 %3727 }
 0xfb5   :  { %v3875_v60 = vrot.slane %v3656_v52, %v7323_v56  ;;  %v3992_v33 = vrot.slane %v3728_v12, %v7323_v56 }
 0xfb7   :  { %v3876_v53 = vsel %vm286_vm5, %v3875_v60, %v6875_v28 }
 0xfb8   :  { %v3698_v55 = vpop.permute.xlu0 %3697  ;;  %v3770_v17 = vpop.permute.xlu1 %3769 }
 0xfb9   :  { %v3943_v24 = vrot.slane %v3698_v55, %v7321_v57 }
 0xfbb   :  { %v3944_v8 = vsel %vm272_vm3, %v3943_v24, %v6924_v34 }
 0xfbc   :  { %v3740_v14 = vpop.permute.xlu0 %3739  ;;  %v3731_v45 = vpop.permute.xlu1 %3730 }
 0xfbd   :  { %v3997_v7 = vrot.slane %v3731_v45, %v7324_v62  ;;  %v4011_v52 = vrot.slane %v3740_v14, %v7453_v43 }
 0xfc0   :  { %v6959_v15 = vpop.permute.xlu0 %3760  ;;  %v3773_v60 = vpop.permute.xlu1 %3772 }
 0xfc4   :  { %v3659_v59 = vpop.permute.xlu0 %3658 }
 0xfc5   :  { %v3880_v32 = vrot.slane %v3659_v59, %v7324_v62  ;;  %v4012_v59 = vsel %vm258_vm1, %v4011_v52, %v4007_v18 }
 0xfc7   :  { %v3881_v61 = vsel %vm293_vm6, %v3880_v32, %v3876_v53 }
 0xfc8   :  { %v4116_v19 = vsel %vm295_vm8, %v3881_v61, %v3842_v63  ;;  %v3701_v28 = vpop.permute.xlu0 %3700  ;;  %v4021_v63 = vrot.slane %v3746_v22, %v7321_v57  ;;  %v3755_v61 = vpop.permute.xlu1 %3754 }
 0xfc9   :  { %v3948_v0 = vrot.slane %v3701_v28, %v7322_v42  ;;  %v4036_v18 = vrot.slane %v3755_v61, %v7324_v62 }
 0xfcb   :  { %v3949_v38 = vsel %vm279_vm4, %v3948_v0, %v3944_v8 }
 0xfcc   :  { %v3743_v21 = vpop.permute.xlu0 %3742  ;;  %v3954_v49 = vsel %vm286_vm5, %v3953_v47, %v3949_v38  ;;  %v3797_v10 = vpop.permute.xlu1 %3796 }
 0xfcd   :  { %v4016_v55 = vrot.slane %v3743_v21, %v7320_v3  ;;  %v4041_v21 = vrot.slane %v6931_v35, %v7319_v23  ;;  %v4084_v35 = vrot.slane %v6957_v9, %v7318_v16 }
 0xfcf   :  { %v4017_v39 = vsel %vm265_vm2, %v4016_v55, %v4012_v59 }
 0xfd0   :  { %v6968_v20 = vpop.permute.xlu0 %3781  ;;  %v4022_v14 = vsel %vm272_vm3, %v4021_v63, %v4017_v39 }
 0xfd1   :  { %v4080_v12 = vrot.slane %v6968_v20, %v7319_v23 }
 0xfd3   :  { %v4085_v23 = vsel %vm251_vm0, %v4084_v35, %v4080_v12 }
 0xfd4   :  { %v3683_v48 = vpop.permute.xlu0 %3682 }
 0xfd5   :  { %v3919_v29 = vrot.slane %v3683_v48, %v7324_v62 }
 0xfd7   :  { %v3920_v11 = vsel %vm293_vm6, %v3919_v29, %v3915_v51  ;;  %v4050_v51 = vrot.slane %v6952_v26, %v7453_v43 }
 0xfd8   :  { %v4117_v27 = vsel %vm296_vm9, %v3920_v11, %v4116_v19  ;;  %v3725_v46 = vpop.permute.xlu0 %3724  ;;  %v4045_v19 = vrot.slane %v6959_v15, %v7318_v16 }
 0xfd9   :  { %v3987_v2 = vrot.slane %v3725_v46, %v7322_v42  ;;  %v4089_v46 = vrot.slane %v6966_v31, %v7453_v43  ;;  %v4104_v31 = vrot.slane %v3797_v10, %v7322_v42 }
 0xfda   :  { %v4046_v40 = vsel %vm251_vm0, %v4045_v19, %v4041_v21 }
 0xfdb   :  { %v3988_v44 = vsel %vm279_vm4, %v3987_v2, %v3983_v41  ;;  %v4051_v20 = vsel %vm258_vm1, %v4050_v51, %v4046_v40  ;;  %v4060_v2 = vrot.slane %v3770_v17, %v7321_v57  ;;  %v4090_v16 = vsel %vm258_vm1, %v4089_v46, %v4085_v23  ;;  %v3800_v41 = vpop.permute.xlu1 %3799 }
 0xfdc   :  { %v3767_v5 = vpop.permute.xlu0 %3766  ;;  %v3993_v58 = vsel %vm286_vm5, %v3992_v33, %v3988_v44  ;;  %v4109_v33 = vrot.slane %v3800_v41, %v7323_v56 }
 0xfdd   :  { %v3998_v4 = vsel %vm293_vm6, %v3997_v7, %v3993_v58  ;;  %v4055_v15 = vrot.slane %v3767_v5, %v7320_v3 }
 0xfdf   :  { %v4056_v36 = vsel %vm265_vm2, %v4055_v15, %v4051_v20 }
 0xfe0   :  { %v3707_v50 = vpop.permute.xlu0 %3706  ;;  %v4061_v9 = vsel %vm272_vm3, %v4060_v2, %v4056_v36 }
 0xfe1   :  { %v3958_v25 = vrot.slane %v3707_v50, %v7324_v62 }
 0xfe3   :  { %v3959_v34 = vsel %vm293_vm6, %v3958_v25, %v3954_v49 }
 0xfe4   :  { %v4118_v1 = vsel %vm298_vm10, %v3959_v34, %v4117_v27  ;;  %v3749_v13 = vpop.permute.xlu0 %3748 }
 0xfe5   :  { %v4119_v53 = vsel %vm300_vm11, %v3998_v4, %v4118_v1  ;;  %v4026_v32 = vrot.slane %v3749_v13, %v7322_v42  ;;  %v4376_v13 = vld [vmem:[%s7069_s8] ss:$0 sm:$0xff] }
 0xfe7   :  { %v4027_v54 = vsel %vm279_vm4, %v4026_v32, %v4022_v14 }
 0xfe8   :  { %v3791_v30 = vpop.permute.xlu0 %3790 }
 0xfe9   :  { %v4094_v27 = vrot.slane %v3791_v30, %v7320_v3  ;;  %v4065_v3 = vrot.slane %v3773_v60, %v7322_v42 }
 0xfeb   :  { %v4095_v6 = vsel %vm265_vm2, %v4094_v27, %v4090_v16 }
 0xfec   :  { %v3752_v28 = vpop.permute.xlu0 %3751 }
 0xfed   :  { %v4031_v37 = vrot.slane %v3752_v28, %v7323_v56 }
 0xfef   :  { %v4032_v22 = vsel %vm286_vm5, %v4031_v37, %v4027_v54 }
 0xff0   :  { %v4037_v48 = vsel %vm293_vm6, %v4036_v18, %v4032_v22  ;;  %v3794_v29 = vpop.permute.xlu0 %3793 }
 0xff1   :  { %v4120_v11 = vsel %vm302_vm12, %v4037_v48, %v4119_v53  ;;  %v4099_v24 = vrot.slane %v3794_v29, %v7321_v57  ;;  %v4066_v57 = vsel %vm279_vm4, %v4065_v3, %v4061_v9 }
 0xff3   :  { %v4100_v5 = vsel %vm272_vm3, %v4099_v24, %v4095_v6 }
 0xff4   :  { %v3776_v26 = vpop.permute.xlu0 %3775  ;;  %v4105_v17 = vsel %vm279_vm4, %v4104_v31, %v4100_v5 }
 0xff5   :  { %v4070_v0 = vrot.slane %v3776_v26, %v7323_v56  ;;  %v4110_v50 = vsel %vm286_vm5, %v4109_v33, %v4105_v17  ;;  %v4667_v56 = vld [vmem:[%s7068_s7 + $0x38] sm:$0xff]  }
 0xff6   :  { %4606 = vmatpush3.bf16.msra.mxu0 %v4667_v56 }
 0xff7   :  { %v4071_v44 = vsel %vm286_vm5, %v4070_v0, %v4066_v57 }
 0xff8   :  { %v3779_v43 = vpop.permute.xlu0 %3778 }
 0xff9   :  { %v4075_v8 = vrot.slane %v3779_v43, %v7324_v62 }
 0xffb   :  { %v4076_v45 = vsel %vm293_vm6, %v4075_v8, %v4071_v44 }
 0xffc   :  { %v3803_v38 = vpop.permute.xlu0 %3802  ;;  %v4121_v42 = vsel %vm304_vm13, %v4076_v45, %v4120_v11 }
 0xffd   :  { %v4114_v47 = vrot.slane %v3803_v38, %v7324_v62 }
 0xfff   :  { %v4115_v58 = vsel %vm293_vm6, %v4114_v47, %v4110_v50 }
0x1000   :  { %v4122_v25 = vsel %vm306_vm14, %v4115_v58, %v4121_v42 }
0x1001   :  { %v4123_v7 = vpack.c.b16 %v4122_v25, %v4122_v25 }
0x1003   :  { %4588 = vmatmul.mubr.msk.bf16.vlgmr.msra.gmra.mrb[32].mxu1 %vm357_vm7, %v4123_v7 }
0x10d6   :  { %v4161_v49 = vpop.f32.mrb[32].mxu1 }
0x10d7   :  { %v4167_v34 = vpack.c.bf16 %v4161_v49, %v4161_v49  ;;  %v4589_v4 = vpop.f32.mrb[33].mxu1 }
0x10d8   :  { %v4164_v62 = vpop.f32.mrb[34].mxu1 }
0x10d9   :  { %v4590_v1 = vpop.f32.mrb[35].mxu1  ;;  %4608 = vmatmul.mubr.bf16.vlgmr.msra.gmra.mrb[16].mxu0 %v4167_v34 }
0x11ac   :  { %v4273_v52 = vpop.f32.mrb[16].mxu0 }
0x11ad   :  { %v4274_v60 = vadd.f32 %v4376_v13, %v4273_v52  ;;  %v4609_v53 = vpop.f32.mrb[17].mxu0 }
0x11ae   :  { %v4276_v55 = vpop.f32.mrb[18].mxu0 }
0x11af   :  { %4279 = vst [vmem:[%s7070_s9] sm:$0xff] %v4274_v60  ;;  %v4610_v30 = vpop.f32.mrb[19].mxu0 }

</bundles_post_ra>
